<compile_context>
chip_gen: v7x
topology: tpu7x:2x2x1
jax: 0.10.0
libtpu: 0.0.40
codegen_flags: <defaults>
</compile_context>

<pallas_src>
import functools
import math

import jax
import jax.numpy as jnp
from jax.experimental import pallas as pl
from jax.experimental.pallas import tpu as pltpu

# ----------------------------- config -------------------------------------
PIXEL_MEAN = jnp.array([103.530, 116.280, 123.675], dtype=jnp.float32)
PIXEL_STD = jnp.array([1.0, 1.0, 1.0], dtype=jnp.float32)

BACKBONE_F = 32          # backbone output channels
BACKBONE_STRIDE = 2      # backbone total stride
ANCHOR_SIZES = (8.0, 16.0, 32.0)
NUM_ANCHORS = len(ANCHOR_SIZES)
NUM_PROPOSALS = 16       # post-top-k proposals per image
POOL = 7                 # ROI pooled resolution
HEAD_DIM = 256           # box-head FC width
NUM_CLASSES = 8          # foreground classes (background is the last logit)
BBOX_REG_WEIGHTS = (10.0, 10.0, 5.0, 5.0)   # detectron2 ROI-head Box2BoxTransform weights

RPN_OUT = 128            # lane-dense fused RPN head width: obj in [0,3), deltas in [3,15), rest 0
HEAD_OUT = 128           # lane-dense fused predictor width: cls in [0,9), bbox in [9,41), rest 0

# ----------------------------- Pallas kernels ------------------------------


def _fused_backbone_rpn_kernel(ev_ref, od_ref, wb_ref, bb_ref, wr_ref, br_ref,
                               wh_ref, bh_ref, feat_ref, rpn_ref,
                               imb_ref, fpad_ref, imr_ref, *, ho, wo, c, f):
    """One image per grid step: backbone 3x3 stride-2 conv -> ReLU -> (bf16 feat to HBM) ->
    RPN 3x3 conv -> ReLU -> fused 1x1 objectness/box heads (lane-dense 128-wide slab)."""
    hw = ho * wo
    taps = [(i, j) for i in range(3) for j in range(3)]

    # ---- backbone: stride-2 3x3 conv over the mean-padded image (pixel normalization is
    # folded into the weights/bias).  Each stride-2 tap is a static slice of the even/odd row
    # planes (W pairs folded into channels), so there is no HBM im2col and no strided load.
    # In-kernel im2col into VMEM scratch -> one K=27 contraction.
    for t, (dy, dx) in enumerate(taps):
        src = od_ref if dy == 1 else ev_ref
        ay = 1 if dy == 2 else 0
        ax = 1 if dx == 2 else 0
        c0 = c if dx == 1 else 0
        patch = src[0, pl.ds(ay, ho), pl.ds(ax, wo), pl.ds(c0, c)]       # (ho, wo, c) bf16
        imb_ref[:, pl.ds(t * c, c)] = patch.reshape(hw, c)
    h = jnp.dot(imb_ref[...], wb_ref[...], preferred_element_type=jnp.float32)
    h = jnp.maximum(h + bb_ref[...], 0.0)                                # (hw, f) f32
    # TODO(synk): feat is stored with 32 of 128 lanes used; packing 4 positions per 128-lane
    # row would need a minor-dim reshape in-kernel — left as-is since the only consumer is the
    # JAX-side ROI gather.
    feat_ref[0] = h.astype(jnp.bfloat16)                                 # bf16 feat, written once

    # ---- RPN: zero-padded feature lives in a VMEM scratch (no jnp.pad HBM copy); in-kernel
    # im2col into a (hw, 9f) scratch -> single K=288 contraction, then the fused heads.
    fpad_ref[...] = jnp.zeros_like(fpad_ref)
    fpad_ref[pl.ds(1, ho), pl.ds(1, wo), :] = h.reshape(ho, wo, f)
    for t, (dy, dx) in enumerate(taps):
        p = fpad_ref[pl.ds(dy, ho), pl.ds(dx, wo), :]                    # (ho, wo, f) f32
        imr_ref[:, pl.ds(t * f, f)] = p.reshape(hw, f).astype(jnp.bfloat16)
    r = jnp.dot(imr_ref[...], wr_ref[...], preferred_element_type=jnp.float32)
    r = jnp.maximum(r + br_ref[...], 0.0)                                # (hw, f) f32
    out = jnp.dot(r.astype(jnp.bfloat16), wh_ref[...],
                  preferred_element_type=jnp.float32) + bh_ref[...]
    rpn_ref[0] = out                                                     # (hw, 128) f32, lane-dense


def pallas_backbone_rpn(img_ev, img_od, iw, Ho, Wo):
    """img_ev/img_od: (N, Ho+1, Wo+1, 2*C) bf16 even/odd row planes of the mean-padded image.
    Returns (feat (N, Ho*Wo, F) bf16, rpn slab (N, Ho*Wo, 128) f32)."""
    N = img_ev.shape[0]
    C = img_ev.shape[-1] // 2
    F = BACKBONE_F
    # TODO(synk): spatial (row-tile + halo) blocking for large detection resolutions needs
    # manual make_async_copy halo staging (BlockSpec windows cannot overlap); whole-image
    # blocks are used here and fit easily under the explicit 32 MiB scoped-VMEM limit.
    return pl.pallas_call(
        functools.partial(_fused_backbone_rpn_kernel, ho=Ho, wo=Wo, c=C, f=F),
        out_shape=(jax.ShapeDtypeStruct((N, Ho * Wo, F), jnp.bfloat16),
                   jax.ShapeDtypeStruct((N, Ho * Wo, RPN_OUT), jnp.float32)),
        grid=(N,),
        in_specs=[
            pl.BlockSpec((1, Ho + 1, Wo + 1, 2 * C), lambda n: (n, 0, 0, 0)),
            pl.BlockSpec((1, Ho + 1, Wo + 1, 2 * C), lambda n: (n, 0, 0, 0)),
            pl.BlockSpec((9 * C, F), lambda n: (0, 0)),
            pl.BlockSpec((1, F), lambda n: (0, 0)),
            pl.BlockSpec((9 * F, F), lambda n: (0, 0)),
            pl.BlockSpec((1, F), lambda n: (0, 0)),
            pl.BlockSpec((F, RPN_OUT), lambda n: (0, 0)),
            pl.BlockSpec((1, RPN_OUT), lambda n: (0, 0)),
        ],
        out_specs=(pl.BlockSpec((1, Ho * Wo, F), lambda n: (n, 0, 0)),
                   pl.BlockSpec((1, Ho * Wo, RPN_OUT), lambda n: (n, 0, 0))),
        scratch_shapes=[
            pltpu.VMEM((Ho * Wo, 9 * C), jnp.bfloat16),   # backbone im2col
            pltpu.VMEM((Ho + 2, Wo + 2, F), jnp.float32),  # zero-padded feature for RPN conv
            pltpu.VMEM((Ho * Wo, 9 * F), jnp.bfloat16),   # RPN im2col (K=288)
        ],
        compiler_params=pltpu.CompilerParams(
            dimension_semantics=("parallel",),
            vmem_limit_bytes=32 * 1024 * 1024),
    )(img_ev, img_od,
      iw["backbone_w"], iw["backbone_b"].reshape(1, F),
      iw["rpn_conv_w"], iw["rpn_conv_b"].reshape(1, F),
      iw["rpn_head_w"], iw["rpn_head_b"].reshape(1, RPN_OUT))


def _box_head_kernel(x_ref, w1_ref, b1_ref, w2_ref, b2_ref, w3_ref, b3_ref, o_ref):
    # Fully fused box head: fc1 -> ReLU -> fc2 -> ReLU -> fused cls+bbox predictor.
    # All weights VMEM-resident, intermediates never touch HBM, one lane-dense output slab.
    h1 = jnp.dot(x_ref[...], w1_ref[...], preferred_element_type=jnp.float32) + b1_ref[...]
    h1 = jnp.maximum(h1, 0.0)
    h2 = jnp.dot(h1.astype(jnp.bfloat16), w2_ref[...],
                 preferred_element_type=jnp.float32) + b2_ref[...]
    h2 = jnp.maximum(h2, 0.0)
    o_ref[...] = jnp.dot(h2.astype(jnp.bfloat16), w3_ref[...],
                         preferred_element_type=jnp.float32) + b3_ref[...]


def pallas_box_head(roi_feats_bf16, w1, b1, w2, b2, w3, b3):
    # TODO(synk): K-tiled pipelining / cross-call prefetch of the fc1 weight DMA skipped: at
    # M=32 rows the per-grid-step overhead would exceed the ~1 us of exposed weight DMA.
    M = roi_feats_bf16.shape[0]
    vmem = pl.BlockSpec(memory_space=pltpu.MemorySpace.VMEM)
    return pl.pallas_call(
        _box_head_kernel,
        out_shape=jax.ShapeDtypeStruct((M, HEAD_OUT), jnp.float32),
        in_specs=[vmem] * 7,
        out_specs=vmem,
    )(roi_feats_bf16, w1, b1.reshape(1, -1), w2, b2.reshape(1, -1), w3, b3.reshape(1, -1))


# ----------------------------- JAX glue -------------------------------------


def make_anchors(Ho, Wo, stride):
    ys = (jnp.arange(Ho, dtype=jnp.float32) + 0.5) * stride
    xs = (jnp.arange(Wo, dtype=jnp.float32) + 0.5) * stride
    cy, cx = jnp.meshgrid(ys, xs, indexing="ij")          # (Ho, Wo)
    sizes = jnp.array(ANCHOR_SIZES, dtype=jnp.float32)    # (A,)
    cx = cx[..., None]
    cy = cy[..., None]
    half = sizes / 2.0
    boxes = jnp.stack([cx - half, cy - half, cx + half, cy + half], axis=-1)
    return boxes.reshape(-1, 4)                            # (Ho*Wo*A, 4)


def decode_boxes(boxes, deltas, weights=(1.0, 1.0, 1.0, 1.0)):
    wx, wy, ww, whh = weights
    w = boxes[..., 2] - boxes[..., 0]
    h = boxes[..., 3] - boxes[..., 1]
    cx = boxes[..., 0] + 0.5 * w
    cy = boxes[..., 1] + 0.5 * h
    dx = deltas[..., 0] / wx
    dy = deltas[..., 1] / wy
    dw = deltas[..., 2] / ww
    dh = deltas[..., 3] / whh
    clamp = math.log(1000.0 / 16.0)
    dw = jnp.minimum(dw, clamp)
    dh = jnp.minimum(dh, clamp)
    pcx = dx * w + cx
    pcy = dy * h + cy
    pw = jnp.exp(dw) * w
    ph = jnp.exp(dh) * h
    return jnp.stack(
        [pcx - 0.5 * pw, pcy - 0.5 * ph, pcx + 0.5 * pw, pcy + 0.5 * ph], axis=-1
    )


def clip_boxes(boxes, H, W):
    x1 = jnp.clip(boxes[..., 0], 0.0, float(W))
    y1 = jnp.clip(boxes[..., 1], 0.0, float(H))
    x2 = jnp.clip(boxes[..., 2], 0.0, float(W))
    y2 = jnp.clip(boxes[..., 3], 0.0, float(H))
    return jnp.stack([x1, y1, x2, y2], axis=-1)


def bilinear_sample(feat, ys, xs):
    # feat: (H, W, C) bf16; ys/xs: (P, P) in feature-map coordinates.
    H, W, _ = feat.shape
    y0 = jnp.floor(ys)
    x0 = jnp.floor(xs)
    wy1 = ys - y0
    wx1 = xs - x0
    wy0 = 1.0 - wy1
    wx0 = 1.0 - wx1
    y0c = jnp.clip(y0, 0, H - 1).astype(jnp.int32)
    y1c = jnp.clip(y0 + 1, 0, H - 1).astype(jnp.int32)
    x0c = jnp.clip(x0, 0, W - 1).astype(jnp.int32)
    x1c = jnp.clip(x0 + 1, 0, W - 1).astype(jnp.int32)
    v00 = feat[y0c, x0c]
    v01 = feat[y0c, x1c]
    v10 = feat[y1c, x0c]
    v11 = feat[y1c, x1c]
    return (v00 * (wy0 * wx0)[..., None] + v01 * (wy0 * wx1)[..., None]
            + v10 * (wy1 * wx0)[..., None] + v11 * (wy1 * wx1)[..., None])


def roi_align_one(feat, box, pooled, scale):
    # TODO(synk): simplified ROIAlign (sampling_ratio=1, no out-of-image zeroing); the
    # data-dependent bilinear gather has no clean Pallas equivalent so it stays in JAX.
    x1, y1, x2, y2 = box[0] * scale, box[1] * scale, box[2] * scale, box[3] * scale
    frac = (jnp.arange(pooled, dtype=jnp.float32) + 0.5) / pooled
    ys = y1 + frac * (y2 - y1) - 0.5
    xs = x1 + frac * (x2 - x1) - 0.5
    yg, xg = jnp.meshgrid(ys, xs, indexing="ij")
    return bilinear_sample(feat, yg, xg)  # (P, P, C)


# ----------------------------- parameters -----------------------------------


def init_params(key):
    keys = jax.random.split(key, 8)
    s = 0.01
    p = {}
    p["backbone_w"] = s * jax.random.normal(keys[0], (3 * 3 * 3, BACKBONE_F), jnp.float32)
    p["backbone_b"] = jnp.zeros((BACKBONE_F,), jnp.float32)
    p["rpn_conv_w"] = s * jax.random.normal(keys[1], (3 * 3 * BACKBONE_F, BACKBONE_F), jnp.float32)
    p["rpn_conv_b"] = jnp.zeros((BACKBONE_F,), jnp.float32)
    p["rpn_obj_w"] = s * jax.random.normal(keys[2], (BACKBONE_F, NUM_ANCHORS), jnp.float32)
    p["rpn_obj_b"] = jnp.zeros((NUM_ANCHORS,), jnp.float32)
    p["rpn_box_w"] = s * jax.random.normal(keys[3], (BACKBONE_F, 4 * NUM_ANCHORS), jnp.float32)
    p["rpn_box_b"] = jnp.zeros((4 * NUM_ANCHORS,), jnp.float32)
    p["fc1_w"] = s * jax.random.normal(keys[4], (POOL * POOL * BACKBONE_F, HEAD_DIM), jnp.float32)
    p["fc1_b"] = jnp.zeros((HEAD_DIM,), jnp.float32)
    p["fc2_w"] = s * jax.random.normal(keys[5], (HEAD_DIM, HEAD_DIM), jnp.float32)
    p["fc2_b"] = jnp.zeros((HEAD_DIM,), jnp.float32)
    p["cls_w"] = s * jax.random.normal(keys[6], (HEAD_DIM, NUM_CLASSES + 1), jnp.float32)
    p["cls_b"] = jnp.zeros((NUM_CLASSES + 1,), jnp.float32)
    p["bbox_w"] = s * jax.random.normal(keys[7], (HEAD_DIM, 4 * NUM_CLASSES), jnp.float32)
    p["bbox_b"] = jnp.zeros((4 * NUM_CLASSES,), jnp.float32)
    return p


def prepare_inference_weights(params):
    """Fold pixel normalization into the backbone conv, fuse/pad head weights lane-dense,
    and cast all matmul operands to bf16 (biases stay f32)."""
    C = PIXEL_MEAN.shape[0]
    inv_std = 1.0 / PIXEL_STD

    # --- fold (x - mean) / std into the first conv (exact; image is padded with MEAN).
    wb = params["backbone_w"].reshape(9, C, BACKBONE_F)
    wb_fold = (wb * inv_std[None, :, None]).reshape(9 * C, BACKBONE_F)
    bb_fold = params["backbone_b"] - jnp.einsum("kcf,c->f", wb, PIXEL_MEAN * inv_std)

    # --- fuse RPN objectness + box-delta heads into one lane-dense (F, 128) weight.
    F = BACKBONE_F
    A = NUM_ANCHORS
    rpn_head_w = jnp.zeros((F, RPN_OUT), jnp.float32)
    rpn_head_w = rpn_head_w.at[:, :A].set(params["rpn_obj_w"])
    rpn_head_w = rpn_head_w.at[:, A:A + 4 * A].set(params["rpn_box_w"])
    rpn_head_b = jnp.zeros((RPN_OUT,), jnp.float32)
    rpn_head_b = rpn_head_b.at[:A].set(params["rpn_obj_b"])
    rpn_head_b = rpn_head_b.at[A:A + 4 * A].set(params["rpn_box_b"])

    # --- fuse cls + bbox predictors into one lane-dense (HEAD_DIM, 128) weight.
    KC = NUM_CLASSES + 1
    pred_w = jnp.zeros((HEAD_DIM, HEAD_OUT), jnp.float32)
    pred_w = pred_w.at[:, :KC].set(params["cls_w"])
    pred_w = pred_w.at[:, KC:KC + 4 * NUM_CLASSES].set(params["bbox_w"])
    pred_b = jnp.zeros((HEAD_OUT,), jnp.float32)
    pred_b = pred_b.at[:KC].set(params["cls_b"])
    pred_b = pred_b.at[KC:KC + 4 * NUM_CLASSES].set(params["bbox_b"])

    return {
        "backbone_w": wb_fold.astype(jnp.bfloat16),
        "backbone_b": bb_fold,
        "rpn_conv_w": params["rpn_conv_w"].astype(jnp.bfloat16),
        "rpn_conv_b": params["rpn_conv_b"],
        "rpn_head_w": rpn_head_w.astype(jnp.bfloat16),
        "rpn_head_b": rpn_head_b,
        "fc1_w": params["fc1_w"].astype(jnp.bfloat16),
        "fc1_b": params["fc1_b"],
        "fc2_w": params["fc2_w"].astype(jnp.bfloat16),
        "fc2_b": params["fc2_b"],
        "pred_w": pred_w.astype(jnp.bfloat16),
        "pred_b": pred_b,
    }


# ----------------------------- forward (inference path) ---------------------


def generalized_rcnn_inference(batched_inputs, params):
    """Mirrors GeneralizedRCNN.inference: preprocess -> backbone -> RPN -> ROI heads -> postprocess."""
    iw = prepare_inference_weights(params)
    images = jnp.stack([d["image"] for d in batched_inputs]).astype(jnp.float32)  # (N, C, H, W)
    N, C, H, W = images.shape
    assert H % 2 == 0 and W % 2 == 0
    Ho, Wo = H // BACKBONE_STRIDE, W // BACKBONE_STRIDE

    # --- preprocess_image: pixel normalization is folded into the conv weights/bias, so the
    # image is only mean-padded (preserving zero-padding semantics in the normalized domain)
    # and split into even/odd row planes (W pairs folded into channels) for the in-kernel
    # stride-2 taps.  bf16 for the MXU.
    # TODO(synk): ImageList.from_tensors size-divisibility padding omitted (images already same size).
    x_nhwc = jnp.transpose(images, (0, 2, 3, 1))
    xp = jnp.broadcast_to(PIXEL_MEAN, (N, H + 2, W + 2, C))
    xp = xp.at[:, 1:H + 1, 1:W + 1, :].set(x_nhwc).astype(jnp.bfloat16)
    xp = xp.reshape(N, Ho + 1, 2, Wo + 1, 2 * C)
    img_ev = xp[:, :, 0]                                                  # rows 0,2,4,...
    img_od = xp[:, :, 1]                                                  # rows 1,3,5,...

    # --- backbone + proposal_generator head: ONE fused Pallas kernel per image.
    feat_tok, rpn_out = pallas_backbone_rpn(img_ev, img_od, iw, Ho, Wo)
    feat = feat_tok.reshape(N, Ho, Wo, BACKBONE_F)                        # bf16, for ROI align

    obj_logits = rpn_out[:, :, :NUM_ANCHORS].reshape(N, Ho * Wo * NUM_ANCHORS)
    rpn_deltas = rpn_out[:, :, NUM_ANCHORS:5 * NUM_ANCHORS].reshape(N, Ho * Wo * NUM_ANCHORS, 4)

    anchors = make_anchors(Ho, Wo, BACKBONE_STRIDE)                       # (Ho*Wo*A, 4)
    prop_boxes = jax.vmap(lambda d: decode_boxes(anchors, d))(rpn_deltas)
    prop_boxes = clip_boxes(prop_boxes, H, W)
    # TODO(synk): RPN NMS + min-size/score filtering have no clean Pallas equivalent; top-k only.
    _, top_idx = jax.lax.top_k(obj_logits, NUM_PROPOSALS)
    proposals = jnp.take_along_axis(prop_boxes, top_idx[..., None], axis=1)   # (N, R, 4)

    # --- roi_heads: ROI pool (JAX gather) + fully fused box head (one Pallas kernel).
    scale = 1.0 / BACKBONE_STRIDE
    pooled = jax.vmap(
        lambda f, bxs: jax.vmap(lambda b: roi_align_one(f, b, POOL, scale))(bxs)
    )(feat, proposals)                                                    # (N, R, P, P, F) f32
    roi_feats = pooled.reshape(N * NUM_PROPOSALS, POOL * POOL * BACKBONE_F)

    pred_slab = pallas_box_head(roi_feats.astype(jnp.bfloat16),
                                iw["fc1_w"], iw["fc1_b"],
                                iw["fc2_w"], iw["fc2_b"],
                                iw["pred_w"], iw["pred_b"])               # (N*R, 128)
    KC = NUM_CLASSES + 1
    cls_logits = pred_slab[:, :KC]                                        # (N*R, K+1)
    box_deltas = pred_slab[:, KC:KC + 4 * NUM_CLASSES]                    # (N*R, 4K)

    probs = jax.nn.softmax(cls_logits, axis=-1)     # tiny (N*R, K+1) softmax stays in JAX
    fg_probs = probs[:, :NUM_CLASSES]               # background is the last column
    pred_classes = jnp.argmax(fg_probs, axis=-1)
    scores = jnp.max(fg_probs, axis=-1)
    box_deltas = box_deltas.reshape(N * NUM_PROPOSALS, NUM_CLASSES, 4)
    sel_deltas = jnp.take_along_axis(box_deltas, pred_classes[:, None, None], axis=1)[:, 0, :]
    pred_boxes = decode_boxes(proposals.reshape(N * NUM_PROPOSALS, 4), sel_deltas,
                              weights=BBOX_REG_WEIGHTS)
    pred_boxes = clip_boxes(pred_boxes, H, W)
    # TODO(synk): per-class score-threshold filtering and final NMS are omitted (no Pallas equivalent).

    pred_boxes = pred_boxes.reshape(N, NUM_PROPOSALS, 4)
    scores = scores.reshape(N, NUM_PROPOSALS)
    pred_classes = pred_classes.reshape(N, NUM_PROPOSALS)

    # --- detector_postprocess: rescale boxes to requested output resolution
    processed_results = []
    for i, inp in enumerate(batched_inputs):
        oh = inp.get("height", H)
        ow = inp.get("width", W)
        sxy = jnp.array([ow / W, oh / H, ow / W, oh / H], dtype=jnp.float32)
        processed_results.append({
            "instances": {
                "pred_boxes": pred_boxes[i] * sxy,
                "scores": scores[i],
                "pred_classes": pred_classes[i],
            }
        })
    return processed_results


# ----------------------------- main ------------------------------------------

if __name__ == "__main__":
    key = jax.random.PRNGKey(0)
    pkey, ikey0, ikey1 = jax.random.split(key, 3)
    params = init_params(pkey)

    # small deterministic inputs: batch=2 images, (C, H, W) = (3, 32, 32)
    img0 = jax.random.uniform(ikey0, (3, 32, 32), jnp.float32, 0.0, 255.0)
    img1 = jax.random.uniform(ikey1, (3, 32, 32), jnp.float32, 0.0, 255.0)
    batched_inputs = [
        {"image": img0, "height": 32, "width": 32},
        {"image": img1, "height": 32, "width": 32},
    ]

    results = generalized_rcnn_inference(batched_inputs, params)
    results = jax.block_until_ready(results)

    r0 = results[0]["instances"]
    assert r0["pred_boxes"].shape == (NUM_PROPOSALS, 4)
    assert r0["scores"].shape == (NUM_PROPOSALS,)
    assert r0["pred_classes"].shape == (NUM_PROPOSALS,)
    print("KERNEL_OK")
</pallas_src>

<mosaic_0001>
module attributes {stable_mosaic.version = 11 : i64} {
  func.func @_fused_backbone_rpn_kernel(%arg0: i32, %arg1: memref<1x17x17x6xbf16, #tpu.memory_space<vmem>>, %arg2: memref<1x17x17x6xbf16, #tpu.memory_space<vmem>>, %arg3: memref<27x32xbf16, #tpu.memory_space<vmem>>, %arg4: memref<1x32xf32, #tpu.memory_space<vmem>>, %arg5: memref<288x32xbf16, #tpu.memory_space<vmem>>, %arg6: memref<1x32xf32, #tpu.memory_space<vmem>>, %arg7: memref<32x128xbf16, #tpu.memory_space<vmem>>, %arg8: memref<1x128xf32, #tpu.memory_space<vmem>>, %arg9: memref<1x256x32xbf16, #tpu.memory_space<vmem>>, %arg10: memref<1x256x128xf32, #tpu.memory_space<vmem>>, %arg11: memref<256x27xbf16, #tpu.memory_space<vmem>>, %arg12: memref<18x18x32xf32, #tpu.memory_space<vmem>>, %arg13: memref<256x288xbf16, #tpu.memory_space<vmem>>) attributes {dimension_semantics = [#tpu.dimension_semantics<parallel>], iteration_bounds = array<i64: 2>, scalar_prefetch = 0 : i64, scratch_operands = 3 : i64, tpu.core_type = #tpu.core_type<tc>, window_params = [{transform_indices = @transform_0, window_bounds = array<i64: 1, 17, 17, 6>}, {transform_indices = @transform_1, window_bounds = array<i64: 1, 17, 17, 6>}, {pipeline_mode = #tpu.pipeline_mode<synchronous>, transform_indices = @transform_2, window_bounds = array<i64: 27, 32>}, {pipeline_mode = #tpu.pipeline_mode<synchronous>, transform_indices = @transform_3, window_bounds = array<i64: 1, 32>}, {pipeline_mode = #tpu.pipeline_mode<synchronous>, transform_indices = @transform_4, window_bounds = array<i64: 288, 32>}, {pipeline_mode = #tpu.pipeline_mode<synchronous>, transform_indices = @transform_5, window_bounds = array<i64: 1, 32>}, {pipeline_mode = #tpu.pipeline_mode<synchronous>, transform_indices = @transform_6, window_bounds = array<i64: 32, 128>}, {pipeline_mode = #tpu.pipeline_mode<synchronous>, transform_indices = @transform_7, window_bounds = array<i64: 1, 128>}, {transform_indices = @transform_8, window_bounds = array<i64: 1, 256, 32>}, {transform_indices = @transform_9, window_bounds = array<i64: 1, 256, 128>}]} {
    %c0 = arith.constant 0 : index
    %c0_0 = arith.constant 0 : index
    %c0_1 = arith.constant 0 : index
    %c0_2 = arith.constant 0 : index
    %0 = vector.load %arg1[%c0, %c0_0, %c0_1, %c0_2] : memref<1x17x17x6xbf16, #tpu.memory_space<vmem>>, vector<1x16x16x3xbf16>
    %1 = vector.shape_cast %0 : vector<1x16x16x3xbf16> to vector<16x16x3xbf16>
    %2 = vector.shape_cast %1 : vector<16x16x3xbf16> to vector<256x3xbf16>
    %c0_3 = arith.constant 0 : index
    %c0_4 = arith.constant 0 : index
    %3 = vector.load %arg11[%c0_3, %c0_4] : memref<256x27xbf16, #tpu.memory_space<vmem>>, vector<256x3xbf16>
    tpu.vector_store %arg11[%c0_3, %c0_4], %2 {strides = array<i32>} : memref<256x27xbf16, #tpu.memory_space<vmem>>, vector<256x3xbf16>,
    %c0_5 = arith.constant 0 : index
    %c0_6 = arith.constant 0 : index
    %c0_7 = arith.constant 0 : index
    %c3 = arith.constant 3 : index
    %4 = vector.load %arg1[%c0_5, %c0_6, %c0_7, %c3] : memref<1x17x17x6xbf16, #tpu.memory_space<vmem>>, vector<1x16x16x3xbf16>
    %5 = vector.shape_cast %4 : vector<1x16x16x3xbf16> to vector<16x16x3xbf16>
    %6 = vector.shape_cast %5 : vector<16x16x3xbf16> to vector<256x3xbf16>
    %c0_8 = arith.constant 0 : index
    %c3_9 = arith.constant 3 : index
    %7 = vector.load %arg11[%c0_8, %c3_9] : memref<256x27xbf16, #tpu.memory_space<vmem>>, vector<256x3xbf16>
    tpu.vector_store %arg11[%c0_8, %c3_9], %6 {strides = array<i32>} : memref<256x27xbf16, #tpu.memory_space<vmem>>, vector<256x3xbf16>,
    %c0_10 = arith.constant 0 : index
    %c0_11 = arith.constant 0 : index
    %c1 = arith.constant 1 : index
    %c0_12 = arith.constant 0 : index
    %8 = vector.load %arg1[%c0_10, %c0_11, %c1, %c0_12] : memref<1x17x17x6xbf16, #tpu.memory_space<vmem>>, vector<1x16x16x3xbf16>
    %9 = vector.shape_cast %8 : vector<1x16x16x3xbf16> to vector<16x16x3xbf16>
    %10 = vector.shape_cast %9 : vector<16x16x3xbf16> to vector<256x3xbf16>
    %c0_13 = arith.constant 0 : index
    %c6 = arith.constant 6 : index
    %11 = vector.load %arg11[%c0_13, %c6] : memref<256x27xbf16, #tpu.memory_space<vmem>>, vector<256x3xbf16>
    tpu.vector_store %arg11[%c0_13, %c6], %10 {strides = array<i32>} : memref<256x27xbf16, #tpu.memory_space<vmem>>, vector<256x3xbf16>,
    %c0_14 = arith.constant 0 : index
    %c0_15 = arith.constant 0 : index
    %c0_16 = arith.constant 0 : index
    %c0_17 = arith.constant 0 : index
    %12 = vector.load %arg2[%c0_14, %c0_15, %c0_16, %c0_17] : memref<1x17x17x6xbf16, #tpu.memory_space<vmem>>, vector<1x16x16x3xbf16>
    %13 = vector.shape_cast %12 : vector<1x16x16x3xbf16> to vector<16x16x3xbf16>
    %14 = vector.shape_cast %13 : vector<16x16x3xbf16> to vector<256x3xbf16>
    %c0_18 = arith.constant 0 : index
    %c9 = arith.constant 9 : index
    %15 = vector.load %arg11[%c0_18, %c9] : memref<256x27xbf16, #tpu.memory_space<vmem>>, vector<256x3xbf16>
    tpu.vector_store %arg11[%c0_18, %c9], %14 {strides = array<i32>} : memref<256x27xbf16, #tpu.memory_space<vmem>>, vector<256x3xbf16>,
    %c0_19 = arith.constant 0 : index
    %c0_20 = arith.constant 0 : index
    %c0_21 = arith.constant 0 : index
    %c3_22 = arith.constant 3 : index
    %16 = vector.load %arg2[%c0_19, %c0_20, %c0_21, %c3_22] : memref<1x17x17x6xbf16, #tpu.memory_space<vmem>>, vector<1x16x16x3xbf16>
    %17 = vector.shape_cast %16 : vector<1x16x16x3xbf16> to vector<16x16x3xbf16>
    %18 = vector.shape_cast %17 : vector<16x16x3xbf16> to vector<256x3xbf16>
    %c0_23 = arith.constant 0 : index
    %c12 = arith.constant 12 : index
    %19 = vector.load %arg11[%c0_23, %c12] : memref<256x27xbf16, #tpu.memory_space<vmem>>, vector<256x3xbf16>
    tpu.vector_store %arg11[%c0_23, %c12], %18 {strides = array<i32>} : memref<256x27xbf16, #tpu.memory_space<vmem>>, vector<256x3xbf16>,
    %c0_24 = arith.constant 0 : index
    %c0_25 = arith.constant 0 : index
    %c1_26 = arith.constant 1 : index
    %c0_27 = arith.constant 0 : index
    %20 = vector.load %arg2[%c0_24, %c0_25, %c1_26, %c0_27] : memref<1x17x17x6xbf16, #tpu.memory_space<vmem>>, vector<1x16x16x3xbf16>
    %21 = vector.shape_cast %20 : vector<1x16x16x3xbf16> to vector<16x16x3xbf16>
    %22 = vector.shape_cast %21 : vector<16x16x3xbf16> to vector<256x3xbf16>
    %c0_28 = arith.constant 0 : index
    %c15 = arith.constant 15 : index
    %23 = vector.load %arg11[%c0_28, %c15] : memref<256x27xbf16, #tpu.memory_space<vmem>>, vector<256x3xbf16>
    tpu.vector_store %arg11[%c0_28, %c15], %22 {strides = array<i32>} : memref<256x27xbf16, #tpu.memory_space<vmem>>, vector<256x3xbf16>,
    %c0_29 = arith.constant 0 : index
    %c1_30 = arith.constant 1 : index
    %c0_31 = arith.constant 0 : index
    %c0_32 = arith.constant 0 : index
    %24 = vector.load %arg1[%c0_29, %c1_30, %c0_31, %c0_32] : memref<1x17x17x6xbf16, #tpu.memory_space<vmem>>, vector<1x16x16x3xbf16>
    %25 = vector.shape_cast %24 : vector<1x16x16x3xbf16> to vector<16x16x3xbf16>
    %26 = vector.shape_cast %25 : vector<16x16x3xbf16> to vector<256x3xbf16>
    %c0_33 = arith.constant 0 : index
    %c18 = arith.constant 18 : index
    %27 = vector.load %arg11[%c0_33, %c18] : memref<256x27xbf16, #tpu.memory_space<vmem>>, vector<256x3xbf16>
    tpu.vector_store %arg11[%c0_33, %c18], %26 {strides = array<i32>} : memref<256x27xbf16, #tpu.memory_space<vmem>>, vector<256x3xbf16>,
    %c0_34 = arith.constant 0 : index
    %c1_35 = arith.constant 1 : index
    %c0_36 = arith.constant 0 : index
    %c3_37 = arith.constant 3 : index
    %28 = vector.load %arg1[%c0_34, %c1_35, %c0_36, %c3_37] : memref<1x17x17x6xbf16, #tpu.memory_space<vmem>>, vector<1x16x16x3xbf16>
    %29 = vector.shape_cast %28 : vector<1x16x16x3xbf16> to vector<16x16x3xbf16>
    %30 = vector.shape_cast %29 : vector<16x16x3xbf16> to vector<256x3xbf16>
    %c0_38 = arith.constant 0 : index
    %c21 = arith.constant 21 : index
    %31 = vector.load %arg11[%c0_38, %c21] : memref<256x27xbf16, #tpu.memory_space<vmem>>, vector<256x3xbf16>
    tpu.vector_store %arg11[%c0_38, %c21], %30 {strides = array<i32>} : memref<256x27xbf16, #tpu.memory_space<vmem>>, vector<256x3xbf16>,
    %c0_39 = arith.constant 0 : index
    %c1_40 = arith.constant 1 : index
    %c1_41 = arith.constant 1 : index
    %c0_42 = arith.constant 0 : index
    %32 = vector.load %arg1[%c0_39, %c1_40, %c1_41, %c0_42] : memref<1x17x17x6xbf16, #tpu.memory_space<vmem>>, vector<1x16x16x3xbf16>
    %33 = vector.shape_cast %32 : vector<1x16x16x3xbf16> to vector<16x16x3xbf16>
    %34 = vector.shape_cast %33 : vector<16x16x3xbf16> to vector<256x3xbf16>
    %c0_43 = arith.constant 0 : index
    %c24 = arith.constant 24 : index
    %35 = vector.load %arg11[%c0_43, %c24] : memref<256x27xbf16, #tpu.memory_space<vmem>>, vector<256x3xbf16>
    tpu.vector_store %arg11[%c0_43, %c24], %34 {strides = array<i32>} : memref<256x27xbf16, #tpu.memory_space<vmem>>, vector<256x3xbf16>,
    %c0_44 = arith.constant 0 : index
    %c0_45 = arith.constant 0 : index
    %36 = vector.load %arg11[%c0_44, %c0_45] : memref<256x27xbf16, #tpu.memory_space<vmem>>, vector<256x27xbf16>
    %c0_46 = arith.constant 0 : index
    %c0_47 = arith.constant 0 : index
    %37 = vector.load %arg3[%c0_46, %c0_47] : memref<27x32xbf16, #tpu.memory_space<vmem>>, vector<27x32xbf16>
    %cst = arith.constant dense<0.000000e+00> : vector<256x32xf32>
    %38 = tpu.matmul %36, %37, %cst {dimension_numbers = #tpu.dot_dimension_numbers<[1], [0], [0], [1], [0, 0, 1, 1], [], []>} : vector<256x27xbf16>, vector<27x32xbf16>, vector<256x32xf32> -> vector<256x32xf32>
    %c0_48 = arith.constant 0 : index
    %c0_49 = arith.constant 0 : index
    %39 = vector.load %arg4[%c0_48, %c0_49] : memref<1x32xf32, #tpu.memory_space<vmem>>, vector<1x32xf32>
    %40 = vector.broadcast %39 : vector<1x32xf32> to vector<256x32xf32>
    %41 = arith.addf %38, %40 : vector<256x32xf32>
    %cst_50 = arith.constant 0.000000e+00 : f32
    %42 = vector.broadcast %cst_50 : f32 to vector<256x32xf32>
    %43 = arith.maximumf %41, %42 : vector<256x32xf32>
    %44 = arith.truncf %43 : vector<256x32xf32> to vector<256x32xbf16>
    %c0_51 = arith.constant 0 : index
    %c0_52 = arith.constant 0 : index
    %c0_53 = arith.constant 0 : index
    %45 = vector.load %arg9[%c0_51, %c0_52, %c0_53] : memref<1x256x32xbf16, #tpu.memory_space<vmem>>, vector<1x256x32xbf16>
    %46 = vector.shape_cast %45 : vector<1x256x32xbf16> to vector<256x32xbf16>
    %47 = vector.shape_cast %44 : vector<256x32xbf16> to vector<1x256x32xbf16>
    tpu.vector_store %arg9[%c0_51, %c0_52, %c0_53], %47 {strides = array<i32>} : memref<1x256x32xbf16, #tpu.memory_space<vmem>>, vector<1x256x32xbf16>,
    %cst_54 = arith.constant 0.000000e+00 : f32
    %48 = vector.broadcast %cst_54 : f32 to vector<18x18x32xf32>
    %c0_55 = arith.constant 0 : index
    %c0_56 = arith.constant 0 : index
    %c0_57 = arith.constant 0 : index
    %49 = vector.load %arg12[%c0_55, %c0_56, %c0_57] : memref<18x18x32xf32, #tpu.memory_space<vmem>>, vector<18x18x32xf32>
    tpu.vector_store %arg12[%c0_55, %c0_56, %c0_57], %48 {strides = array<i32>} : memref<18x18x32xf32, #tpu.memory_space<vmem>>, vector<18x18x32xf32>,
    %50 = vector.shape_cast %43 : vector<256x32xf32> to vector<16x16x32xf32>
    %c1_58 = arith.constant 1 : index
    %c1_59 = arith.constant 1 : index
    %c0_60 = arith.constant 0 : index
    %51 = vector.load %arg12[%c1_58, %c1_59, %c0_60] : memref<18x18x32xf32, #tpu.memory_space<vmem>>, vector<16x16x32xf32>
    tpu.vector_store %arg12[%c1_58, %c1_59, %c0_60], %50 {strides = array<i32>} : memref<18x18x32xf32, #tpu.memory_space<vmem>>, vector<16x16x32xf32>,
    %c0_61 = arith.constant 0 : index
    %c0_62 = arith.constant 0 : index
    %c0_63 = arith.constant 0 : index
    %52 = vector.load %arg12[%c0_61, %c0_62, %c0_63] : memref<18x18x32xf32, #tpu.memory_space<vmem>>, vector<16x16x32xf32>
    %53 = vector.shape_cast %52 : vector<16x16x32xf32> to vector<256x32xf32>
    %54 = arith.truncf %53 : vector<256x32xf32> to vector<256x32xbf16>
    %c0_64 = arith.constant 0 : index
    %c0_65 = arith.constant 0 : index
    %55 = vector.load %arg13[%c0_64, %c0_65] : memref<256x288xbf16, #tpu.memory_space<vmem>>, vector<256x32xbf16>
    tpu.vector_store %arg13[%c0_64, %c0_65], %54 {strides = array<i32>} : memref<256x288xbf16, #tpu.memory_space<vmem>>, vector<256x32xbf16>,
    %c0_66 = arith.constant 0 : index
    %c1_67 = arith.constant 1 : index
    %c0_68 = arith.constant 0 : index
    %56 = vector.load %arg12[%c0_66, %c1_67, %c0_68] : memref<18x18x32xf32, #tpu.memory_space<vmem>>, vector<16x16x32xf32>
    %57 = vector.shape_cast %56 : vector<16x16x32xf32> to vector<256x32xf32>
    %58 = arith.truncf %57 : vector<256x32xf32> to vector<256x32xbf16>
    %c0_69 = arith.constant 0 : index
    %c32 = arith.constant 32 : index
    %59 = vector.load %arg13[%c0_69, %c32] : memref<256x288xbf16, #tpu.memory_space<vmem>>, vector<256x32xbf16>
    tpu.vector_store %arg13[%c0_69, %c32], %58 {strides = array<i32>} : memref<256x288xbf16, #tpu.memory_space<vmem>>, vector<256x32xbf16>,
    %c0_70 = arith.constant 0 : index
    %c2 = arith.constant 2 : index
    %c0_71 = arith.constant 0 : index
    %60 = vector.load %arg12[%c0_70, %c2, %c0_71] : memref<18x18x32xf32, #tpu.memory_space<vmem>>, vector<16x16x32xf32>
    %61 = vector.shape_cast %60 : vector<16x16x32xf32> to vector<256x32xf32>
    %62 = arith.truncf %61 : vector<256x32xf32> to vector<256x32xbf16>
    %c0_72 = arith.constant 0 : index
    %c64 = arith.constant 64 : index
    %63 = vector.load %arg13[%c0_72, %c64] : memref<256x288xbf16, #tpu.memory_space<vmem>>, vector<256x32xbf16>
    tpu.vector_store %arg13[%c0_72, %c64], %62 {strides = array<i32>} : memref<256x288xbf16, #tpu.memory_space<vmem>>, vector<256x32xbf16>,
    %c1_73 = arith.constant 1 : index
    %c0_74 = arith.constant 0 : index
    %c0_75 = arith.constant 0 : index
    %64 = vector.load %arg12[%c1_73, %c0_74, %c0_75] : memref<18x18x32xf32, #tpu.memory_space<vmem>>, vector<16x16x32xf32>
    %65 = vector.shape_cast %64 : vector<16x16x32xf32> to vector<256x32xf32>
    %66 = arith.truncf %65 : vector<256x32xf32> to vector<256x32xbf16>
    %c0_76 = arith.constant 0 : index
    %c96 = arith.constant 96 : index
    %67 = vector.load %arg13[%c0_76, %c96] : memref<256x288xbf16, #tpu.memory_space<vmem>>, vector<256x32xbf16>
    tpu.vector_store %arg13[%c0_76, %c96], %66 {strides = array<i32>} : memref<256x288xbf16, #tpu.memory_space<vmem>>, vector<256x32xbf16>,
    %c1_77 = arith.constant 1 : index
    %c1_78 = arith.constant 1 : index
    %c0_79 = arith.constant 0 : index
    %68 = vector.load %arg12[%c1_77, %c1_78, %c0_79] : memref<18x18x32xf32, #tpu.memory_space<vmem>>, vector<16x16x32xf32>
    %69 = vector.shape_cast %68 : vector<16x16x32xf32> to vector<256x32xf32>
    %70 = arith.truncf %69 : vector<256x32xf32> to vector<256x32xbf16>
    %c0_80 = arith.constant 0 : index
    %c128 = arith.constant 128 : index
    %71 = vector.load %arg13[%c0_80, %c128] : memref<256x288xbf16, #tpu.memory_space<vmem>>, vector<256x32xbf16>
    tpu.vector_store %arg13[%c0_80, %c128], %70 {strides = array<i32>} : memref<256x288xbf16, #tpu.memory_space<vmem>>, vector<256x32xbf16>,
    %c1_81 = arith.constant 1 : index
    %c2_82 = arith.constant 2 : index
    %c0_83 = arith.constant 0 : index
    %72 = vector.load %arg12[%c1_81, %c2_82, %c0_83] : memref<18x18x32xf32, #tpu.memory_space<vmem>>, vector<16x16x32xf32>
    %73 = vector.shape_cast %72 : vector<16x16x32xf32> to vector<256x32xf32>
    %74 = arith.truncf %73 : vector<256x32xf32> to vector<256x32xbf16>
    %c0_84 = arith.constant 0 : index
    %c160 = arith.constant 160 : index
    %75 = vector.load %arg13[%c0_84, %c160] : memref<256x288xbf16, #tpu.memory_space<vmem>>, vector<256x32xbf16>
    tpu.vector_store %arg13[%c0_84, %c160], %74 {strides = array<i32>} : memref<256x288xbf16, #tpu.memory_space<vmem>>, vector<256x32xbf16>,
    %c2_85 = arith.constant 2 : index
    %c0_86 = arith.constant 0 : index
    %c0_87 = arith.constant 0 : index
    %76 = vector.load %arg12[%c2_85, %c0_86, %c0_87] : memref<18x18x32xf32, #tpu.memory_space<vmem>>, vector<16x16x32xf32>
    %77 = vector.shape_cast %76 : vector<16x16x32xf32> to vector<256x32xf32>
    %78 = arith.truncf %77 : vector<256x32xf32> to vector<256x32xbf16>
    %c0_88 = arith.constant 0 : index
    %c192 = arith.constant 192 : index
    %79 = vector.load %arg13[%c0_88, %c192] : memref<256x288xbf16, #tpu.memory_space<vmem>>, vector<256x32xbf16>
    tpu.vector_store %arg13[%c0_88, %c192], %78 {strides = array<i32>} : memref<256x288xbf16, #tpu.memory_space<vmem>>, vector<256x32xbf16>,
    %c2_89 = arith.constant 2 : index
    %c1_90 = arith.constant 1 : index
    %c0_91 = arith.constant 0 : index
    %80 = vector.load %arg12[%c2_89, %c1_90, %c0_91] : memref<18x18x32xf32, #tpu.memory_space<vmem>>, vector<16x16x32xf32>
    %81 = vector.shape_cast %80 : vector<16x16x32xf32> to vector<256x32xf32>
    %82 = arith.truncf %81 : vector<256x32xf32> to vector<256x32xbf16>
    %c0_92 = arith.constant 0 : index
    %c224 = arith.constant 224 : index
    %83 = vector.load %arg13[%c0_92, %c224] : memref<256x288xbf16, #tpu.memory_space<vmem>>, vector<256x32xbf16>
    tpu.vector_store %arg13[%c0_92, %c224], %82 {strides = array<i32>} : memref<256x288xbf16, #tpu.memory_space<vmem>>, vector<256x32xbf16>,
    %c2_93 = arith.constant 2 : index
    %c2_94 = arith.constant 2 : index
    %c0_95 = arith.constant 0 : index
    %84 = vector.load %arg12[%c2_93, %c2_94, %c0_95] : memref<18x18x32xf32, #tpu.memory_space<vmem>>, vector<16x16x32xf32>
    %85 = vector.shape_cast %84 : vector<16x16x32xf32> to vector<256x32xf32>
    %86 = arith.truncf %85 : vector<256x32xf32> to vector<256x32xbf16>
    %c0_96 = arith.constant 0 : index
    %c256 = arith.constant 256 : index
    %87 = vector.load %arg13[%c0_96, %c256] : memref<256x288xbf16, #tpu.memory_space<vmem>>, vector<256x32xbf16>
    tpu.vector_store %arg13[%c0_96, %c256], %86 {strides = array<i32>} : memref<256x288xbf16, #tpu.memory_space<vmem>>, vector<256x32xbf16>,
    %c0_97 = arith.constant 0 : index
    %c0_98 = arith.constant 0 : index
    %88 = vector.load %arg13[%c0_97, %c0_98] : memref<256x288xbf16, #tpu.memory_space<vmem>>, vector<256x288xbf16>
    %c0_99 = arith.constant 0 : index
    %c0_100 = arith.constant 0 : index
    %89 = vector.load %arg5[%c0_99, %c0_100] : memref<288x32xbf16, #tpu.memory_space<vmem>>, vector<288x32xbf16>
    %cst_101 = arith.constant dense<0.000000e+00> : vector<256x32xf32>
    %90 = tpu.matmul %88, %89, %cst_101 {dimension_numbers = #tpu.dot_dimension_numbers<[1], [0], [0], [1], [0, 0, 1, 1], [], []>} : vector<256x288xbf16>, vector<288x32xbf16>, vector<256x32xf32> -> vector<256x32xf32>
    %c0_102 = arith.constant 0 : index
    %c0_103 = arith.constant 0 : index
    %91 = vector.load %arg6[%c0_102, %c0_103] : memref<1x32xf32, #tpu.memory_space<vmem>>, vector<1x32xf32>
    %92 = vector.broadcast %91 : vector<1x32xf32> to vector<256x32xf32>
    %93 = arith.addf %90, %92 : vector<256x32xf32>
    %cst_104 = arith.constant 0.000000e+00 : f32
    %94 = vector.broadcast %cst_104 : f32 to vector<256x32xf32>
    %95 = arith.maximumf %93, %94 : vector<256x32xf32>
    %96 = arith.truncf %95 : vector<256x32xf32> to vector<256x32xbf16>
    %c0_105 = arith.constant 0 : index
    %c0_106 = arith.constant 0 : index
    %97 = vector.load %arg7[%c0_105, %c0_106] : memref<32x128xbf16, #tpu.memory_space<vmem>>, vector<32x128xbf16>
    %cst_107 = arith.constant dense<0.000000e+00> : vector<256x128xf32>
    %98 = tpu.matmul %96, %97, %cst_107 {dimension_numbers = #tpu.dot_dimension_numbers<[1], [0], [0], [1], [0, 0, 1, 1], [], []>} : vector<256x32xbf16>, vector<32x128xbf16>, vector<256x128xf32> -> vector<256x128xf32>
    %c0_108 = arith.constant 0 : index
    %c0_109 = arith.constant 0 : index
    %99 = vector.load %arg8[%c0_108, %c0_109] : memref<1x128xf32, #tpu.memory_space<vmem>>, vector<1x128xf32>
    %100 = vector.broadcast %99 : vector<1x128xf32> to vector<256x128xf32>
    %101 = arith.addf %98, %100 : vector<256x128xf32>
    %c0_110 = arith.constant 0 : index
    %c0_111 = arith.constant 0 : index
    %c0_112 = arith.constant 0 : index
    %102 = vector.load %arg10[%c0_110, %c0_111, %c0_112] : memref<1x256x128xf32, #tpu.memory_space<vmem>>, vector<1x256x128xf32>
    %103 = vector.shape_cast %102 : vector<1x256x128xf32> to vector<256x128xf32>
    %104 = vector.shape_cast %101 : vector<256x128xf32> to vector<1x256x128xf32>
    tpu.vector_store %arg10[%c0_110, %c0_111, %c0_112], %104 {strides = array<i32>} : memref<1x256x128xf32, #tpu.memory_space<vmem>>, vector<1x256x128xf32>,
    return
  }
  func.func @transform_0(%arg0: i32) -> (i32, i32, i32, i32) {
    %c0_i32 = arith.constant 0 : i32
    %c0_i32_0 = arith.constant 0 : i32
    %c0_i32_1 = arith.constant 0 : i32
    %c0_i32_2 = arith.constant 0 : i32
    return %arg0, %c0_i32, %c0_i32_0, %c0_i32_1 : i32, i32, i32, i32
  }
  func.func @transform_1(%arg0: i32) -> (i32, i32, i32, i32) {
    %c0_i32 = arith.constant 0 : i32
    %c0_i32_0 = arith.constant 0 : i32
    %c0_i32_1 = arith.constant 0 : i32
    %c0_i32_2 = arith.constant 0 : i32
    return %arg0, %c0_i32, %c0_i32_0, %c0_i32_1 : i32, i32, i32, i32
  }
  func.func @transform_2(%arg0: i32) -> (i32, i32) {
    %c0_i32 = arith.constant 0 : i32
    %c0_i32_0 = arith.constant 0 : i32
    %c0_i32_1 = arith.constant 0 : i32
    return %c0_i32, %c0_i32_0 : i32, i32
  }
  func.func @transform_3(%arg0: i32) -> (i32, i32) {
    %c0_i32 = arith.constant 0 : i32
    %c0_i32_0 = arith.constant 0 : i32
    %c0_i32_1 = arith.constant 0 : i32
    return %c0_i32, %c0_i32_0 : i32, i32
  }
  func.func @transform_4(%arg0: i32) -> (i32, i32) {
    %c0_i32 = arith.constant 0 : i32
    %c0_i32_0 = arith.constant 0 : i32
    %c0_i32_1 = arith.constant 0 : i32
    return %c0_i32, %c0_i32_0 : i32, i32
  }
  func.func @transform_5(%arg0: i32) -> (i32, i32) {
    %c0_i32 = arith.constant 0 : i32
    %c0_i32_0 = arith.constant 0 : i32
    %c0_i32_1 = arith.constant 0 : i32
    return %c0_i32, %c0_i32_0 : i32, i32
  }
  func.func @transform_6(%arg0: i32) -> (i32, i32) {
    %c0_i32 = arith.constant 0 : i32
    %c0_i32_0 = arith.constant 0 : i32
    %c0_i32_1 = arith.constant 0 : i32
    return %c0_i32, %c0_i32_0 : i32, i32
  }
  func.func @transform_7(%arg0: i32) -> (i32, i32) {
    %c0_i32 = arith.constant 0 : i32
    %c0_i32_0 = arith.constant 0 : i32
    %c0_i32_1 = arith.constant 0 : i32
    return %c0_i32, %c0_i32_0 : i32, i32
  }
  func.func @transform_8(%arg0: i32) -> (i32, i32, i32) {
    %c0_i32 = arith.constant 0 : i32
    %c0_i32_0 = arith.constant 0 : i32
    %c0_i32_1 = arith.constant 0 : i32
    return %arg0, %c0_i32, %c0_i32_0 : i32, i32, i32
  }
  func.func @transform_9(%arg0: i32) -> (i32, i32, i32) {
    %c0_i32 = arith.constant 0 : i32
    %c0_i32_0 = arith.constant 0 : i32
    %c0_i32_1 = arith.constant 0 : i32
    return %arg0, %c0_i32, %c0_i32_0 : i32, i32, i32
  }
}

</mosaic_0001>

<bundles_post_ra>
// kernel: tpu_custom_call.1
= control target key start
LH: loop header
LB: loop body
LE: loop exit
PB: predicated region body
PF: predicated region fallthrough
CT: control target
= control target key end

     0   :  { %15 = vsyncpa [#allocation6], 0  ;;  %s8374_s0 = inlined_call_operand.vmem [shape: bf16[2,17,17,6], index: 0, kind: input, shape index: {}]   ;;  %s8375_s1 = inlined_call_operand.vmem [shape: bf16[2,17,17,6], index: 1, kind: input, shape index: {}]   ;;  %s8376_s2 = inlined_call_operand.vmem [shape: bf16[27,32], index: 2, kind: input, shape index: {}]   ;;  %s8377_s3 = inlined_call_operand.vmem [shape: f32[1,32], index: 3, kind: input, shape index: {}]   ;;  %s8378_s4 = inlined_call_operand.vmem [shape: bf16[288,32], index: 4, kind: input, shape index: {}]   ;;  %s8379_s5 = inlined_call_operand.vmem [shape: f32[1,32], index: 5, kind: input, shape index: {}]   ;;  %s8380_s6 = inlined_call_operand.vmem [shape: bf16[32,128], index: 6, kind: input, shape index: {}]   ;;  %s8381_s7 = inlined_call_operand.vmem [shape: f32[1,128], index: 7, kind: input, shape index: {}]   ;;  %s8382_s8 = inlined_call_operand.vmem [shape: bf16[2,256,32], index: 8, kind: output, shape index: {0}]   ;;  %s8383_s9 = inlined_call_operand.hbm [shape: f32[2,256,128], index: 9, kind: output, shape index: {1}]  }
   0x1   :  { %17 = vsyncpa [#allocation6 + $0x1], 0  ;;  %s6489_s30 = smov 0   ;;  %s6491_s10 = smov 0  }
   0x2   :  { %s6493_s11 = smov 0   ;;  %s6495_s12 = smov 0  }
   0x3 LB: > { %s6510_s13 = sadd.s32 4294967295, %s6424_s12   ;;  %s5505_s14 = sadd.s32 4294967294, %s6424_s12   ;;  %s6424_s12 = sphi %s6495_s12, %s8391_s12   ;;  %s6420_s11 = sphi %s6493_s11, %s8390_s11   ;;  %s6416_s10 = sphi %s6491_s10, %s8389_s10   ;;  %s6412_s30 = sphi %s6489_s30, %s8388_s30  }
   0x4   : > { %s6514_s15 = sadd.s32 1, %s6424_s12   ;;  %s234_s16 = sadd.s32 1, %s6420_s11 }
   0x5   : > { %s231_s17 = ssub.s32 %s6424_s12, %s6514_s15  ;;  %p244_p0 = scmp.ne.s32.totalorder %s6420_s11, %s6416_s10 }
   0x6   : > { %p232_p1 = scmp.eq.s32.totalorder %s231_s17, 0  ;;  %p245_p2 = scmp.eq.s32.totalorder %s6510_s13, 1 }
   0x7   : > { %p250_p3 = scmp.ne.s32.totalorder %s6416_s10, %s6412_s30  ;;  %p251_p4 = scmp.eq.s32.totalorder %s5505_s14, 1 }
   0x8   : > { %s6525_s18 = scalar_select %p232_p1, %s6420_s11, %s234_s16  }
   0x9   : > { %p6527_p5 = por %p245_p2, %p244_p0  ;;  %p6531_p6 = por %p251_p4, %p250_p3 }
   0xa   : > { %p5508_p7 = scmp.ge.s32.totalorder %s6424_s12, 1  ;;  %p303_p8 = scmp.lt.s32.totalorder %s6424_s12, 3 }
   0xc   : > { %p304_p9 = pnand %p5508_p7, %p303_p8 }
   0xd   : > { %p349_p10 = scmp.lt.s32.totalorder (!%p304_p9), %s6510_s13, 1  ;;  %vm703_vm0 = vsmask.f32 (!%p304_p9), 3328  ;;  %vm704_vm1 = vsmask.f32 (!%p304_p9), 7440  ;;  %s6426_s26 = smov (!%p304_p9), 9  }
   0xe   : > { %307 = sbr.rel (%p304_p9) target bundleno = 1286 (0x506), region = 52  ;;  %s6427_s14 = smov (!%p304_p9), 18   ;;  %vm6573_vm2 = vmor (!%p304_p9), %vm703_vm0, %vm704_vm1  ;;  %vm493_vm3 = vcmask (!%p304_p9), 23552   ;;  %vm638_vm4 = vcmask (!%p304_p9), 48152   ;;  %vm1186_vm5 = vcmask (!%p304_p9), 72752   ;;  %vm1363_vm6 = vcmask (!%p304_p9), 97352  }
   0xf   : > { %s6428_s16 = smov (!%p304_p9), 6   ;;  %s6429_s17 = smov (!%p304_p9), 15   ;;  %vm1540_vm7 = vcmask (!%p304_p9), 121952   ;;  %vm2085_vm8 = vcmask (!%p304_p9), 146552   ;;  %vm2263_vm9 = vcmask (!%p304_p9), 171152   ;;  %vm2440_vm10 = vcmask (!%p304_p9), 195752  }
  0x10   : > { %vm3089_vm11 = vcmask (!%p304_p9), 1044480   ;;  %vm3090_vm12 = vcmask (!%p304_p9), 1045504   ;;  %vm2985_vm13 = vcmask (!%p304_p9), 220352   ;;  %vm3040_vm14 = vcmask (!%p304_p9), 220160   ;;  %s5913_s28 = sshll.u32 (!%p304_p9), %s6510_s13, 12 }
  0x11   : > { %vm3450_vm15 = vcmask (!%p304_p9), 261120   ;;  %vm3453_vm0 = vcmask (!%p304_p9), 254976   ;;  %vm3715_vm1 = vcmask (!%p304_p9), 523520  }
  0x15   : > { %s6539_s21 = scalar_select %p349_p10, %s6510_s13, 1 }
  0x17   : > { %s6192_s22 = smul.u32 204, %s6539_s21  ;;  %s5880_s24 = sshll.u32 %s6539_s21, 7 }
  0x18   : > { %s6435_s21 = smov 96  }
  0x19   : > { %s6545_s25 = scalar_lea.vmem %s8375_s1, %s6192_s22  ;;  %s6553_s29 = scalar_lea.vmem %s8374_s0, %s6192_s22 }
  0x1a   : > { %v6244_v0 = vld [vmem:[%s6545_s25] sm:$0xff]   ;;  %v6246_v2 = vld [vmem:[%s6545_s25 + $0xc] sm:$0xff]   ;;  %v657_v7 = vld [vmem:[%s6553_s29 + $0x8] sm:$0x1]  ;;  %s6430_s22 = smov 24  }
  0x1b   : > { %v6245_v1 = vld [vmem:[%s6545_s25] sm:$0xff]   ;;  %1315 = vrot.lane.b32.xlu1 %v6244_v0, %s6426_s26  ;;  %v6247_v3 = vld [vmem:[%s6553_s29 + $0xc] sm:$0xff]   ;;  %v726_v12 = vshll.u32 %v657_v7, 16  ;;  %v6249_v18 = vld [vmem:[%s6553_s29 + $0x18] sm:$0xff]  }
  0x1c   : > { %1492 = vrot.lane.b32.xlu0 %v6245_v1, %s6426_s26  ;;  %v6248_v4 = vld [vmem:[%s6545_s25 + $0xc] sm:$0xff]   ;;  %v655_v5 = vld [vmem:[%s6553_s29] sm:$0xf]  ;;  %v656_v6 = vld [vmem:[%s6553_s29 + $0x4] sm:$0xf] }
  0x1d   : > { %v707_v8 = vshrl.u32 %v655_v5, 16  ;;  %v710_v9 = vshll.u32 %v655_v5, 16  ;;  %v716_v10 = vshll.u32 %v656_v6, 16  ;;  %v720_v11 = vshrl.u32 %v656_v6, 16  ;;  %v658_v13 = vld [vmem:[%s6553_s29 + $0xc] sm:$0xf] }
  0x1e   : > { %v659_v19 = vld [vmem:[%s6553_s29 + $0x10] sm:$0xf]  ;;  %v728_v20 = vrot.slane %v726_v12, 5  ;;  %v660_v21 = vld [vmem:[%s6553_s29 + $0x14] sm:$0x1]  ;;  %v731_v22 = vshrl.u32 %v658_v13, 16 }
  0x1f   : > { %1317 = vrot.lane.b32.xlu1 %v6246_v2, %s6426_s26  ;;  %v709_v14 = vrot.slane %v707_v8, 4  ;;  %v712_v15 = vrot.slane %v710_v9, 5  ;;  %v718_v16 = vrot.slane %v716_v10, 5  ;;  %v722_v17 = vrot.slane %v720_v11, 4  ;;  %v1560_v29 = vld [vmem:[%s6545_s25 + $0xc] sm:$0xf] }
  0x20   : > { %2215 = vrot.lane.b32.xlu0 %v6247_v3, %s6427_s14  ;;  %v734_v23 = vshll.u32 %v658_v13, 16  ;;  %v740_v24 = vshll.u32 %v659_v19, 16  ;;  %v744_v27 = vshrl.u32 %v659_v19, 16  ;;  %v750_v28 = vshll.u32 %v660_v21, 16  ;;  %v1561_v30 = vld [vmem:[%s6545_s25 + $0x10] sm:$0xf] }
  0x21   : > { %v713_v25 = vor.u32 %v712_v15, %v709_v14  ;;  %v723_v26 = vor.u32 %v722_v17, %v718_v16  ;;  %v733_v32 = vrot.slane %v731_v22, 4  ;;  %v1630_v35 = vshrl.u32 %v1560_v29, 16  ;;  %v1562_v40 = vld [vmem:[%s6545_s25 + $0x14] sm:$0x1]  ;;  %v1557_v45 = vld [vmem:[%s6545_s25] sm:$0xf] }
  0x22   : > { %v736_v33 = vrot.slane %v734_v23, 5  ;;  %v742_v34 = vrot.slane %v740_v24, 5  ;;  %v746_v38 = vrot.slane %v744_v27, 4  ;;  %v752_v39 = vrot.slane %v750_v28, 5  ;;  %v1558_v50 = vld [vmem:[%s6545_s25 + $0x4] sm:$0xf] }
  0x23   : > { %1494 = vrot.lane.b32.xlu1 %v6248_v4, %s6426_s26  ;;  %v714_v36 = vrot.slane %v713_v25, 4  ;;  %v724_v37 = vrot.slane %v723_v26, 4  ;;  %v1632_v42 = vrot.slane %v1630_v35, 4  ;;  %v1633_v43 = vshll.u32 %v1560_v29, 16  ;;  %v1559_v55 = vld [vmem:[%s6545_s25 + $0x8] sm:$0x1] }
  0x24   : > { %v737_v41 = vor.u32 %v736_v33, %v733_v32  ;;  %v1639_v44 = vshll.u32 %v1561_v30, 16  ;;  %v747_v48 = vor.u32 %v746_v38, %v742_v34  ;;  %v1643_v49 = vshrl.u32 %v1561_v30, 16  ;;  %v5706_v0 = vld [vmem:[%s6553_s29 + $0xc] sm:$0xf]  ;;  %v5707_v5 = vld [vmem:[%s6553_s29 + $0x10] sm:$0xf] }
  0x25   : > { %v719_v46 = vsel %vm6573_vm2, %v714_v36, %v718_v16  ;;  %v729_v47 = vsel %vm6573_vm2, %v724_v37, %v728_v20  ;;  %v1635_v53 = vrot.slane %v1633_v43, 5  ;;  %v1649_v58 = vshll.u32 %v1562_v40, 16  ;;  %v5708_v16 = vld [vmem:[%s6553_s29 + $0x14] sm:$0x1]  ;;  %v5709_v19 = vld [vmem:[%s6553_s29 + $0x18] sm:$0xf] }
  0x26   : > { %v5546_v51 = vcombine.low %v719_v46, %v729_v47  ;;  %v738_v52 = vrot.slane %v737_v41, 4  ;;  %v1641_v54 = vrot.slane %v1639_v44, 5  ;;  %v748_v56 = vrot.slane %v747_v48, 4  ;;  %v5710_v24 = vld [vmem:[%s6553_s29 + $0x1c] sm:$0xf] }
  0x27   : > { %2217 = vrot.lane.b32.xlu1 %v6249_v18, %s6427_s14  ;;  %v1645_v57 = vrot.slane %v1643_v49, 4  ;;  %v1606_v59 = vshrl.u32 %v1557_v45, 16  ;;  %v1636_v61 = vor.u32 %v1635_v53, %v1632_v42  ;;  %v1609_v62 = vshll.u32 %v1557_v45, 16  ;;  %v6251_v30 = vld [vmem:[%s6553_s29 + $0x18] sm:$0xff]   ;;  %v5711_v37 = vld [vmem:[%s6553_s29 + $0x20] sm:$0x1] }
  0x28   : > { %1138 = vrot.lane.b32.xlu0 %v5546_v51, %s6428_s16  ;;  %v743_v60 = vsel %vm6573_vm2, %v738_v52, %v742_v34  ;;  %v1615_v63 = vshll.u32 %v1558_v50, 16  ;;  %v753_v1 = vsel %vm6573_vm2, %v748_v56, %v752_v39  ;;  %v1651_v3 = vrot.slane %v1649_v58, 5  ;;  %v661_v40 = vld [vmem:[%s6553_s29 + $0x18] sm:$0xf]  ;;  %v662_v45 = vld [vmem:[%s6553_s29 + $0x1c] sm:$0xf] }
  0x29   : > { %v1646_v2 = vor.u32 %v1645_v57, %v1641_v54  ;;  %v1608_v4 = vrot.slane %v1606_v59, 4  ;;  %v5547_v6 = vcombine.low %v743_v60, %v753_v1  ;;  %v1637_v7 = vrot.slane %v1636_v61, 4  ;;  %v664_v51 = vld [vmem:[%s6553_s29 + $0x24] sm:$0xf] }
  0x2a   : > { %v1611_v8 = vrot.slane %v1609_v62, 5  ;;  %v1617_v9 = vrot.slane %v1615_v63, 5  ;;  %v1619_v11 = vshrl.u32 %v1558_v50, 16  ;;  %v1625_v12 = vshll.u32 %v1559_v55, 16  ;;  %v663_v50 = vld [vmem:[%s6553_s29 + $0x20] sm:$0x1] }
  0x2b   : > { %v1647_v10 = vrot.slane %v1646_v2, 4  ;;  %v2506_v13 = vshrl.u32 %v5706_v0, 16  ;;  %v1642_v14 = vsel %vm6573_vm2, %v1637_v7, %v1641_v54  ;;  %v2509_v17 = vshll.u32 %v5706_v0, 16  ;;  %v6250_v0 = vld [vmem:[%s6553_s29 + $0xc] sm:$0xff]  }
  0x2c   : > { %1140 = vrot.lane.b32.xlu0 %v5547_v6, %s6428_s16  ;;  %v1612_v15 = vor.u32 %v1611_v8, %v1608_v4  ;;  %v2515_v18 = vshll.u32 %v5707_v5, 16  ;;  %v1621_v21 = vrot.slane %v1619_v11, 4  ;;  %v1627_v22 = vrot.slane %v1625_v12, 5  ;;  %v665_v8 = vld [vmem:[%s6553_s29 + $0x28] sm:$0xf] }
  0x2d   : > { %v1652_v20 = vsel %vm6573_vm2, %v1647_v10, %v1651_v3  ;;  %v2508_v23 = vrot.slane %v2506_v13, 4  ;;  %v2511_v27 = vrot.slane %v2509_v17, 5  ;;  %v2519_v32 = vshrl.u32 %v5707_v5, 16 }
  0x2e   : > { %v5595_v25 = vcombine.low %v1642_v14, %v1652_v20  ;;  %v1613_v26 = vrot.slane %v1612_v15, 4  ;;  %v2517_v28 = vrot.slane %v2515_v18, 5  ;;  %v1622_v29 = vor.u32 %v1621_v21, %v1617_v9  ;;  %v666_v14 = vld [vmem:[%s6553_s29 + $0x2c] sm:$0x1] }
  0x2f   : > { %v2525_v33 = vshll.u32 %v5708_v16, 16  ;;  %v2530_v34 = vshrl.u32 %v5709_v19, 16  ;;  %v2512_v36 = vor.u32 %v2511_v27, %v2508_v23  ;;  %v2533_v38 = vshll.u32 %v5709_v19, 16  ;;  %v1563_v19 = vld [vmem:[%s6545_s25 + $0x18] sm:$0xf] }
  0x30   : > { %2039 = vrot.lane.b32.xlu1 %v5595_v25, %s6429_s17  ;;  %v1618_v35 = vsel %vm6573_vm2, %v1613_v26, %v1617_v9  ;;  %v2539_v39 = vshll.u32 %v5710_v24, 16  ;;  %v1623_v41 = vrot.slane %v1622_v29, 4  ;;  %v2521_v42 = vrot.slane %v2519_v32, 4  ;;  %v1565_v29 = vld [vmem:[%s6545_s25 + $0x20] sm:$0x1] }
  0x31   : > { %v2527_v43 = vrot.slane %v2525_v33, 5  ;;  %v2532_v44 = vrot.slane %v2530_v34, 4  ;;  %v2513_v46 = vrot.slane %v2512_v36, 4  ;;  %v2535_v47 = vrot.slane %v2533_v38, 5 }
  0x32   : > { %v2541_v48 = vrot.slane %v2539_v39, 5  ;;  %v2543_v49 = vshrl.u32 %v5710_v24, 16  ;;  %v1628_v52 = vsel %vm6573_vm2, %v1623_v41, %v1627_v22  ;;  %v2522_v53 = vor.u32 %v2521_v42, %v2517_v28  ;;  %v1564_v24 = vld [vmem:[%s6545_s25 + $0x1c] sm:$0xf] }
  0x33   : > { %v2549_v54 = vshll.u32 %v5711_v37, 16  ;;  %v755_v55 = vshrl.u32 %v661_v40, 16  ;;  %v5594_v56 = vcombine.low %v1618_v35, %v1628_v52  ;;  %v2518_v57 = vsel %vm6573_vm2, %v2513_v46, %v2517_v28  ;;  %v1566_v35 = vld [vmem:[%s6545_s25 + $0x24] sm:$0xf] }
  0x34   : > { %2394 = vrot.lane.b32.xlu1 %v6251_v30, %s6427_s14  ;;  %v2536_v58 = vor.u32 %v2535_v47, %v2532_v44  ;;  %v2545_v59 = vrot.slane %v2543_v49, 4  ;;  %v2523_v60 = vrot.slane %v2522_v53, 4  ;;  %v758_v63 = vshll.u32 %v661_v40, 16  ;;  %v1567_v40 = vld [vmem:[%s6545_s25 + $0x28] sm:$0xf] }
  0x35   : > { %v2551_v61 = vrot.slane %v2549_v54, 5  ;;  %v757_v62 = vrot.slane %v755_v55, 4  ;;  %2037 = vrot.lane.b32.xlu0 %v5594_v56, %s6429_s17  ;;  %v764_v3 = vshll.u32 %v662_v45, 16  ;;  %v768_v4 = vshrl.u32 %v662_v45, 16  ;;  %v1568_v49 = vld [vmem:[%s6545_s25 + $0x2c] sm:$0x1] }
  0x36   : > { %v2537_v1 = vrot.slane %v2536_v58, 4  ;;  %v2546_v2 = vor.u32 %v2545_v59, %v2541_v48  ;;  %v2528_v5 = vsel %vm6573_vm2, %v2523_v60, %v2527_v43  ;;  %v760_v6 = vrot.slane %v758_v63, 5  ;;  %v6252_v60 = vld [vmem:[%s6545_s25 + $0x18] sm:$0xff]   ;;  %v5712_v63 = vld [vmem:[%s6553_s29 + $0x24] sm:$0xf] }
  0x37   : > { %v774_v7 = vshll.u32 %v663_v50, 16  ;;  %v779_v9 = vshrl.u32 %v664_v51, 16  ;;  %v5754_v10 = vcombine.low %v2518_v57, %v2528_v5  ;;  %v766_v13 = vrot.slane %v764_v3, 5 }
  0x38   : > { %v2542_v11 = vsel %vm6573_vm2, %v2537_v1, %v2541_v48  ;;  %v2547_v12 = vrot.slane %v2546_v2, 4  ;;  %v761_v15 = vor.u32 %v760_v6, %v757_v62  ;;  %v770_v16 = vrot.slane %v768_v4, 4  ;;  %v5713_v4 = vld [vmem:[%s6553_s29 + $0x28] sm:$0xf] }
  0x39   : > { %v776_v17 = vrot.slane %v774_v7, 5  ;;  %v781_v18 = vrot.slane %v779_v9, 4  ;;  %2392 = vrot.lane.b32.xlu0 %v6250_v0, %s6427_s14  ;;  %v782_v21 = vshll.u32 %v664_v51, 16  ;;  %v788_v22 = vshll.u32 %v665_v8, 16  ;;  %v6253_v9 = vld [vmem:[%s6545_s25 + $0x24] sm:$0xff]  }
  0x3a   : > { %v2552_v20 = vsel %vm6573_vm2, %v2547_v12, %v2551_v61  ;;  %v792_v23 = vshrl.u32 %v665_v8, 16  ;;  %v762_v26 = vrot.slane %v761_v15, 4  ;;  %v771_v27 = vor.u32 %v770_v16, %v766_v13  ;;  %v5714_v12 = vld [vmem:[%s6553_s29 + $0x2c] sm:$0x1]  ;;  %v6254_v15 = vld [vmem:[%s6545_s25 + $0x18] sm:$0xff]  }
  0x3b   : > { %v5755_v25 = vcombine.low %v2542_v11, %v2552_v20  ;;  %v798_v28 = vshll.u32 %v666_v14, 16  ;;  %v784_v30 = vrot.slane %v782_v21, 5  ;;  %v790_v32 = vrot.slane %v788_v22, 5  ;;  %v5715_v20 = vld [vmem:[%s6553_s29 + $0x30] sm:$0xf] }
  0x3c   : > { %v794_v33 = vrot.slane %v792_v23, 4  ;;  %v1654_v34 = vshrl.u32 %v1563_v19, 16  ;;  %v767_v36 = vsel %vm6573_vm2, %v762_v26, %v766_v13  ;;  %v772_v37 = vrot.slane %v771_v27, 4 }
  0x3d   : > { %2939 = vrot.lane.b32.xlu1 %v5755_v25, %s6430_s22  ;;  %v800_v38 = vrot.slane %v798_v28, 5  ;;  %v1657_v39 = vshll.u32 %v1563_v19, 16  ;;  %2937 = vrot.lane.b32.xlu0 %v5754_v10, %s6430_s22  ;;  %v785_v41 = vor.u32 %v784_v30, %v781_v18  ;;  %v1663_v44 = vshll.u32 %v1564_v24, 16  ;;  %v5716_v25 = vld [vmem:[%s6553_s29 + $0x34] sm:$0xf] }
  0x3e   : > { %v795_v42 = vor.u32 %v794_v33, %v790_v32  ;;  %v1656_v43 = vrot.slane %v1654_v34, 4  ;;  %v777_v45 = vsel %vm6573_vm2, %v772_v37, %v776_v17  ;;  %v1667_v47 = vshrl.u32 %v1564_v24, 16  ;;  %v5717_v30 = vld [vmem:[%s6553_s29 + $0x38] sm:$0x1]  ;;  %v667_v37 = vld [vmem:[%s6553_s29 + $0x30] sm:$0xf] }
  0x3f   : > { %v1659_v46 = vrot.slane %v1657_v39, 5  ;;  %v1673_v48 = vshll.u32 %v1565_v29, 16  ;;  %v5548_v50 = vcombine.low %v767_v36, %v777_v45  ;;  %v786_v51 = vrot.slane %v785_v41, 4 }
  0x40   : > { %v796_v52 = vrot.slane %v795_v42, 4  ;;  %v1665_v53 = vrot.slane %v1663_v44, 5  ;;  %v1669_v55 = vrot.slane %v1667_v47, 4  ;;  %v1678_v57 = vshrl.u32 %v1566_v35, 16  ;;  %v668_v42 = vld [vmem:[%s6553_s29 + $0x34] sm:$0xf] }
  0x41   : > { %v1660_v54 = vor.u32 %v1659_v46, %v1656_v43  ;;  %v1675_v56 = vrot.slane %v1673_v48, 5  ;;  %1142 = vrot.lane.b32.xlu0 %v5548_v50, %s6428_s16  ;;  %v791_v58 = vsel %vm6573_vm2, %v786_v51, %v790_v32  ;;  %v1681_v61 = vshll.u32 %v1566_v35, 16  ;;  %v6255_v32 = vld [vmem:[%s6545_s25 + $0x24] sm:$0xff]   ;;  %v669_v51 = vld [vmem:[%s6553_s29 + $0x38] sm:$0x1] }
  0x42   : > { %v801_v59 = vsel %vm6573_vm2, %v796_v52, %v800_v38  ;;  %v1687_v62 = vshll.u32 %v1567_v40, 16  ;;  %v1670_v2 = vor.u32 %v1669_v55, %v1665_v53  ;;  %v1680_v3 = vrot.slane %v1678_v57, 4  ;;  %v6256_v57 = vld [vmem:[%s6553_s29 + $0x24] sm:$0xff]  }
  0x43   : > { %v5549_v0 = vcombine.low %v791_v58, %v801_v59  ;;  %v1661_v1 = vrot.slane %v1660_v54, 4  ;;  %v1683_v5 = vrot.slane %v1681_v61, 5  ;;  %v1691_v7 = vshrl.u32 %v1567_v40, 16 }
  0x44   : > { %v1689_v6 = vrot.slane %v1687_v62, 5  ;;  %v1697_v8 = vshll.u32 %v1568_v49, 16  ;;  %v1671_v11 = vrot.slane %v1670_v2, 4  ;;  %v2554_v13 = vshrl.u32 %v5712_v63, 16  ;;  %v671_v62 = vld [vmem:[%s6553_s29 + $0x40] sm:$0xf] }
  0x45   : > { %1144 = vrot.lane.b32.xlu1 %v5549_v0, %s6428_s16  ;;  %v1666_v10 = vsel %vm6573_vm2, %v1661_v1, %v1665_v53  ;;  %v2557_v14 = vshll.u32 %v5712_v63, 16  ;;  %1319 = vrot.lane.b32.xlu0 %v6252_v60, %s6426_s26  ;;  %v1684_v16 = vor.u32 %v1683_v5, %v1680_v3  ;;  %v1693_v17 = vrot.slane %v1691_v7, 4  ;;  %v6257_v7 = vld [vmem:[%s6553_s29 + $0x30] sm:$0xff]  }
  0x46   : > { %v1699_v18 = vrot.slane %v1697_v8, 5  ;;  %v2563_v19 = vshll.u32 %v5713_v4, 16  ;;  %v1676_v21 = vsel %vm6573_vm2, %v1671_v11, %v1675_v56  ;;  %v2556_v22 = vrot.slane %v2554_v13, 4  ;;  %v670_v56 = vld [vmem:[%s6553_s29 + $0x3c] sm:$0xf] }
  0x47   : > { %v2559_v23 = vrot.slane %v2557_v14, 5  ;;  %v2567_v24 = vshrl.u32 %v5713_v4, 16  ;;  %v5596_v26 = vcombine.low %v1666_v10, %v1676_v21  ;;  %v1685_v27 = vrot.slane %v1684_v16, 4 }
  0x48   : > { %v1694_v28 = vor.u32 %v1693_v17, %v1689_v6  ;;  %v2565_v29 = vrot.slane %v2563_v19, 5  ;;  %v2573_v35 = vshll.u32 %v5714_v12, 16  ;;  %v2578_v36 = vshrl.u32 %v5715_v20, 16  ;;  %v6258_v12 = vld [vmem:[%s6553_s29 + $0x24] sm:$0xff]  }
  0x49   : > { %1321 = vrot.lane.b32.xlu1 %v6253_v9, %s6426_s26  ;;  %v2560_v33 = vor.u32 %v2559_v23, %v2556_v22  ;;  %v2569_v34 = vrot.slane %v2567_v24, 4  ;;  %1496 = vrot.lane.b32.xlu0 %v6254_v15, %s6426_s26  ;;  %v1690_v38 = vsel %vm6573_vm2, %v1685_v27, %v1689_v6  ;;  %v2581_v40 = vshll.u32 %v5715_v20, 16  ;;  %v672_v20 = vld [vmem:[%s6553_s29 + $0x44] sm:$0x1]  ;;  %v1569_v22 = vld [vmem:[%s6545_s25 + $0x30] sm:$0xf] }
  0x4a   : > { %v1695_v39 = vrot.slane %v1694_v28, 4  ;;  %v2587_v41 = vshll.u32 %v5716_v25, 16  ;;  %v2575_v45 = vrot.slane %v2573_v35, 5  ;;  %v2580_v46 = vrot.slane %v2578_v36, 4  ;;  %v1570_v27 = vld [vmem:[%s6545_s25 + $0x34] sm:$0xf] }
  0x4b   : > { %v2561_v43 = vrot.slane %v2560_v33, 4  ;;  %v2570_v44 = vor.u32 %v2569_v34, %v2565_v29  ;;  %v2583_v48 = vrot.slane %v2581_v40, 5  ;;  %v2591_v50 = vshrl.u32 %v5716_v25, 16  ;;  %v6259_v28 = vld [vmem:[%s6553_s29 + $0x30] sm:$0xff]   ;;  %v1571_v34 = vld [vmem:[%s6545_s25 + $0x38] sm:$0x1] }
  0x4c   : > { %v1700_v47 = vsel %vm6573_vm2, %v1695_v39, %v1699_v18  ;;  %v2589_v49 = vrot.slane %v2587_v41, 5  ;;  %v2597_v55 = vshll.u32 %v5717_v30, 16  ;;  %v803_v60 = vshrl.u32 %v667_v37, 16  ;;  %v1572_v35 = vld [vmem:[%s6545_s25 + $0x3c] sm:$0xf] }
  0x4d   : > { %1498 = vrot.lane.b32.xlu1 %v6255_v32, %s6426_s26  ;;  %v5597_v52 = vcombine.low %v1690_v38, %v1700_v47  ;;  %v2566_v53 = vsel %vm6573_vm2, %v2561_v43, %v2565_v29  ;;  %v2571_v54 = vrot.slane %v2570_v44, 4  ;;  %2041 = vrot.lane.b32.xlu0 %v5596_v26, %s6429_s17  ;;  %v2584_v58 = vor.u32 %v2583_v48, %v2580_v46  ;;  %v1573_v40 = vld [vmem:[%s6545_s25 + $0x40] sm:$0xf] }
  0x4e   : > { %v2593_v59 = vrot.slane %v2591_v50, 4  ;;  %v806_v61 = vshll.u32 %v667_v37, 16  ;;  %v2599_v0 = vrot.slane %v2597_v55, 5  ;;  %v812_v1 = vshll.u32 %v668_v42, 16 }
  0x4f   : > { %v2576_v63 = vsel %vm6573_vm2, %v2571_v54, %v2575_v45  ;;  %v816_v2 = vshrl.u32 %v668_v42, 16  ;;  %v2585_v4 = vrot.slane %v2584_v58, 4  ;;  %v805_v6 = vrot.slane %v803_v60, 4 }
  0x50   : > { %v5756_v3 = vcombine.low %v2566_v53, %v2576_v63  ;;  %v2594_v5 = vor.u32 %v2593_v59, %v2589_v49  ;;  %v808_v8 = vrot.slane %v806_v61, 5  ;;  %v814_v9 = vrot.slane %v812_v1, 5  ;;  %v1574_v53 = vld [vmem:[%s6545_s25 + $0x44] sm:$0x1] }
  0x51   : > { %2043 = vrot.lane.b32.xlu1 %v5597_v52, %s6429_s17  ;;  %v818_v10 = vrot.slane %v816_v2, 4  ;;  %v822_v11 = vshll.u32 %v669_v51, 16  ;;  %2219 = vrot.lane.b32.xlu0 %v6256_v57, %s6427_s14  ;;  %v2590_v13 = vsel %vm6573_vm2, %v2585_v4, %v2589_v49  ;;  %v827_v15 = vshrl.u32 %v670_v56, 16  ;;  %v5718_v2 = vld [vmem:[%s6553_s29 + $0x3c] sm:$0xf] }
  0x52   : > { %v2595_v14 = vrot.slane %v2594_v5, 4  ;;  %v830_v16 = vshll.u32 %v670_v56, 16  ;;  %v809_v17 = vor.u32 %v808_v8, %v805_v6  ;;  %v836_v21 = vshll.u32 %v671_v62, 16  ;;  %v6260_v8 = vld [vmem:[%s6545_s25 + $0x30] sm:$0xff]  }
  0x53   : > { %v819_v18 = vor.u32 %v818_v10, %v814_v9  ;;  %v824_v19 = vrot.slane %v822_v11, 5  ;;  %v829_v24 = vrot.slane %v827_v15, 4  ;;  %v840_v26 = vshrl.u32 %v671_v62, 16 }
  0x54   : > { %v2600_v23 = vsel %vm6573_vm2, %v2595_v14, %v2599_v0  ;;  %v832_v25 = vrot.slane %v830_v16, 5  ;;  %v810_v30 = vrot.slane %v809_v17, 4  ;;  %v838_v33 = vrot.slane %v836_v21, 5  ;;  %v5720_v16 = vld [vmem:[%s6553_s29 + $0x44] sm:$0x1] }
  0x55   : > { %2221 = vrot.lane.b32.xlu1 %v6257_v7, %s6427_s14  ;;  %v5757_v29 = vcombine.low %v2590_v13, %v2600_v23  ;;  %v820_v32 = vrot.slane %v819_v18, 4  ;;  %2396 = vrot.lane.b32.xlu0 %v6258_v12, %s6427_s14  ;;  %v842_v37 = vrot.slane %v840_v26, 4  ;;  %v846_v38 = vshll.u32 %v672_v20, 16  ;;  %v5719_v7 = vld [vmem:[%s6553_s29 + $0x40] sm:$0xf] }
  0x56   : > { %v833_v36 = vor.u32 %v832_v25, %v829_v24  ;;  %v1702_v39 = vshrl.u32 %v1569_v22, 16  ;;  %v815_v41 = vsel %vm6573_vm2, %v810_v30, %v814_v9  ;;  %v1705_v43 = vshll.u32 %v1569_v22, 16  ;;  %v5721_v22 = vld [vmem:[%s6553_s29 + $0x48] sm:$0xf]  ;;  %v6261_v23 = vld [vmem:[%s6545_s25 + $0x3c] sm:$0xff]  }
  0x57   : > { %v825_v42 = vsel %vm6573_vm2, %v820_v32, %v824_v19  ;;  %v1711_v44 = vshll.u32 %v1570_v27, 16  ;;  %v843_v47 = vor.u32 %v842_v37, %v838_v33  ;;  %v848_v48 = vrot.slane %v846_v38, 5  ;;  %v5723_v38 = vld [vmem:[%s6553_s29 + $0x50] sm:$0x1] }
  0x58   : > { %v5550_v45 = vcombine.low %v815_v41, %v825_v42  ;;  %v834_v46 = vrot.slane %v833_v36, 4  ;;  %v1704_v49 = vrot.slane %v1702_v39, 4  ;;  %v1707_v50 = vrot.slane %v1705_v43, 5  ;;  %v6263_v41 = vld [vmem:[%s6545_s25 + $0x3c] sm:$0xff]  }
  0x59   : > { %2398 = vrot.lane.b32.xlu1 %v6259_v28, %s6427_s14  ;;  %v1713_v51 = vrot.slane %v1711_v44, 5  ;;  %v1715_v52 = vshrl.u32 %v1570_v27, 16  ;;  %2941 = vrot.lane.b32.xlu0 %v5756_v3, %s6430_s22  ;;  %v844_v55 = vrot.slane %v843_v47, 4  ;;  %v1721_v56 = vshll.u32 %v1571_v34, 16  ;;  %v5722_v28 = vld [vmem:[%s6553_s29 + $0x4c] sm:$0xf] }
  0x5a   : > { %v839_v54 = vsel %vm6573_vm2, %v834_v46, %v838_v33  ;;  %v1726_v57 = vshrl.u32 %v1572_v35, 16  ;;  %v1708_v58 = vor.u32 %v1707_v50, %v1704_v49  ;;  %v1729_v60 = vshll.u32 %v1572_v35, 16  ;;  %v674_v46 = vld [vmem:[%s6553_s29 + $0x4c] sm:$0xf] }
  0x5b   : > { %v1717_v59 = vrot.slane %v1715_v52, 4  ;;  %v1735_v61 = vshll.u32 %v1573_v40, 16  ;;  %v849_v62 = vsel %vm6573_vm2, %v844_v55, %v848_v48  ;;  %v1723_v63 = vrot.slane %v1721_v56, 5  ;;  %v675_v55 = vld [vmem:[%s6553_s29 + $0x50] sm:$0x1] }
  0x5c   : > { %v1728_v0 = vrot.slane %v1726_v57, 4  ;;  %v1739_v1 = vshrl.u32 %v1573_v40, 16  ;;  %v5551_v3 = vcombine.low %v839_v54, %v849_v62  ;;  %v1709_v4 = vrot.slane %v1708_v58, 4  ;;  %v673_v40 = vld [vmem:[%s6553_s29 + $0x48] sm:$0xf]  ;;  %v6264_v62 = vld [vmem:[%s6553_s29 + $0x3c] sm:$0xff]  }
  0x5d   : > { %2943 = vrot.lane.b32.xlu1 %v5757_v29, %s6430_s22  ;;  %v1718_v5 = vor.u32 %v1717_v59, %v1713_v51  ;;  %v1731_v6 = vrot.slane %v1729_v60, 5  ;;  %1146 = vrot.lane.b32.xlu0 %v5550_v45, %s6428_s16  ;;  %v1737_v9 = vrot.slane %v1735_v61, 5  ;;  %v1745_v11 = vshll.u32 %v1574_v53, 16  ;;  %v6262_v29 = vld [vmem:[%s6545_s25 + $0x30] sm:$0xff]   ;;  %v677_v61 = vld [vmem:[%s6553_s29 + $0x58] sm:$0xf] }
  0x5e   : > { %v1741_v10 = vrot.slane %v1739_v1, 4  ;;  %v2602_v12 = vshrl.u32 %v5718_v2, 16  ;;  %v1714_v13 = vsel %vm6573_vm2, %v1709_v4, %v1713_v51  ;;  %v2605_v17 = vshll.u32 %v5718_v2, 16  ;;  %v676_v56 = vld [vmem:[%s6553_s29 + $0x54] sm:$0xf] }
  0x5f   : > { %v1719_v14 = vrot.slane %v1718_v5, 4  ;;  %v1732_v15 = vor.u32 %v1731_v6, %v1728_v0  ;;  %v1747_v19 = vrot.slane %v1745_v11, 5  ;;  %v2611_v21 = vshll.u32 %v5719_v7, 16 }
  0x60   : > { %v1742_v18 = vor.u32 %v1741_v10, %v1737_v9  ;;  %v2604_v20 = vrot.slane %v2602_v12, 4  ;;  %v2607_v26 = vrot.slane %v2605_v17, 5  ;;  %v2615_v27 = vshrl.u32 %v5719_v7, 16  ;;  %v6288_v7 = vld [vmem:[%s8376_s2] sm:$0xff]   ;;  %v678_v17 = vld [vmem:[%s6553_s29 + $0x5c] sm:$0x1] }
  0x61   : > { %1148 = vrot.lane.b32.xlu1 %v5551_v3, %s6428_s16  ;;  %v1724_v24 = vsel %vm6573_vm2, %v1719_v14, %v1723_v63  ;;  %v1733_v25 = vrot.slane %v1732_v15, 4  ;;  %1323 = vrot.lane.b32.xlu0 %v6260_v8, %s6426_s26  ;;  %v2613_v33 = vrot.slane %v2611_v21, 5  ;;  %v2621_v34 = vshll.u32 %v5720_v16, 16 }
  0x62   : > { %v5598_v30 = vcombine.low %v1714_v13, %v1724_v24  ;;  %v1743_v32 = vrot.slane %v1742_v18, 4  ;;  %v2608_v36 = vor.u32 %v2607_v26, %v2604_v20  ;;  %v2617_v37 = vrot.slane %v2615_v27, 4  ;;  %6080 = vmatprep.subr.bf16.mxu0 %v6288_v7  ;;  %6188 = vmatprep.subr.bf16.mxu1 %v6288_v7  ;;  %v6265_v20 = vld [vmem:[%s6553_s29 + $0x48] sm:$0xff]   ;;  %v6266_v26 = vld [vmem:[%s6553_s29 + $0x3c] sm:$0xff]  }
  0x63   : > { %v1738_v35 = vsel %vm6573_vm2, %v1733_v25, %v1737_v9  ;;  %v2626_v39 = vshrl.u32 %v5721_v22, 16  ;;  %v2623_v43 = vrot.slane %v2621_v34, 5  ;;  %v2629_v44 = vshll.u32 %v5721_v22, 16  ;;  %6081 = vmatpush3.bf16.msra.mxu0 %v6288_v7  ;;  %6190 = vmatpush3.bf16.msra.mxu1 %v6288_v7  ;;  %v1575_v25 = vld [vmem:[%s6545_s25 + $0x48] sm:$0xf] }
  0x64   : > { %v1748_v42 = vsel %vm6573_vm2, %v1743_v32, %v1747_v19  ;;  %v2635_v45 = vshll.u32 %v5722_v28, 16  ;;  %v2609_v48 = vrot.slane %v2608_v36, 4  ;;  %v2618_v49 = vor.u32 %v2617_v37, %v2613_v33  ;;  %v1576_v32 = vld [vmem:[%s6545_s25 + $0x4c] sm:$0xf]  ;;  %v1577_v37 = vld [vmem:[%s6545_s25 + $0x50] sm:$0x1] }
  0x65   : > { %1325 = vrot.lane.b32.xlu1 %v6261_v23, %s6426_s26  ;;  %v5599_v47 = vcombine.low %v1738_v35, %v1748_v42  ;;  %v2628_v50 = vrot.slane %v2626_v39, 4  ;;  %1500 = vrot.lane.b32.xlu0 %v6262_v29, %s6426_s26  ;;  %v2631_v51 = vrot.slane %v2629_v44, 5  ;;  %v2639_v53 = vshrl.u32 %v5722_v28, 16  ;;  %v6267_v44 = vld [vmem:[%s6553_s29 + $0x48] sm:$0xff]  }
  0x66   : > { %v6731_v52 = vrot.slane %v2635_v45, 5  ;;  %v2645_v54 = vshll.u32 %v5723_v38, 16  ;;  %v2614_v57 = vsel %vm6573_vm2, %v2609_v48, %v2613_v33  ;;  %v2619_v58 = vrot.slane %v2618_v49, 4  ;;  %v1578_v38 = vld [vmem:[%s6545_s25 + $0x54] sm:$0xf] }
  0x67   : > { %v851_v59 = vshrl.u32 %v673_v40, 16  ;;  %v854_v60 = vshll.u32 %v673_v40, 16  ;;  %v2632_v63 = vor.u32 %v2631_v51, %v2628_v50  ;;  %v2641_v0 = vrot.slane %v2639_v53, 4 }
  0x68   : > { %v2647_v1 = vrot.slane %v2645_v54, 5  ;;  %v860_v2 = vshll.u32 %v674_v46, 16  ;;  %v2624_v3 = vsel %vm6573_vm2, %v2619_v58, %v2623_v43  ;;  %v864_v6 = vshrl.u32 %v674_v46, 16  ;;  %v1579_v43 = vld [vmem:[%s6545_s25 + $0x58] sm:$0xf] }
  0x69   : > { %1502 = vrot.lane.b32.xlu1 %v6263_v41, %s6426_s26  ;;  %v853_v4 = vrot.slane %v851_v59, 4  ;;  %v856_v5 = vrot.slane %v854_v60, 5  ;;  %2045 = vrot.lane.b32.xlu0 %v5598_v30, %s6429_s17  ;;  %v2633_v8 = vrot.slane %v2632_v63, 4  ;;  %v2642_v9 = vor.u32 %v2641_v0, %v6731_v52 }
  0x6a   : > { %v862_v10 = vrot.slane %v860_v2, 5  ;;  %v866_v12 = vrot.slane %v864_v6, 4  ;;  %v870_v13 = vshll.u32 %v675_v55, 16  ;;  %v875_v14 = vshrl.u32 %v676_v56, 16  ;;  %v5724_v6 = vld [vmem:[%s6553_s29 + $0x54] sm:$0xf] }
  0x6b   : > { %v857_v11 = vor.u32 %v856_v5, %v853_v4  ;;  %v5758_v15 = vcombine.low %v2614_v57, %v2624_v3  ;;  %v2643_v16 = vrot.slane %v2642_v9, 4  ;;  %v878_v18 = vshll.u32 %v676_v56, 16  ;;  %v1580_v57 = vld [vmem:[%s6545_s25 + $0x5c] sm:$0x1] }
  0x6c   : > { %v884_v19 = vshll.u32 %v677_v61, 16  ;;  %v867_v22 = vor.u32 %v866_v12, %v862_v10  ;;  %v872_v23 = vrot.slane %v870_v13, 5  ;;  %v877_v24 = vrot.slane %v875_v14, 4 }
  0x6d   : > { %2047 = vrot.lane.b32.xlu1 %v5599_v47, %s6429_s17  ;;  %v858_v21 = vrot.slane %v857_v11, 4  ;;  %2223 = vrot.lane.b32.xlu0 %v6264_v62, %s6427_s14  ;;  %v2638_v27 = vsel %vm6573_vm2, %v2633_v8, %v6731_v52  ;;  %v880_v28 = vrot.slane %v878_v18, 5  ;;  %v888_v30 = vshrl.u32 %v677_v61, 16 }
  0x6e   : > { %v886_v29 = vrot.slane %v884_v19, 5  ;;  %v2648_v33 = vsel %vm6573_vm2, %v2643_v16, %v2647_v1  ;;  %v868_v35 = vrot.slane %v867_v22, 4  ;;  %v894_v36 = vshll.u32 %v678_v17, 16  ;;  %v5726_v16 = vld [vmem:[%s6553_s29 + $0x5c] sm:$0x1] }
  0x6f   : > { %v863_v34 = vsel %vm6573_vm2, %v858_v21, %v862_v10  ;;  %v881_v39 = vor.u32 %v880_v28, %v877_v24  ;;  %v890_v40 = vrot.slane %v888_v30, 4  ;;  %v1750_v41 = vshrl.u32 %v1575_v25, 16  ;;  %v5725_v10 = vld [vmem:[%s6553_s29 + $0x58] sm:$0xf]  ;;  %v5727_v19 = vld [vmem:[%s6553_s29 + $0x60] sm:$0xf] }
  0x70   : > { %v1753_v42 = vshll.u32 %v1575_v25, 16  ;;  %v873_v45 = vsel %vm6573_vm2, %v868_v35, %v872_v23  ;;  %v896_v46 = vrot.slane %v894_v36, 5  ;;  %v1759_v47 = vshll.u32 %v1576_v32, 16  ;;  %v5728_v25 = vld [vmem:[%s6553_s29 + $0x64] sm:$0xf]  ;;  %v6269_v36 = vld [vmem:[%s6545_s25 + $0x54] sm:$0xff]  }
  0x71   : > { %2225 = vrot.lane.b32.xlu1 %v6265_v20, %s6427_s14  ;;  %v1763_v48 = vshrl.u32 %v1576_v32, 16  ;;  %2400 = vrot.lane.b32.xlu0 %v6266_v26, %s6427_s14  ;;  %v5759_v49 = vcombine.low %v2638_v27, %v2648_v33  ;;  %v882_v50 = vrot.slane %v881_v39, 4  ;;  %v891_v51 = vor.u32 %v890_v40, %v886_v29  ;;  %v6268_v20 = vld [vmem:[%s6545_s25 + $0x48] sm:$0xff]  }
  0x72   : > { %v1752_v52 = vrot.slane %v1750_v41, 4  ;;  %v1755_v53 = vrot.slane %v1753_v42, 5  ;;  %v6769_v54 = vrot.slane %v1759_v47, 5  ;;  %v1769_v56 = vshll.u32 %v1577_v37, 16  ;;  %v679_v41 = vld [vmem:[%s6553_s29 + $0x60] sm:$0xf] }
  0x73   : > { %v1765_v55 = vrot.slane %v1763_v48, 4  ;;  %v5552_v58 = vcombine.low %v863_v34, %v873_v45  ;;  %v892_v59 = vrot.slane %v891_v51, 4  ;;  %v1774_v60 = vshrl.u32 %v1578_v38, 16  ;;  %v5729_v34 = vld [vmem:[%s6553_s29 + $0x68] sm:$0x1]  ;;  %v6271_v47 = vld [vmem:[%s6545_s25 + $0x54] sm:$0xff]  }
  0x74   : > { %v1777_v61 = vshll.u32 %v1578_v38, 16  ;;  %v887_v62 = vsel %vm6573_vm2, %v882_v50, %v886_v29  ;;  %v1756_v63 = vor.u32 %v1755_v53, %v1752_v52  ;;  %v1783_v1 = vshll.u32 %v1579_v43, 16  ;;  %v6270_v42 = vld [vmem:[%s6545_s25 + $0x48] sm:$0xff]   ;;  %v680_v52 = vld [vmem:[%s6553_s29 + $0x64] sm:$0xf] }
  0x75   : > { %2402 = vrot.lane.b32.xlu1 %v6267_v44, %s6427_s14  ;;  %v1766_v0 = vor.u32 %v1765_v55, %v6769_v54  ;;  %2945 = vrot.lane.b32.xlu0 %v5758_v15, %s6430_s22  ;;  %v897_v2 = vsel %vm6573_vm2, %v892_v59, %v896_v46  ;;  %v1776_v3 = vrot.slane %v1774_v60, 4  ;;  %v1787_v5 = vshrl.u32 %v1579_v43, 16 }
  0x76   : > { %v1779_v4 = vrot.slane %v1777_v61, 5  ;;  %v1757_v7 = vrot.slane %v1756_v63, 4  ;;  %v1771_v8 = vrot.slane %v1769_v56, 5  ;;  %v6780_v9 = vrot.slane %v1783_v1, 5  ;;  %v681_v61 = vld [vmem:[%s6553_s29 + $0x68] sm:$0x1] }
  0x77   : > { %v1789_v12 = vrot.slane %v1787_v5, 4  ;;  %v1793_v13 = vshll.u32 %v1580_v57, 16  ;;  %v2650_v14 = vshrl.u32 %v5724_v6, 16  ;;  %v5553_v15 = vcombine.low %v887_v62, %v897_v2  ;;  %v682_v57 = vld [vmem:[%s6553_s29 + $0x6c] sm:$0xf] }
  0x78   : > { %v1780_v11 = vor.u32 %v1779_v4, %v1776_v3  ;;  %v2653_v17 = vshll.u32 %v5724_v6, 16  ;;  %v2659_v18 = vshll.u32 %v5725_v10, 16  ;;  %v1767_v21 = vrot.slane %v1766_v0, 4  ;;  %v683_v63 = vld [vmem:[%s6553_s29 + $0x70] sm:$0xf] }
  0x79   : > { %2947 = vrot.lane.b32.xlu1 %v5759_v49, %s6430_s22  ;;  %1150 = vrot.lane.b32.xlu0 %v5552_v58, %s6428_s16  ;;  %v1790_v23 = vor.u32 %v1789_v12, %v6780_v9  ;;  %v1795_v24 = vrot.slane %v1793_v13, 5  ;;  %v2652_v26 = vrot.slane %v2650_v14, 4  ;;  %v2663_v29 = vshrl.u32 %v5725_v10, 16  ;;  %v6280_v13 = vld [vmem:[%s6553_s29] sm:$0xff]   ;;  %v6282_v14 = vld [vmem:[%s6553_s29 + $0xc] sm:$0xff]  }
  0x7a   : > { %v1781_v22 = vrot.slane %v1780_v11, 4  ;;  %v2655_v27 = vrot.slane %v2653_v17, 5  ;;  %v6790_v28 = vrot.slane %v2659_v18, 5  ;;  %v1762_v30 = vsel %vm6573_vm2, %v1757_v7, %v6769_v54  ;;  %v6822_v7 = vld [vmem:[%s6553_s29 + $0x74] sm:$0x1]  ;;  %v6300_v18 = vld [vmem:[%s6553_s29 + $0x3c] sm:$0xff]  }
  0x7b   : > { %v1791_v32 = vrot.slane %v1790_v23, 4  ;;  %v2669_v33 = vshll.u32 %v5726_v16, 16  ;;  %v2674_v35 = vshrl.u32 %v5727_v19, 16  ;;  %v2665_v38 = vrot.slane %v2663_v29, 4  ;;  %v6291_v16 = vld [vmem:[%s6553_s29 + $0x24] sm:$0xff]   ;;  %v6298_v17 = vld [vmem:[%s6553_s29 + $0x30] sm:$0xff]  }
  0x7c   : > { %v2656_v37 = vor.u32 %v2655_v27, %v2652_v26  ;;  %v2677_v39 = vshll.u32 %v5727_v19, 16  ;;  %v2683_v40 = vshll.u32 %v5728_v25, 16  ;;  %v1772_v43 = vsel %vm6573_vm2, %v1767_v21, %v1771_v8  ;;  %v6272_v8 = vld [vmem:[%s6553_s29 + $0x54] sm:$0xff]   ;;  %v6281_v23 = vld [vmem:[%s6553_s29] sm:$0xff]   ;;  %494 = vst.msk [vmem:[#allocation2] sm:$0xff] %vm493_vm3, %v6280_v13  ;;  %495 = vst.msk [vmem:[#allocation2 + $0x8] sm:$0xff] %vm493_vm3, %v6282_v14 }
  0x7d   : > { %1152 = vrot.lane.b32.xlu1 %v5553_v15, %s6428_s16  ;;  %1327 = vrot.lane.b32.xlu0 %v6268_v20, %s6426_s26  ;;  %v1786_v44 = vsel %vm6573_vm2, %v1781_v22, %v6780_v9  ;;  %v2676_v45 = vrot.slane %v2674_v35, 4  ;;  %v2687_v46 = vshrl.u32 %v5728_v25, 16  ;;  %v1796_v48 = vsel %vm6573_vm2, %v1791_v32, %v1795_v24  ;;  %v6289_v15 = vld [vmem:[%s6553_s29 + $0x18] sm:$0xff]   ;;  %v6283_v24 = vld [vmem:[%s6553_s29 + $0xc] sm:$0xff]   ;;  %497 = vst.msk [vmem:[#allocation2 + $0x18] sm:$0xff] %vm493_vm3, %v6291_v16 }
  0x7e   : > { %v2666_v49 = vor.u32 %v2665_v38, %v6790_v28  ;;  %v6810_v50 = vrot.slane %v2669_v33, 5  ;;  %v2679_v51 = vrot.slane %v2677_v39, 5  ;;  %v6813_v53 = vrot.slane %v2683_v40, 5  ;;  %v6290_v25 = vld [vmem:[%s6553_s29 + $0x18] sm:$0xff]   ;;  %v6292_v26 = vld [vmem:[%s6553_s29 + $0x24] sm:$0xff]   ;;  %v6299_v27 = vld [vmem:[%s6553_s29 + $0x30] sm:$0xff]  }
  0x7f   : > { %v2689_v54 = vrot.slane %v2687_v46, 4  ;;  %v2693_v55 = vshll.u32 %v5729_v34, 16  ;;  %v899_v56 = vshrl.u32 %v679_v41, 16  ;;  %v5600_v58 = vcombine.low %v1762_v30, %v1772_v43  ;;  %v6301_v29 = vld [vmem:[%s6553_s29 + $0x3c] sm:$0xff]   ;;  %v6306_v34 = vld [vmem:[%s6553_s29 + $0x48] sm:$0xff]   ;;  %496 = vst.msk [vmem:[#allocation2 + $0x10] sm:$0xff] %vm493_vm3, %v6289_v15 }
  0x80   : > { %v2657_v59 = vrot.slane %v2656_v37, 4  ;;  %v2680_v60 = vor.u32 %v2679_v51, %v2676_v45  ;;  %v902_v62 = vshll.u32 %v679_v41, 16  ;;  %v2667_v0 = vrot.slane %v2666_v49, 4  ;;  %v6273_v43 = vld [vmem:[%s6553_s29 + $0x60] sm:$0xff]   ;;  %v6307_v46 = vld [vmem:[%s6553_s29 + $0x48] sm:$0xff]   ;;  %498 = vst.msk [vmem:[#allocation2 + $0x20] sm:$0xff] %vm493_vm3, %v6298_v17 }
  0x81   : > { %1329 = vrot.lane.b32.xlu1 %v6269_v36, %s6426_s26  ;;  %1504 = vrot.lane.b32.xlu0 %v6270_v42, %s6426_s26  ;;  %v2690_v1 = vor.u32 %v2689_v54, %v6813_v53  ;;  %v901_v2 = vrot.slane %v899_v56, 4  ;;  %v908_v3 = vshll.u32 %v680_v52, 16  ;;  %v5601_v4 = vcombine.low %v1786_v44, %v1796_v48  ;;  %v1581_v42 = vld [vmem:[%s6545_s25 + $0x60] sm:$0xf]  ;;  %v1582_v45 = vld [vmem:[%s6545_s25 + $0x64] sm:$0xf] }
  0x82   : > { %v904_v5 = vrot.slane %v902_v62, 5  ;;  %v912_v6 = vshrl.u32 %v680_v52, 16  ;;  %v6825_v9 = vrot.slane %v2680_v60, 4  ;;  %v6829_v11 = vrot.slane %v2693_v55, 5  ;;  %499 = vst.msk [vmem:[#allocation2 + $0x28] sm:$0xff] %vm493_vm3, %v6300_v18  ;;  %500 = vst.msk [vmem:[#allocation2 + $0x30] sm:$0xff] %vm493_vm3, %v6306_v34 }
  0x83   : > { %v6827_v10 = vrot.slane %v2690_v1, 4  ;;  %v6831_v12 = vrot.slane %v908_v3, 5  ;;  %v2662_v19 = vsel %vm6573_vm2, %v2657_v59, %v6790_v28  ;;  %v923_v22 = vshrl.u32 %v682_v57, 16  ;;  %v6308_v52 = vld [vmem:[%s6553_s29 + $0x54] sm:$0xff]   ;;  %v6275_v54 = vld [vmem:[%s6553_s29 + $0x60] sm:$0xff]   ;;  %639 = vst.msk [vmem:[#allocation2] sm:$0xff] %vm638_vm4, %v6281_v23 }
  0x84   : > { %v905_v20 = vor.u32 %v904_v5, %v901_v2  ;;  %v914_v21 = vrot.slane %v912_v6, 4  ;;  %v2672_v30 = vsel %vm6573_vm2, %v2667_v0, %v6810_v50  ;;  %v918_v32 = vshll.u32 %v681_v61, 16  ;;  %v1584_v60 = vld [vmem:[%s6545_s25 + $0x6c] sm:$0xf]  ;;  %640 = vst.msk [vmem:[#allocation2 + $0x8] sm:$0xff] %vm638_vm4, %v6283_v24  ;;  %641 = vst.msk [vmem:[#allocation2 + $0x10] sm:$0xff] %vm638_vm4, %v6290_v25 }
  0x85   : > { %1506 = vrot.lane.b32.xlu1 %v6271_v47, %s6426_s26  ;;  %2049 = vrot.lane.b32.xlu0 %v5600_v58, %s6429_s17  ;;  %v926_v33 = vshll.u32 %v682_v57, 16  ;;  %v932_v28 = vshll.u32 %v683_v63, 16  ;;  %v925_v37 = vrot.slane %v923_v22, 4  ;;  %v936_v40 = vshrl.u32 %v683_v63, 16  ;;  %v6274_v47 = vld [vmem:[%s6553_s29 + $0x54] sm:$0xff]   ;;  %642 = vst.msk [vmem:[#allocation2 + $0x18] sm:$0xff] %vm638_vm4, %v6292_v26 }
  0x86   : > { %v6854_v35 = vrot.slane %v905_v20, 4  ;;  %v915_v36 = vor.u32 %v914_v21, %v6831_v12  ;;  %v942_v41 = vshll.u32 %v6822_v7, 16  ;;  %v6863_v44 = vcombine.low %v2662_v19, %v2672_v30  ;;  %643 = vst.msk [vmem:[#allocation2 + $0x20] sm:$0xff] %vm638_vm4, %v6299_v27  ;;  %644 = vst.msk [vmem:[#allocation2 + $0x28] sm:$0xff] %vm638_vm4, %v6301_v29  ;;  %v1583_v0 = vld [vmem:[%s6545_s25 + $0x68] sm:$0x1] }
  0x87   : > { %v928_v38 = vrot.slane %v926_v33, 5  ;;  %v6857_v39 = vrot.slane %v932_v28, 5  ;;  %v920_v49 = vrot.slane %v918_v32, 5  ;;  %v938_v51 = vrot.slane %v936_v40, 4  ;;  %645 = vst.msk [vmem:[#allocation2 + $0x30] sm:$0xff] %vm638_vm4, %v6307_v46  ;;  %v6310_v13 = vld [vmem:[%s6553_s29 + $0x60] sm:$0xff]  }
  0x88   : > { %v6869_v48 = vrot.slane %v915_v36, 4  ;;  %v2686_v55 = vsel %vm6573_vm2, %v6825_v9, %v6813_v53  ;;  %v2696_v56 = vsel %vm6573_vm2, %v6827_v10, %v6829_v11  ;;  %v1798_v58 = vshrl.u32 %v1581_v42, 16  ;;  %v6309_v53 = vld [vmem:[%s6553_s29 + $0x54] sm:$0xff]   ;;  %v1585_v2 = vld [vmem:[%s6545_s25 + $0x70] sm:$0xf]  ;;  %501 = vst.msk [vmem:[#allocation2 + $0x38] sm:$0xff] %vm493_vm3, %v6308_v52 }
  0x89   : > { %2051 = vrot.lane.b32.xlu1 %v5601_v4, %s6429_s17  ;;  %2227 = vrot.lane.b32.xlu0 %v6272_v8, %s6427_s14  ;;  %v929_v50 = vor.u32 %v928_v38, %v925_v37  ;;  %v1801_v59 = vshll.u32 %v1581_v42, 16  ;;  %v911_v61 = vsel %vm6573_vm2, %v6854_v35, %v6831_v12  ;;  %v939_v62 = vor.u32 %v938_v51, %v6857_v39  ;;  %v1586_v7 = vld [vmem:[%s6545_s25 + $0x74] sm:$0x1]  ;;  %v6311_v18 = vld [vmem:[%s6553_s29 + $0x60] sm:$0xff]  }
  0x8a   : > { %v944_v63 = vrot.slane %v942_v41, 5  ;;  %v1807_v1 = vshll.u32 %v1582_v45, 16  ;;  %v1800_v4 = vrot.slane %v1798_v58, 4  ;;  %v1811_v6 = vshrl.u32 %v1582_v45, 16  ;;  %646 = vst.msk [vmem:[#allocation2 + $0x38] sm:$0xff] %vm638_vm4, %v6309_v53  ;;  %v6312_v24 = vld [vmem:[%s6553_s29 + $0x6c] sm:$0xff]  }
  0x8b   : > { %v930_v3 = vrot.slane %v929_v50, 4  ;;  %v1803_v5 = vrot.slane %v1801_v59, 5  ;;  %v921_v8 = vsel %vm6573_vm2, %v6869_v48, %v920_v49  ;;  %v940_v9 = vrot.slane %v939_v62, 4  ;;  %502 = vst.msk [vmem:[#allocation2 + $0x40] sm:$0xff] %vm493_vm3, %v6310_v13  ;;  %503 = vst.msk [vmem:[#allocation2 + $0x48] sm:$0xff] %vm493_vm3, %v6312_v24  ;;  %v6276_v37 = vld [vmem:[%s6545_s25 + $0x60] sm:$0xff]  }
  0x8c   : > { %v6916_v11 = vrot.slane %v1807_v1, 5  ;;  %v1822_v12 = vshrl.u32 %v1584_v60, 16  ;;  %v1813_v15 = vrot.slane %v1811_v6, 4  ;;  %v1817_v16 = vshll.u32 %v1583_v0, 16  ;;  %647 = vst.msk [vmem:[#allocation2 + $0x40] sm:$0xff] %vm638_vm4, %v6311_v18  ;;  %v6277_v50 = vld [vmem:[%s6545_s25 + $0x6c] sm:$0xff]  }
  0x8d   : > { %v6888_v57 = vpop.permute.xlu1 %1315  ;;  %2229 = vrot.lane.b32.xlu1 %v6273_v43, %s6427_s14  ;;  %2404 = vrot.lane.b32.xlu0 %v6274_v47, %s6427_s14  ;;  %v1804_v14 = vor.u32 %v1803_v5, %v1800_v4  ;;  %v1825_v17 = vshll.u32 %v1584_v60, 16  ;;  %v5761_v19 = vcombine.low %v2686_v55, %v2696_v56  ;;  %v1831_v22 = vshll.u32 %v1585_v2, 16  ;;  %v5731_v47 = vld [vmem:[%s6553_s29 + $0x70] sm:$0xf]  ;;  %v5732_v48 = vld [vmem:[%s6553_s29 + $0x74] sm:$0x1] }
  0x8e   : > { %v6914_v10 = vpop.permute.xlu0 %1492  ;;  %v1824_v21 = vrot.slane %v1822_v12, 4  ;;  %v1835_v23 = vshrl.u32 %v1585_v2, 16  ;;  %v5554_v25 = vcombine.low %v911_v61, %v921_v8  ;;  %v935_v26 = vsel %vm6573_vm2, %v930_v3, %v6857_v39  ;;  %v5733_v55 = vld [vmem:[%s6553_s29 + $0x78] sm:$0xf]  ;;  %v6313_v56 = vld [vmem:[%s6553_s29 + $0x6c] sm:$0xff]   ;;  %v6278_v2 = vld [vmem:[%s6545_s25 + $0x60] sm:$0xff]  }
  0x8f   : > { %v1814_v27 = vor.u32 %v1813_v15, %v6916_v11  ;;  %v1827_v29 = vrot.slane %v1825_v17, 5  ;;  %v945_v30 = vsel %vm6573_vm2, %v940_v9, %v944_v63  ;;  %v6934_v32 = vrot.slane %v1831_v22, 5  ;;  %v5734_v53 = vld [vmem:[%s6553_s29 + $0x7c] sm:$0xf]  ;;  %v5735_v61 = vld [vmem:[%s6553_s29 + $0x80] sm:$0x1] }
  0x90   : > { %v1837_v33 = vrot.slane %v1835_v23, 4  ;;  %v1841_v28 = vshll.u32 %v1586_v7, 16  ;;  %v6937_v34 = vrot.slane %v1804_v14, 4  ;;  %v6939_v35 = vrot.slane %v1817_v16, 5  ;;  %648 = vst.msk [vmem:[#allocation2 + $0x48] sm:$0xff] %vm638_vm4, %v6313_v56  ;;  %v6279_v8 = vld [vmem:[%s6545_s25 + $0x6c] sm:$0xff]  }
  0x91   : > { %v6920_v20 = vpop.permute.xlu1 %1317  ;;  %2406 = vrot.lane.b32.xlu1 %v6275_v54, %s6427_s14  ;;  %2949 = vrot.lane.b32.xlu0 %v6863_v44, %s6430_s22  ;;  %v1828_v36 = vor.u32 %v1827_v29, %v1824_v21  ;;  %v1815_v39 = vrot.slane %v1814_v27, 4  ;;  %v5555_v41 = vcombine.low %v935_v26, %v945_v30  ;;  %v5730_v44 = vld [vmem:[%s6553_s29 + $0x6c] sm:$0xf]  ;;  %v2707_v52 = vshll.u32 %v5731_v47, 16  ;;  %v685_v29 = vld [vmem:[%s6553_s29 + $0x78] sm:$0xf] }
  0x92   : > { %v6942_v38 = vpop.permute.xlu0 %2215  ;;  %v1838_v40 = vor.u32 %v1837_v33, %v6934_v32  ;;  %v1843_v43 = vrot.slane %v1841_v28, 5  ;;  %v2698_v49 = vshrl.u32 %v5730_v44, 16  ;;  %v2701_v51 = vshll.u32 %v5730_v44, 16  ;;  %v6293_v26 = vld [vmem:[%s8376_s2 + $0x8] sm:$0x3f]  }
  0x93   : > { %v1829_v42 = vrot.slane %v1828_v36, 4  ;;  %v2711_v54 = vshrl.u32 %v5731_v47, 16  ;;  %v1810_v58 = vsel %vm6573_vm2, %v6937_v34, %v6916_v11  ;;  %v1820_v59 = vsel %vm6573_vm2, %v1815_v39, %v6939_v35  ;;  %v686_v30 = vld [vmem:[%s6553_s29 + $0x7c] sm:$0xf]  ;;  %v687_v28 = vld [vmem:[%s6553_s29 + $0x80] sm:$0x1] }
  0x94   : > { %v1839_v46 = vrot.slane %v1838_v40, 4  ;;  %v2700_v60 = vrot.slane %v2698_v49, 4  ;;  %v2703_v62 = vrot.slane %v2701_v51, 5  ;;  %v6965_v63 = vrot.slane %v2707_v52, 5  ;;  %v688_v39 = vld [vmem:[%s6553_s29 + $0x84] sm:$0xf] }
  0x95   : > { %2951 = vrot.lane.b32.xlu1 %v5761_v19, %s6430_s22  ;;  %1154 = vrot.lane.b32.xlu0 %v5554_v25, %s6428_s16  ;;  %v6948_v45 = vpop.permute.xlu1 %1494  ;;  %v2713_v0 = vrot.slane %v2711_v54, 4  ;;  %v2717_v1 = vshll.u32 %v5732_v48, 16  ;;  %v1834_v4 = vsel %vm6573_vm2, %v1829_v42, %v6934_v32  ;;  %v2722_v5 = vshrl.u32 %v5733_v55, 16  ;;  %v6284_v40 = vld [vmem:[%s6553_s29 + $0x6c] sm:$0xff]   ;;  %v6285_v52 = vld [vmem:[%s6553_s29 + $0x78] sm:$0xff]  }
  0x96   : > { %v2725_v6 = vshll.u32 %v5733_v55, 16  ;;  %v2731_v7 = vshll.u32 %v5734_v53, 16  ;;  %v1844_v9 = vsel %vm6573_vm2, %v1839_v46, %v1843_v43  ;;  %v2704_v11 = vor.u32 %v2703_v62, %v2700_v60  ;;  %v689_v46 = vld [vmem:[%s6553_s29 + $0x88] sm:$0xf]  ;;  %v690_v51 = vld [vmem:[%s6553_s29 + $0x8c] sm:$0x1] }
  0x97   : > { %v2714_v12 = vor.u32 %v2713_v0, %v6965_v63  ;;  %v2735_v13 = vshrl.u32 %v5734_v53, 16  ;;  %v2724_v15 = vrot.slane %v2722_v5, 4  ;;  %v2741_v18 = vshll.u32 %v5735_v61, 16  ;;  %v6286_v62 = vld [vmem:[%s6553_s29 + $0x6c] sm:$0xff]  }
  0x98   : > { %v2727_v16 = vrot.slane %v2725_v6, 5  ;;  %v6980_v17 = vrot.slane %v2731_v7, 5  ;;  %v6985_v19 = vrot.slane %v2704_v11, 4  ;;  %v6989_v22 = vrot.slane %v2717_v1, 5 }
  0x99   : > { %1156 = vrot.lane.b32.xlu1 %v5555_v41, %s6428_s16  ;;  %1331 = vrot.lane.b32.xlu0 %v6276_v37, %s6426_s26  ;;  %v2218_v14 = vpop.permute.xlu1 %2217  ;;  %v6987_v21 = vrot.slane %v2714_v12, 4  ;;  %v5602_v23 = vcombine.low %v1810_v58, %v1820_v59  ;;  %v5603_v27 = vcombine.low %v1834_v4, %v1844_v9  ;;  %v7003_v33 = vrot.slane %v2741_v18, 5  ;;  %v6287_v9 = vld [vmem:[%s6553_s29 + $0x78] sm:$0xff]  }
  0x9a   : > { %v1139_v3 = vpop.permute.xlu0 %1138  ;;  %v2728_v25 = vor.u32 %v2727_v16, %v2724_v15  ;;  %v2710_v34 = vsel %vm6573_vm2, %v6985_v19, %v6965_v63  ;;  %v6431_v36 = vmov 65535   ;;  %v947_v37 = vshrl.u32 %v685_v29, 16 }
  0x9b   : > { %1187 = vst.msk [vmem:[#allocation2] sm:$0xff] %vm1186_vm5, %v1139_v3  ;;  %v2720_v42 = vsel %vm6573_vm2, %v6987_v21, %v6989_v22  ;;  %v950_v44 = vshll.u32 %v685_v29, 16  ;;  %v966_v58 = vshll.u32 %v687_v28, 16  ;;  %v971_v60 = vshrl.u32 %v688_v39, 16  ;;  %v1587_v21 = vld [vmem:[%s6545_s25 + $0x78] sm:$0xf] }
  0x9c   : > { %1364 = vst.msk [vmem:[#allocation2] sm:$0xff] %vm1363_vm6, %v6888_v57  ;;  %v2737_v57 = vrot.slane %v2735_v13, 4  ;;  %v7001_v32 = vrot.slane %v2728_v25, 4  ;;  %v949_v49 = vrot.slane %v947_v37, 4  ;;  %v974_v53 = vshll.u32 %v688_v39, 16 }
  0x9d   : > { %1333 = vrot.lane.b32.xlu1 %v6277_v50, %s6426_s26  ;;  %1541 = vst.msk [vmem:[#allocation2] sm:$0xff] %vm1540_vm7, %v6914_v10  ;;  %1508 = vrot.lane.b32.xlu0 %v6278_v2, %s6426_s26  ;;  %v960_v50 = vshrl.u32 %v686_v30, 16  ;;  %v952_v55 = vrot.slane %v950_v44, 5  ;;  %v980_v61 = vshll.u32 %v689_v46, 16  ;;  %v968_v1 = vrot.slane %v966_v58, 5  ;;  %v6328_v58 = vld [vmem:[%s6553_s29 + $0x78] sm:$0xff]  }
  0x9e   : > { %v1141_v24 = vpop.permute.xlu0 %1140  ;;  %v2738_v10 = vor.u32 %v2737_v57, %v6980_v17  ;;  %v2734_v47 = vsel %vm6573_vm2, %v7001_v32, %v6980_v17  ;;  %v984_v2 = vshrl.u32 %v689_v46, 16  ;;  %v990_v3 = vshll.u32 %v690_v51, 16  ;;  %v1588_v22 = vld [vmem:[%s6545_s25 + $0x7c] sm:$0xf]  ;;  %v1589_v57 = vld [vmem:[%s6545_s25 + $0x80] sm:$0x1] }
  0x9f   : > { %1188 = vst.msk [vmem:[#allocation2 + $0x8] sm:$0xff] %vm1186_vm5, %v1141_v24  ;;  %v962_v59 = vrot.slane %v960_v50, 4  ;;  %v953_v0 = vor.u32 %v952_v55, %v949_v49  ;;  %v973_v5 = vrot.slane %v971_v60, 4  ;;  %v976_v6 = vrot.slane %v974_v53, 5 }
  0xa0   : > { %1365 = vst.msk [vmem:[#allocation2 + $0x8] sm:$0xff] %vm1363_vm6, %v6920_v20  ;;  %v2739_v35 = vrot.slane %v2738_v10, 4  ;;  %v3091_v20 = vsel %vm3089_vm11, 4294967295, %v6431_v36  ;;  %v982_v7 = vrot.slane %v980_v61, 5  ;;  %v986_v12 = vrot.slane %v984_v2, 4  ;;  %v6329_v61 = vld [vmem:[%s6553_s29 + $0x78] sm:$0xff]  }
  0xa1   : > { %1510 = vrot.lane.b32.xlu1 %v6279_v8, %s6426_s26  ;;  %1542 = vst.msk [vmem:[#allocation2 + $0x8] sm:$0xff] %vm1540_vm7, %v6948_v45  ;;  %2053 = vrot.lane.b32.xlu0 %v5602_v23, %s6429_s17  ;;  %v3092_v43 = vsel %vm3090_vm12, %v3091_v20, 0  ;;  %v956_v45 = vshll.u32 %v686_v30, 16  ;;  %v954_v11 = vrot.slane %v953_v0, 4  ;;  %v992_v15 = vrot.slane %v990_v3, 5  ;;  %v6296_v3 = vld [vmem:[%s6545_s25 + $0x78] sm:$0xff]  }
  0xa2   : > { %v2040_v41 = vpop.permute.xlu1 %2039  ;;  %v3094_v48 = vand.u32 %v6293_v26, %v3092_v43  ;;  %v2744_v54 = vsel %vm6573_vm2, %v2739_v35, %v7003_v33  ;;  %v5762_v16 = vcombine.low %v2710_v34, %v2720_v42  ;;  %v987_v19 = vor.u32 %v986_v12, %v982_v7  ;;  %v1591_v33 = vld [vmem:[%s6545_s25 + $0x88] sm:$0xf]  ;;  %v1592_v20 = vld [vmem:[%s6545_s25 + $0x8c] sm:$0x1]  ;;  %504 = vst.msk [vmem:[#allocation2 + $0x50] sm:$0xff] %vm493_vm3, %v6328_v58 }
  0xa3   : > { %2087 = vst.msk [vmem:[#allocation2 + $0x8] sm:$0xff] %vm2085_vm8, %v2040_v41  ;;  %v958_v56 = vrot.slane %v956_v45, 5  ;;  %v5763_v17 = vcombine.low %v2734_v47, %v2744_v54  ;;  %v1846_v25 = vshrl.u32 %v1587_v21, 16  ;;  %v1849_v26 = vshll.u32 %v1587_v21, 16  ;;  %v6294_v47 = vld [vmem:[%s6545_s25 + $0x78] sm:$0xff]  }
  0xa4   : > { %2265 = vst.msk [vmem:[#allocation2 + $0x8] sm:$0xff] %vm2263_vm9, %v2218_v14  ;;  %6082 = vmatprep.subr.bf16.mxu0 %v3094_v48  ;;  %6189 = vmatprep.subr.bf16.mxu1 %v3094_v48  ;;  %v977_v14 = vor.u32 %v976_v6, %v973_v5  ;;  %v988_v29 = vrot.slane %v987_v19, 4  ;;  %v1855_v30 = vshll.u32 %v1588_v22, 16  ;;  %v1859_v32 = vshrl.u32 %v1588_v22, 16  ;;  %v6331_v6 = vld [vmem:[%s6553_s29 + $0x84] sm:$0xff]  }
  0xa5   : > { %2055 = vrot.lane.b32.xlu1 %v5603_v27, %s6429_s17  ;;  %2231 = vrot.lane.b32.xlu0 %v6284_v40, %s6427_s14  ;;  %v963_v4 = vor.u32 %v962_v59, %v958_v56  ;;  %v959_v18 = vsel %vm6573_vm2, %v954_v11, %v958_v56  ;;  %v1590_v27 = vld [vmem:[%s6545_s25 + $0x84] sm:$0xf]  ;;  %v1848_v34 = vrot.slane %v1846_v25, 4  ;;  %v1851_v35 = vrot.slane %v1849_v26, 5  ;;  %649 = vst.msk [vmem:[#allocation2 + $0x50] sm:$0xff] %vm638_vm4, %v6329_v61 }
  0xa6   : > { %v2395_v63 = vpop.permute.xlu1 %2394  ;;  %6083 = vmatpush3.bf16.msra.mxu0 %v3094_v48  ;;  %6191 = vmatpush3.bf16.msra.mxu1 %v3094_v48  ;;  %v978_v24 = vrot.slane %v977_v14, 4  ;;  %v1865_v36 = vshll.u32 %v1589_v57, 16  ;;  %v993_v37 = vsel %vm6573_vm2, %v988_v29, %v992_v15  ;;  %v7059_v39 = vrot.slane %v1855_v30, 5  ;;  %v5736_v14 = vld [vmem:[%s6553_s29 + $0x84] sm:$0xf] }
  0xa7   : > { %2442 = vst.msk [vmem:[#allocation2 + $0x8] sm:$0xff] %vm2440_vm10, %v2395_v63  ;;  %v2038_v8 = vpop.permute.xlu0 %2037  ;;  %v964_v13 = vrot.slane %v963_v4, 4  ;;  %v1861_v40 = vrot.slane %v1859_v32, 4  ;;  %v1870_v41 = vshrl.u32 %v1590_v27, 16  ;;  %v1852_v43 = vor.u32 %v1851_v35, %v1848_v34  ;;  %v5738_v19 = vld [vmem:[%s6553_s29 + $0x8c] sm:$0x1] }
  0xa8   : > { %2086 = vst.msk [vmem:[#allocation2] sm:$0xff] %vm2085_vm8, %v2038_v8  ;;  %v983_v28 = vsel %vm6573_vm2, %v978_v24, %v982_v7  ;;  %v7061_v44 = vrot.slane %v1865_v36, 5  ;;  %v1873_v45 = vshll.u32 %v1590_v27, 16  ;;  %v1879_v50 = vshll.u32 %v1591_v33, 16  ;;  %v6297_v22 = vld [vmem:[%s6545_s25 + $0x84] sm:$0xff]  }
  0xa9   : > { %2233 = vrot.lane.b32.xlu1 %v6285_v52, %s6427_s14  ;;  %2408 = vrot.lane.b32.xlu0 %v6286_v62, %s6427_s14  ;;  %2264 = vst.msk [vmem:[#allocation2] sm:$0xff] %vm2263_vm9, %v6942_v38  ;;  %v969_v23 = vsel %vm6573_vm2, %v964_v13, %v968_v1  ;;  %v1862_v48 = vor.u32 %v1861_v40, %v7059_v39  ;;  %v1872_v49 = vrot.slane %v1870_v41, 4  ;;  %v1883_v51 = vshrl.u32 %v1591_v33, 16  ;;  %v6295_v62 = vld [vmem:[%s6545_s25 + $0x84] sm:$0xff]   ;;  %v5739_v25 = vld [vmem:[%s6553_s29 + $0x90] sm:$0xf] }
  0xaa   : > { %v5556_v38 = vcombine.low %v959_v18, %v969_v23  ;;  %v5557_v52 = vcombine.low %v983_v28, %v993_v37  ;;  %v1853_v54 = vrot.slane %v1852_v43, 4  ;;  %v1875_v55 = vrot.slane %v1873_v45, 5  ;;  %v6330_v1 = vld [vmem:[%s6553_s29 + $0x84] sm:$0xff]   ;;  %v5740_v29 = vld [vmem:[%s6553_s29 + $0x94] sm:$0xf] }
  0xab   : > { %v2393_v10 = vpop.permute.xlu0 %2392  ;;  %v1889_v56 = vshll.u32 %v1592_v20, 16  ;;  %v1863_v59 = vrot.slane %v1862_v48, 4  ;;  %v1881_v60 = vrot.slane %v1879_v50, 5  ;;  %v1885_v53 = vrot.slane %v1883_v51, 4  ;;  %505 = vst.msk [vmem:[#allocation2 + $0x58] sm:$0xff] %vm493_vm3, %v6330_v1  ;;  %v6302_v45 = vld [vmem:[%s6553_s29 + $0x84] sm:$0xff]  }
  0xac   : > { %2441 = vst.msk [vmem:[#allocation2] sm:$0xff] %vm2440_vm10, %v2393_v10  ;;  %v1876_v63 = vor.u32 %v1875_v55, %v1872_v49  ;;  %v1858_v11 = vsel %vm6573_vm2, %v1853_v54, %v7059_v39  ;;  %v5737_v18 = vld [vmem:[%s6553_s29 + $0x88] sm:$0xf]  ;;  %v2746_v21 = vshrl.u32 %v5736_v14, 16  ;;  %v2749_v57 = vshll.u32 %v5736_v14, 16  ;;  %v6303_v50 = vld [vmem:[%s6553_s29 + $0x90] sm:$0xff]  }
  0xad   : > { %2410 = vrot.lane.b32.xlu1 %v6287_v9, %s6427_s14  ;;  %2953 = vrot.lane.b32.xlu0 %v5762_v16, %s6430_s22  ;;  %v1891_v0 = vrot.slane %v1889_v56, 5  ;;  %v1886_v4 = vor.u32 %v1885_v53, %v1881_v60  ;;  %v1868_v12 = vsel %vm6573_vm2, %v1863_v59, %v7061_v44  ;;  %650 = vst.msk [vmem:[#allocation2 + $0x58] sm:$0xff] %vm638_vm4, %v6331_v6  ;;  %v2755_v23 = vshll.u32 %v5737_v18, 16  ;;  %v5741_v30 = vld [vmem:[%s6553_s29 + $0x98] sm:$0x1]  ;;  %v6304_v1 = vld [vmem:[%s6553_s29 + $0x84] sm:$0xff]  }
  0xae   : > { %v1877_v5 = vrot.slane %v1876_v63, 4  ;;  %v2759_v24 = vshrl.u32 %v5737_v18, 16  ;;  %v5604_v26 = vcombine.low %v1858_v11, %v1868_v12  ;;  %v2748_v10 = vrot.slane %v2746_v21, 4  ;;  %v691_v59 = vld [vmem:[%s6553_s29 + $0x90] sm:$0xf] }
  0xaf   : > { %v2940_v42 = vpop.permute.xlu1 %2939  ;;  %v2938_v46 = vpop.permute.xlu0 %2937  ;;  %v1887_v7 = vrot.slane %v1886_v4, 4  ;;  %v2751_v33 = vrot.slane %v2749_v57, 5  ;;  %v2757_v28 = vrot.slane %v2755_v23, 5  ;;  %v2770_v35 = vshrl.u32 %v5739_v25, 16  ;;  %v692_v61 = vld [vmem:[%s6553_s29 + $0x94] sm:$0xf] }
  0xb0   : > { %2987 = vst.msk [vmem:[#allocation2 + $0x8] sm:$0xff] %vm2985_vm13, %v2940_v42  ;;  %2986 = vst.msk [vmem:[#allocation2] sm:$0xff] %vm2985_vm13, %v2938_v46  ;;  %v1882_v13 = vsel %vm6573_vm2, %v1877_v5, %v1881_v60  ;;  %v2761_v34 = vrot.slane %v2759_v24, 4  ;;  %v2773_v37 = vshll.u32 %v5739_v25, 16  ;;  %v2779_v39 = vshll.u32 %v5740_v29, 16  ;;  %v6305_v12 = vld [vmem:[%s6553_s29 + $0x90] sm:$0xff]  }
  0xb1   : > { %2955 = vrot.lane.b32.xlu1 %v5763_v17, %s6430_s22  ;;  %1158 = vrot.lane.b32.xlu0 %v5556_v38, %s6428_s16  ;;  %v1892_v17 = vsel %vm6573_vm2, %v1887_v7, %v1891_v0  ;;  %v2765_v38 = vshll.u32 %v5738_v19, 16  ;;  %v2783_v40 = vshrl.u32 %v5740_v29, 16  ;;  %v2752_v41 = vor.u32 %v2751_v33, %v2748_v10  ;;  %v694_v21 = vld [vmem:[%s6553_s29 + $0x9c] sm:$0xf]  ;;  %v696_v57 = vld [vmem:[%s6553_s29 + $0xa4] sm:$0x1] }
  0xb2   : > { %v5605_v27 = vcombine.low %v1882_v13, %v1892_v17  ;;  %v2762_v42 = vor.u32 %v2761_v34, %v2757_v28  ;;  %v2772_v43 = vrot.slane %v2770_v35, 4  ;;  %v2789_v44 = vshll.u32 %v5741_v30, 16 }
  0xb3   : > { %v1143_v2 = vpop.permute.xlu0 %1142  ;;  %v2767_v20 = vrot.slane %v2765_v38, 5  ;;  %v2775_v46 = vrot.slane %v2773_v37, 5  ;;  %v2785_v48 = vrot.slane %v2783_v40, 4  ;;  %v2753_v51 = vrot.slane %v2752_v41, 4 }
  0xb4   : > { %1189 = vst.msk [vmem:[#allocation2 + $0x10] sm:$0xff] %vm1186_vm5, %v1143_v2  ;;  %v2791_v54 = vrot.slane %v2789_v44, 5  ;;  %v995_v63 = vshrl.u32 %v691_v59, 16  ;;  %v998_v0 = vshll.u32 %v691_v59, 16  ;;  %v1004_v4 = vshll.u32 %v692_v61, 16 }
  0xb5   : > { %1160 = vrot.lane.b32.xlu1 %v5557_v52, %s6428_s16  ;;  %1335 = vrot.lane.b32.xlu0 %v6294_v47, %s6426_s26  ;;  %v7110_v47 = vrot.slane %v2779_v39, 5  ;;  %v2763_v52 = vrot.slane %v2762_v42, 4  ;;  %v2776_v56 = vor.u32 %v2775_v46, %v2772_v43  ;;  %v2758_v60 = vsel %vm6573_vm2, %v2753_v51, %v2757_v28  ;;  %v1596_v59 = vld [vmem:[%s6545_s25 + $0x9c] sm:$0xf] }
  0xb6   : > { %v997_v6 = vrot.slane %v995_v63, 4  ;;  %v1000_v7 = vrot.slane %v998_v0, 5  ;;  %v1019_v23 = vshrl.u32 %v694_v21, 16  ;;  %v1022_v24 = vshll.u32 %v694_v21, 16  ;;  %v6336_v21 = vld [vmem:[%s6553_s29 + $0x9c] sm:$0xff]  }
  0xb7   : > { %v1145_v8 = vpop.permute.xlu1 %1144  ;;  %v3003_v9 = vld [vmem:[#allocation2 + $0x8] sm:$0xff]  ;;  %v1320_v15 = vpop.permute.xlu0 %1319  ;;  %v3002_v16 = vld [vmem:[#allocation2] sm:$0xff]  ;;  %v2786_v58 = vor.u32 %v2785_v48, %v7110_v47  ;;  %v2768_v53 = vsel %vm6573_vm2, %v2763_v52, %v2767_v20  ;;  %v2777_v2 = vrot.slane %v2776_v56, 4  ;;  %v1038_v29 = vshll.u32 %v696_v57, 16  ;;  %v1593_v48 = vld [vmem:[%s6545_s25 + $0x90] sm:$0xf] }
  0xb8   : > { %1190 = vst.msk [vmem:[#allocation2 + $0x18] sm:$0xff] %vm1186_vm5, %v1145_v8  ;;  %6084 = vmatprep.mubr.msk.bf16.mxu0 %vm3040_vm14, %v3002_v16  ;;  %v1008_v8 = vshrl.u32 %v692_v61, 16  ;;  %v5764_v13 = vcombine.low %v2758_v60, %v2768_v53  ;;  %v1001_v17 = vor.u32 %v1000_v7, %v997_v6  ;;  %v1024_v33 = vrot.slane %v1022_v24, 5  ;;  %v1597_v60 = vld [vmem:[%s6545_s25 + $0xa0] sm:$0xf] }
  0xb9   : > { %1366 = vst.msk [vmem:[#allocation2 + $0x10] sm:$0xff] %vm1363_vm6, %v1320_v15  ;;  %1337 = vrot.lane.b32.xlu1 %v6295_v62, %s6426_s26  ;;  %6085 = vmatmul.mubr.msk.bf16.vlgmr.msra.gmra.mrb[0].mxu0 %vm3040_vm14, %v3003_v9  ;;  %v693_v62 = vld [vmem:[%s6553_s29 + $0x98] sm:$0x1]  ;;  %v2782_v14 = vsel %vm6573_vm2, %v2777_v2, %v7110_v47  ;;  %v1006_v15 = vrot.slane %v1004_v4, 5  ;;  %v1040_v37 = vrot.slane %v1038_v29, 5  ;;  %v6314_v47 = vld [vmem:[%s6545_s25 + $0x90] sm:$0xff]  }
  0xba   : > { %1512 = vrot.lane.b32.xlu0 %v6296_v3, %s6426_s26  ;;  %v2787_v3 = vrot.slane %v2786_v58, 4  ;;  %v1014_v9 = vshll.u32 %v693_v62, 16  ;;  %v1010_v18 = vrot.slane %v1008_v8, 4  ;;  %v1002_v10 = vrot.slane %v1001_v17, 4  ;;  %v6315_v62 = vld [vmem:[%s6545_s25 + $0x9c] sm:$0xff]   ;;  %507 = vst.msk [vmem:[#allocation2 + $0x68] sm:$0xff] %vm493_vm3, %v6336_v21 }
  0xbb   : > { %v1322_v32 = vpop.permute.xlu1 %1321  ;;  %v1497_v36 = vpop.permute.xlu0 %1496  ;;  %v1894_v51 = vshrl.u32 %v1593_v48, 16  ;;  %v1897_v52 = vshll.u32 %v1593_v48, 16  ;;  %v1598_v2 = vld [vmem:[%s6545_s25 + $0xa4] sm:$0x1]  ;;  %v1918_v8 = vshrl.u32 %v1596_v59, 16 }
  0xbc   : > { %1367 = vst.msk [vmem:[#allocation2 + $0x18] sm:$0xff] %vm1363_vm6, %v1322_v32  ;;  %v2792_v16 = vsel %vm6573_vm2, %v2787_v3, %v2791_v54  ;;  %v1016_v19 = vrot.slane %v1014_v9, 5  ;;  %v1011_v38 = vor.u32 %v1010_v18, %v1006_v15  ;;  %v1021_v32 = vrot.slane %v1019_v23, 4  ;;  %v6334_v3 = vld [vmem:[%s6553_s29 + $0x90] sm:$0xff]  }
  0xbd   : > { %1543 = vst.msk [vmem:[#allocation2 + $0x10] sm:$0xff] %vm1540_vm7, %v1497_v36  ;;  %1514 = vrot.lane.b32.xlu1 %v6297_v22, %s6426_s26  ;;  %v695_v22 = vld [vmem:[%s6553_s29 + $0xa0] sm:$0xf]  ;;  %v5765_v35 = vcombine.low %v2782_v14, %v2792_v16  ;;  %v1007_v36 = vsel %vm6573_vm2, %v1002_v10, %v1006_v15  ;;  %v1896_v63 = vrot.slane %v1894_v51, 4  ;;  %v1899_v0 = vrot.slane %v1897_v52, 5  ;;  %v6335_v15 = vld [vmem:[%s6553_s29 + $0x90] sm:$0xff]  }
  0xbe   : > { %2057 = vrot.lane.b32.xlu0 %v5604_v26, %s6429_s17  ;;  %v1028_v25 = vshll.u32 %v695_v22, 16  ;;  %v1032_v26 = vshrl.u32 %v695_v22, 16  ;;  %v1012_v20 = vrot.slane %v1011_v38, 4  ;;  %v1025_v39 = vor.u32 %v1024_v33, %v1021_v32  ;;  %506 = vst.msk [vmem:[#allocation2 + $0x60] sm:$0xff] %vm493_vm3, %v6334_v3  ;;  %v6317_v10 = vld [vmem:[%s6545_s25 + $0x9c] sm:$0xff]  }
  0xbf   : > { %v1499_v49 = vpop.permute.xlu1 %1498  ;;  %v2042_v55 = vpop.permute.xlu0 %2041  ;;  %v1921_v9 = vshll.u32 %v1596_v59, 16  ;;  %v1931_v14 = vshrl.u32 %v1597_v60, 16  ;;  %v1920_v17 = vrot.slane %v1918_v8, 4  ;;  %651 = vst.msk [vmem:[#allocation2 + $0x60] sm:$0xff] %vm638_vm4, %v6335_v15 }
  0xc0   : > { %1544 = vst.msk [vmem:[#allocation2 + $0x18] sm:$0xff] %vm1540_vm7, %v1499_v49  ;;  %v1030_v28 = vrot.slane %v1028_v25, 5  ;;  %v1034_v34 = vrot.slane %v1032_v26, 4  ;;  %v1017_v42 = vsel %vm6573_vm2, %v1012_v20, %v1016_v19  ;;  %v1594_v49 = vld [vmem:[%s6545_s25 + $0x94] sm:$0xf]  ;;  %v1937_v19 = vshll.u32 %v1598_v2, 16 }
  0xc1   : > { %2088 = vst.msk [vmem:[#allocation2 + $0x10] sm:$0xff] %vm2085_vm8, %v2042_v55  ;;  %2059 = vrot.lane.b32.xlu1 %v5605_v27, %s6429_s17  ;;  %v5558_v44 = vcombine.low %v1007_v36, %v1017_v42  ;;  %v1903_v56 = vshll.u32 %v1594_v49, 16  ;;  %v1907_v58 = vshrl.u32 %v1594_v49, 16  ;;  %v1923_v18 = vrot.slane %v1921_v9, 5  ;;  %v6337_v25 = vld [vmem:[%s6553_s29 + $0x9c] sm:$0xff]  }
  0xc2   : > { %2235 = vrot.lane.b32.xlu0 %v6302_v45, %s6427_s14  ;;  %v1035_v40 = vor.u32 %v1034_v34, %v1030_v28  ;;  %v1026_v45 = vrot.slane %v1025_v39, 4  ;;  %v1933_v24 = vrot.slane %v1931_v14, 4  ;;  %652 = vst.msk [vmem:[#allocation2 + $0x68] sm:$0xff] %vm638_vm4, %v6337_v25  ;;  %v5743_v36 = vld [vmem:[%s6553_s29 + $0xa0] sm:$0xf] }
  0xc3   : > { %v2044_v5 = vpop.permute.xlu1 %2043  ;;  %v2220_v11 = vpop.permute.xlu0 %2219  ;;  %v1905_v6 = vrot.slane %v1903_v56, 5  ;;  %v1909_v7 = vrot.slane %v1907_v58, 4  ;;  %v1924_v29 = vor.u32 %v1923_v18, %v1920_v17  ;;  %v5745_v49 = vld [vmem:[%s6553_s29 + $0xa8] sm:$0xf]  ;;  %v6318_v58 = vld [vmem:[%s6553_s29 + $0x9c] sm:$0xff]  }
  0xc4   : > { %2089 = vst.msk [vmem:[#allocation2 + $0x18] sm:$0xff] %vm2085_vm8, %v2044_v5  ;;  %v1036_v46 = vrot.slane %v1035_v40, 4  ;;  %v1031_v54 = vsel %vm6573_vm2, %v1026_v45, %v1030_v28  ;;  %v6316_v5 = vld [vmem:[%s6545_s25 + $0x90] sm:$0xff]   ;;  %v2821_v2 = vshll.u32 %v5745_v49, 16  ;;  %v698_v9 = vld [vmem:[%s6553_s29 + $0xac] sm:$0xf] }
  0xc5   : > { %2266 = vst.msk [vmem:[#allocation2 + $0x10] sm:$0xff] %vm2263_vm9, %v2220_v11  ;;  %2237 = vrot.lane.b32.xlu1 %v6303_v50, %s6427_s14  ;;  %v1595_v50 = vld [vmem:[%s6545_s25 + $0x98] sm:$0x1]  ;;  %v1900_v11 = vor.u32 %v1899_v0, %v1896_v63  ;;  %v1910_v16 = vor.u32 %v1909_v7, %v1905_v6  ;;  %v1925_v34 = vrot.slane %v1924_v29, 4  ;;  %v6319_v63 = vld [vmem:[%s6553_s29 + $0xa8] sm:$0xff]  }
  0xc6   : > { %2412 = vrot.lane.b32.xlu0 %v6304_v1, %s6427_s14  ;;  %v1041_v55 = vsel %vm6573_vm2, %v1036_v46, %v1040_v37  ;;  %v1913_v1 = vshll.u32 %v1595_v50, 16  ;;  %v2803_v46 = vshll.u32 %v5743_v36, 16  ;;  %v2823_v14 = vrot.slane %v2821_v2, 5  ;;  %v1601_v2 = vld [vmem:[%s6545_s25 + $0xb0] sm:$0x1] }
  0xc7   : > { %v2222_v27 = vpop.permute.xlu1 %2221  ;;  %v2397_v30 = vpop.permute.xlu0 %2396  ;;  %v5559_v61 = vcombine.low %v1031_v54, %v1041_v55  ;;  %v1901_v57 = vrot.slane %v1900_v11, 4  ;;  %v1911_v38 = vrot.slane %v1910_v16, 4  ;;  %v5746_v54 = vld [vmem:[%s6553_s29 + $0xac] sm:$0xf]  ;;  %v5747_v55 = vld [vmem:[%s6553_s29 + $0xb0] sm:$0x1] }
  0xc8   : > { %2267 = vst.msk [vmem:[#allocation2 + $0x18] sm:$0xff] %vm2263_vm9, %v2222_v27  ;;  %v2805_v59 = vrot.slane %v2803_v46, 5  ;;  %v2827_v3 = vshll.u32 %v5746_v54, 16  ;;  %v2831_v7 = vshrl.u32 %v5746_v54, 16  ;;  %v2837_v8 = vshll.u32 %v5747_v55, 16 }
  0xc9   : > { %2443 = vst.msk [vmem:[#allocation2 + $0x10] sm:$0xff] %vm2440_vm10, %v2397_v30  ;;  %2414 = vrot.lane.b32.xlu1 %v6305_v12, %s6427_s14  ;;  %v1915_v12 = vrot.slane %v1913_v1, 5  ;;  %v1939_v30 = vrot.slane %v1937_v19, 5  ;;  %v1906_v32 = vsel %vm6573_vm2, %v1901_v57, %v1905_v6  ;;  %v2818_v1 = vshrl.u32 %v5745_v49, 16  ;;  %v699_v16 = vld [vmem:[%s6553_s29 + $0xb0] sm:$0x1] }
  0xca   : > { %2957 = vrot.lane.b32.xlu0 %v5764_v13, %s6430_s22  ;;  %v1927_v13 = vshll.u32 %v1597_v60, 16  ;;  %v2829_v15 = vrot.slane %v2827_v3, 5  ;;  %v2833_v18 = vrot.slane %v2831_v7, 4  ;;  %v2839_v19 = vrot.slane %v2837_v8, 5 }
  0xcb   : > { %v2399_v41 = vpop.permute.xlu1 %2398  ;;  %v2942_v43 = vpop.permute.xlu0 %2941  ;;  %v1916_v28 = vsel %vm6573_vm2, %v1911_v38, %v1915_v12 }
  0xcc   : > { %2444 = vst.msk [vmem:[#allocation2 + $0x18] sm:$0xff] %vm2440_vm10, %v2399_v41  ;;  %v1929_v23 = vrot.slane %v1927_v13, 5  ;;  %v5606_v39 = vcombine.low %v1906_v32, %v1916_v28  ;;  %v5744_v41 = vld [vmem:[%s6553_s29 + $0xa4] sm:$0x1]  ;;  %v2820_v13 = vrot.slane %v2818_v1, 4  ;;  %v2834_v29 = vor.u32 %v2833_v18, %v2829_v15 }
  0xcd   : > { %2988 = vst.msk [vmem:[#allocation2 + $0x10] sm:$0xff] %vm2985_vm13, %v2942_v43  ;;  %2959 = vrot.lane.b32.xlu1 %v5765_v35, %s6430_s22  ;;  %v5742_v35 = vld [vmem:[%s6553_s29 + $0x9c] sm:$0xf]  ;;  %v2813_v48 = vshll.u32 %v5744_v41, 16  ;;  %v1062_v32 = vshll.u32 %v699_v16, 16 }
  0xce   : > { %1162 = vrot.lane.b32.xlu0 %v5558_v44, %s6428_s16  ;;  %v1934_v33 = vor.u32 %v1933_v24, %v1929_v23  ;;  %v2794_v42 = vshrl.u32 %v5742_v35, 16  ;;  %v2797_v43 = vshll.u32 %v5742_v35, 16  ;;  %v1930_v45 = vsel %vm6573_vm2, %v1925_v34, %v1929_v23  ;;  %v1604_v18 = vld [vmem:[%s6545_s25 + $0xbc] sm:$0x1] }
  0xcf   : > { %v2944_v53 = vpop.permute.xlu1 %2943  ;;  %v1147_v4 = vpop.permute.xlu0 %1146  ;;  %v2824_v24 = vor.u32 %v2823_v14, %v2820_v13 }
  0xd0   : > { %2989 = vst.msk [vmem:[#allocation2 + $0x18] sm:$0xff] %vm2985_vm13, %v2944_v53  ;;  %v1935_v40 = vrot.slane %v1934_v33, 4  ;;  %v2796_v51 = vrot.slane %v2794_v42, 4  ;;  %v2799_v52 = vrot.slane %v2797_v43, 5  ;;  %v2815_v53 = vrot.slane %v2813_v48, 5  ;;  %v6321_v33 = vld [vmem:[%s6553_s29 + $0xa8] sm:$0xff]  }
  0xd1   : > { %1191 = vst.msk [vmem:[#allocation2 + $0x20] sm:$0xff] %vm1186_vm5, %v1147_v4  ;;  %1164 = vrot.lane.b32.xlu1 %v5559_v61, %s6428_s16  ;;  %v697_v61 = vld [vmem:[%s6553_s29 + $0xa8] sm:$0xf]  ;;  %v2825_v34 = vrot.slane %v2824_v24, 4 }
  0xd2   : > { %1339 = vrot.lane.b32.xlu0 %v6314_v47, %s6426_s26  ;;  %v2807_v47 = vshrl.u32 %v5743_v36, 16  ;;  %v1940_v50 = vsel %vm6573_vm2, %v1935_v40, %v1939_v30  ;;  %v2800_v0 = vor.u32 %v2799_v52, %v2796_v51  ;;  %v1043_v11 = vshrl.u32 %v697_v61, 16  ;;  %v1599_v52 = vld [vmem:[%s6545_s25 + $0xa8] sm:$0xf] }
  0xd3   : > { %v1149_v22 = vpop.permute.xlu1 %1148  ;;  %v1324_v26 = vpop.permute.xlu0 %1323  ;;  %v5607_v56 = vcombine.low %v1930_v45, %v1940_v50  ;;  %v1046_v25 = vshll.u32 %v697_v61, 16  ;;  %v1056_v30 = vshrl.u32 %v698_v9, 16  ;;  %v1064_v40 = vrot.slane %v1062_v32, 5 }
  0xd4   : > { %1192 = vst.msk [vmem:[#allocation2 + $0x28] sm:$0xff] %vm1186_vm5, %v1149_v22  ;;  %v3004_v27 = vld [vmem:[#allocation2 + $0x10] sm:$0xff]  ;;  %v2809_v60 = vrot.slane %v2807_v47, 4  ;;  %v2801_v12 = vrot.slane %v2800_v0, 4  ;;  %v1045_v21 = vrot.slane %v1043_v11, 4  ;;  %v2830_v43 = vsel %vm6573_vm2, %v2825_v34, %v2829_v15  ;;  %v6322_v15 = vld [vmem:[%s6545_s25 + $0xa8] sm:$0xff]  }
  0xd5   : > { %1368 = vst.msk [vmem:[#allocation2 + $0x20] sm:$0xff] %vm1363_vm6, %v1324_v26  ;;  %6088 = vmatprep.mubr.msk.bf16.mxu0 %vm3040_vm14, %v3004_v27  ;;  %1341 = vrot.lane.b32.xlu1 %v6315_v62, %s6426_s26  ;;  %v700_v22 = vld [vmem:[%s6553_s29 + $0xb4] sm:$0xf]  ;;  %v1052_v26 = vshll.u32 %v698_v9, 16  ;;  %v701_v27 = vld [vmem:[%s6553_s29 + $0xb8] sm:$0xf] }
  0xd6   : > { %1516 = vrot.lane.b32.xlu0 %v6316_v5, %s6426_s26  ;;  %v6320_v5 = vld [vmem:[%s6553_s29 + $0x9c] sm:$0xff]   ;;  %v2810_v6 = vor.u32 %v2809_v60, %v2805_v59  ;;  %v2806_v23 = vsel %vm6573_vm2, %v2801_v12, %v2805_v59  ;;  %v1048_v35 = vrot.slane %v1046_v25, 5  ;;  %v1067_v41 = vshrl.u32 %v700_v22, 16  ;;  %v1600_v59 = vld [vmem:[%s6545_s25 + $0xac] sm:$0xf] }
  0xd7   : > { %v1326_v20 = vpop.permute.xlu1 %1325  ;;  %v3005_v37 = vld [vmem:[#allocation2 + $0x18] sm:$0xff]  ;;  %v1501_v44 = vpop.permute.xlu0 %1500  ;;  %v1054_v36 = vrot.slane %v1052_v26, 5  ;;  %v1070_v45 = vshll.u32 %v700_v22, 16  ;;  %v1076_v46 = vshll.u32 %v701_v27, 16  ;;  %v1080_v51 = vshrl.u32 %v701_v27, 16  ;;  %v6324_v34 = vld [vmem:[%s6545_s25 + $0xa8] sm:$0xff]  }
  0xd8   : > { %1369 = vst.msk [vmem:[#allocation2 + $0x28] sm:$0xff] %vm1363_vm6, %v1326_v20  ;;  %6089 = vmatmul.mubr.msk.bf16.gmra.mrb[4].mxu0 %vm3040_vm14, %v3005_v37  ;;  %v2811_v17 = vrot.slane %v2810_v6, 4  ;;  %v702_v20 = vld [vmem:[%s6553_s29 + $0xbc] sm:$0x1]  ;;  %v2835_v37 = vrot.slane %v2834_v29, 4  ;;  %v1069_v50 = vrot.slane %v1067_v41, 4 }
  0xd9   : > { %1545 = vst.msk [vmem:[#allocation2 + $0x20] sm:$0xff] %vm1540_vm7, %v1501_v44  ;;  %1518 = vrot.lane.b32.xlu1 %v6317_v10, %s6426_s26  ;;  %v1049_v44 = vor.u32 %v1048_v35, %v1045_v21  ;;  %v1086_v61 = vshll.u32 %v702_v20, 16  ;;  %v1945_v3 = vshll.u32 %v1599_v52, 16  ;;  %v1603_v12 = vld [vmem:[%s6545_s25 + $0xb8] sm:$0xf]  ;;  %v1955_v21 = vshrl.u32 %v1600_v59, 16 }
  0xda   : > { %2061 = vrot.lane.b32.xlu0 %v5606_v39, %s6429_s17  ;;  %v2816_v38 = vsel %vm6573_vm2, %v2811_v17, %v2815_v53  ;;  %v1058_v39 = vrot.slane %v1056_v30, 4  ;;  %v2840_v48 = vsel %vm6573_vm2, %v2835_v37, %v2839_v19  ;;  %v1082_v53 = vrot.slane %v1080_v51, 4 }
  0xdb   : > { %v1503_v62 = vpop.permute.xlu1 %1502  ;;  %v2046_v4 = vpop.permute.xlu0 %2045  ;;  %v5766_v28 = vcombine.low %v2806_v23, %v2816_v38  ;;  %v5767_v54 = vcombine.low %v2830_v43, %v2840_v48  ;;  %v1050_v55 = vrot.slane %v1049_v44, 4  ;;  %v1088_v9 = vrot.slane %v1086_v61, 5  ;;  %v6325_v48 = vld [vmem:[%s6545_s25 + $0xb4] sm:$0xff]  }
  0xdc   : > { %1546 = vst.msk [vmem:[#allocation2 + $0x28] sm:$0xff] %vm1540_vm7, %v1503_v62  ;;  %v1059_v49 = vor.u32 %v1058_v39, %v1054_v36  ;;  %v1942_v62 = vshrl.u32 %v1599_v52, 16  ;;  %v1947_v16 = vrot.slane %v1945_v3, 5  ;;  %v1961_v22 = vshll.u32 %v1601_v2, 16  ;;  %v5751_v3 = vld [vmem:[%s6553_s29 + $0xc0] sm:$0xf] }
  0xdd   : > { %2090 = vst.msk [vmem:[#allocation2 + $0x20] sm:$0xff] %vm2085_vm8, %v2046_v4  ;;  %2063 = vrot.lane.b32.xlu1 %v5607_v56, %s6429_s17  ;;  %v1072_v56 = vrot.slane %v1070_v45, 5  ;;  %v1055_v0 = vsel %vm6573_vm2, %v1050_v55, %v1054_v36  ;;  %v1951_v4 = vshll.u32 %v1600_v59, 16  ;;  %v1975_v27 = vshll.u32 %v1603_v12, 16 }
  0xde   : > { %2239 = vrot.lane.b32.xlu0 %v6318_v58, %s6427_s14  ;;  %v1078_v58 = vrot.slane %v1076_v46, 5  ;;  %v1060_v60 = vrot.slane %v1059_v49, 4  ;;  %v1944_v11 = vrot.slane %v1942_v62, 4  ;;  %v1957_v29 = vrot.slane %v1955_v21, 4 }
  0xdf   : > { %v2048_v57 = vpop.permute.xlu1 %2047  ;;  %v2224_v10 = vpop.permute.xlu0 %2223  ;;  %v1073_v1 = vor.u32 %v1072_v56, %v1069_v50  ;;  %v1953_v17 = vrot.slane %v1951_v4, 5  ;;  %v1963_v30 = vrot.slane %v1961_v22, 5  ;;  %v1977_v20 = vrot.slane %v1975_v27, 5 }
  0xe0   : > { %2091 = vst.msk [vmem:[#allocation2 + $0x28] sm:$0xff] %vm2085_vm8, %v2048_v57  ;;  %v1065_v7 = vsel %vm6573_vm2, %v1060_v60, %v1064_v40  ;;  %v1083_v8 = vor.u32 %v1082_v53, %v1078_v58  ;;  %v1948_v25 = vor.u32 %v1947_v16, %v1944_v11  ;;  %v1979_v39 = vshrl.u32 %v1603_v12, 16  ;;  %v5749_v60 = vld [vmem:[%s6553_s29 + $0xb8] sm:$0xf]  ;;  %v5750_v53 = vld [vmem:[%s6553_s29 + $0xbc] sm:$0x1] }
  0xe1   : > { %2268 = vst.msk [vmem:[#allocation2 + $0x20] sm:$0xff] %vm2263_vm9, %v2224_v10  ;;  %2241 = vrot.lane.b32.xlu1 %v6319_v63, %s6427_s14  ;;  %v5560_v13 = vcombine.low %v1055_v0, %v1065_v7  ;;  %v1074_v14 = vrot.slane %v1073_v1, 4  ;;  %v1958_v37 = vor.u32 %v1957_v29, %v1953_v17  ;;  %v1985_v40 = vshll.u32 %v1604_v18, 16  ;;  %v5753_v7 = vld [vmem:[%s6553_s29 + $0xc8] sm:$0x1] }
  0xe2   : > { %2416 = vrot.lane.b32.xlu0 %v6320_v5, %s6427_s14  ;;  %v1602_v5 = vld [vmem:[%s6545_s25 + $0xb4] sm:$0xf]  ;;  %v1084_v19 = vrot.slane %v1083_v8, 4  ;;  %v1949_v35 = vrot.slane %v1948_v25, 4  ;;  %v2851_v1 = vshll.u32 %v5749_v60, 16  ;;  %v2855_v2 = vshrl.u32 %v5749_v60, 16 }
  0xe3   : > { %v2226_v42 = vpop.permute.xlu1 %2225  ;;  %v2401_v47 = vpop.permute.xlu0 %2400  ;;  %v1966_v57 = vshrl.u32 %v1602_v5, 16  ;;  %v1079_v24 = vsel %vm6573_vm2, %v1074_v14, %v1078_v58  ;;  %v1969_v26 = vshll.u32 %v1602_v5, 16  ;;  %v1959_v46 = vrot.slane %v1958_v37, 4  ;;  %v6332_v25 = vld [vmem:[%s6553_s29 + $0xb4] sm:$0xff]  }
  0xe4   : > { %2269 = vst.msk [vmem:[#allocation2 + $0x28] sm:$0xff] %vm2263_vm9, %v2226_v42  ;;  %v1089_v38 = vsel %vm6573_vm2, %v1084_v19, %v1088_v9  ;;  %v1954_v45 = vsel %vm6573_vm2, %v1949_v35, %v1953_v17  ;;  %v1987_v50 = vrot.slane %v1985_v40, 5  ;;  %v2861_v5 = vshll.u32 %v5750_v53, 16  ;;  %v6333_v40 = vld [vmem:[%s6553_s29 + $0xc0] sm:$0xff]  }
  0xe5   : > { %2445 = vst.msk [vmem:[#allocation2 + $0x20] sm:$0xff] %vm2440_vm10, %v2401_v47  ;;  %2418 = vrot.lane.b32.xlu1 %v6321_v33, %s6427_s14  ;;  %v1968_v32 = vrot.slane %v1966_v57, 4  ;;  %v5561_v33 = vcombine.low %v1079_v24, %v1089_v38  ;;  %v1971_v36 = vrot.slane %v1969_v26, 5  ;;  %v1981_v47 = vrot.slane %v1979_v39, 4  ;;  %v6327_v24 = vld [vmem:[%s6553_s29 + $0xc0] sm:$0xff]  }
  0xe6   : > { %2961 = vrot.lane.b32.xlu0 %v5766_v28, %s6430_s22  ;;  %v6323_v28 = vld [vmem:[%s6545_s25 + $0xb4] sm:$0xff]   ;;  %v1964_v51 = vsel %vm6573_vm2, %v1959_v46, %v1963_v30  ;;  %v2853_v11 = vrot.slane %v2851_v1, 5  ;;  %v2857_v12 = vrot.slane %v2855_v2, 4  ;;  %v2863_v16 = vrot.slane %v2861_v5, 5  ;;  %v6338_v1 = vld [vmem:[%s6553_s29 + $0xa8] sm:$0xff]   ;;  %s6433_s25 = smov 32  }
  0xe7   : > { %v2403_v63 = vpop.permute.xlu1 %2402  ;;  %v2946_v6 = vpop.permute.xlu0 %2945  ;;  %v1972_v42 = vor.u32 %v1971_v36, %v1968_v32  ;;  %v1982_v52 = vor.u32 %v1981_v47, %v1977_v20  ;;  %v5608_v58 = vcombine.low %v1954_v45, %v1964_v51  ;;  %v2866_v17 = vshrl.u32 %v5751_v3, 16  ;;  %v6339_v2 = vld [vmem:[%s6553_s29 + $0xa8] sm:$0xff]   ;;  %v6341_v5 = vld [vmem:[%s6553_s29 + $0xb4] sm:$0xff]   ;;  %508 = vst.msk [vmem:[#allocation2 + $0x70] sm:$0xff] %vm493_vm3, %v6338_v1 }
  0xe8   : > { %2446 = vst.msk [vmem:[#allocation2 + $0x28] sm:$0xff] %vm2440_vm10, %v2403_v63  ;;  %v2869_v18 = vshll.u32 %v5751_v3, 16  ;;  %v2858_v22 = vor.u32 %v2857_v12, %v2853_v11  ;;  %v6340_v3 = vld [vmem:[%s6553_s29 + $0xb4] sm:$0xff]  }
  0xe9   : > { %2990 = vst.msk [vmem:[#allocation2 + $0x20] sm:$0xff] %vm2985_vm13, %v2946_v6  ;;  %2963 = vrot.lane.b32.xlu1 %v5767_v54, %s6430_s22  ;;  %v1973_v49 = vrot.slane %v1972_v42, 4  ;;  %v5748_v54 = vld [vmem:[%s6553_s29 + $0xb4] sm:$0xf]  ;;  %v1983_v63 = vrot.slane %v1982_v52, 4  ;;  %v2868_v26 = vrot.slane %v2866_v17, 4 }
  0xea   : > { %1166 = vrot.lane.b32.xlu0 %v5560_v13, %s6428_s16  ;;  %v2842_v61 = vshrl.u32 %v5748_v54, 16  ;;  %v2845_v0 = vshll.u32 %v5748_v54, 16  ;;  %v5752_v6 = vld [vmem:[%s6553_s29 + $0xc4] sm:$0xf]  ;;  %v2871_v27 = vrot.slane %v2869_v18, 5  ;;  %v2859_v29 = vrot.slane %v2858_v22, 4 }
  0xeb   : > { %v2948_v23 = vpop.permute.xlu1 %2947  ;;  %v1151_v10 = vpop.permute.xlu0 %1150  ;;  %v1978_v59 = vsel %vm6573_vm2, %v1973_v49, %v1977_v20  ;;  %v1988_v8 = vsel %vm6573_vm2, %v1983_v63, %v1987_v50  ;;  %v2875_v57 = vshll.u32 %v5752_v6, 16  ;;  %509 = vst.msk [vmem:[#allocation2 + $0x78] sm:$0xff] %vm493_vm3, %v6340_v3  ;;  %vm3417_vm3 = vcmask 257024  }
  0xec   : > { %2991 = vst.msk [vmem:[#allocation2 + $0x28] sm:$0xff] %vm2985_vm13, %v2948_v23  ;;  %v2844_v4 = vrot.slane %v2842_v61, 4  ;;  %v2847_v9 = vrot.slane %v2845_v0, 5  ;;  %v5609_v14 = vcombine.low %v1978_v59, %v1988_v8  ;;  %v2879_v23 = vshrl.u32 %v5752_v6, 16 }
  0xed   : > { %1193 = vst.msk [vmem:[#allocation2 + $0x30] sm:$0xff] %vm1186_vm5, %v1151_v10  ;;  %1168 = vrot.lane.b32.xlu1 %v5561_v33, %s6428_s16  ;;  %v2885_v10 = vshll.u32 %v5753_v7, 16  ;;  %v2877_v30 = vrot.slane %v2875_v57, 5  ;;  %v2864_v20 = vsel %vm6573_vm2, %v2859_v29, %v2863_v16  ;;  %s6436_s16 = smov [#allocation5]  }
  0xee   : > { %1343 = vrot.lane.b32.xlu0 %v6322_v15, %s6426_s26  ;;  %v6326_v15 = vld [vmem:[%s6553_s29 + $0xb4] sm:$0xff]   ;;  %v2848_v21 = vor.u32 %v2847_v9, %v2844_v4  ;;  %v2881_v32 = vrot.slane %v2879_v23, 4  ;;  %653 = vst.msk [vmem:[#allocation2 + $0x70] sm:$0xff] %vm638_vm4, %v6339_v2  ;;  %654 = vst.msk [vmem:[#allocation2 + $0x78] sm:$0xff] %vm638_vm4, %v6341_v5  ;;  %s7460_s29 = scalar_lea.vmem %s8382_s8, %s5880_s24  ;;  %vm3973_vm4 = vcmask 1048320  }
  0xef   : > { %v1153_v41 = vpop.permute.xlu1 %1152  ;;  %v1328_v43 = vpop.permute.xlu0 %1327 }
  0xf0   : > { %1194 = vst.msk [vmem:[#allocation2 + $0x38] sm:$0xff] %vm1186_vm5, %v1153_v41  ;;  %v3006_v44 = vld [vmem:[#allocation2 + $0x20] sm:$0xff]  ;;  %v2849_v38 = vrot.slane %v2848_v21, 4  ;;  %v2882_v37 = vor.u32 %v2881_v32, %v2877_v30 }
  0xf1   : > { %1370 = vst.msk [vmem:[#allocation2 + $0x30] sm:$0xff] %vm1363_vm6, %v1328_v43  ;;  %6092 = vmatprep.mubr.msk.bf16.mxu0 %vm3040_vm14, %v3006_v44  ;;  %1345 = vrot.lane.b32.xlu1 %v6323_v28, %s6426_s26  ;;  %v2872_v28 = vor.u32 %v2871_v27, %v2868_v26 }
  0xf2   : > { %1520 = vrot.lane.b32.xlu0 %v6324_v34, %s6426_s26  ;;  %v2887_v34 = vrot.slane %v2885_v10, 5  ;;  %v2854_v36 = vsel %vm6573_vm2, %v2849_v38, %v2853_v11  ;;  %v2883_v41 = vrot.slane %v2882_v37, 4  ;;  %v6342_v38 = vld [vmem:[%s8378_s4 + $0x80] sm:$0xff]  }
  0xf3   : > { %v1330_v55 = vpop.permute.xlu1 %1329  ;;  %v3007_v56 = vld [vmem:[#allocation2 + $0x28] sm:$0xff]  ;;  %v1505_v62 = vpop.permute.xlu0 %1504  ;;  %v2873_v39 = vrot.slane %v2872_v28, 4  ;;  %v5768_v43 = vcombine.low %v2854_v36, %v2864_v20  ;;  %6116 = vmatprep.subr.bf16.mxu0 %v6342_v38 }
  0xf4   : > { %1371 = vst.msk [vmem:[#allocation2 + $0x38] sm:$0xff] %vm1363_vm6, %v1330_v55  ;;  %6093 = vmatmul.mubr.msk.bf16.gmra.mrb[8].mxu0 %vm3040_vm14, %v3007_v56  ;;  %v2888_v46 = vsel %vm6573_vm2, %v2883_v41, %v2887_v34  ;;  %v6432_v55 = vmov 0.0  }
  0xf5   : > { %1547 = vst.msk [vmem:[#allocation2 + $0x30] sm:$0xff] %vm1540_vm7, %v1505_v62  ;;  %1522 = vrot.lane.b32.xlu1 %v6325_v48, %s6426_s26  ;;  %v2878_v45 = vsel %vm6573_vm2, %v2873_v39, %v2877_v30  ;;  %s6434_s26 = smov 64   ;;  %v6343_v30 = vld [vmem:[%s8378_s4 + $0x88] sm:$0xff]   ;;  %6117 = vmatpush3.bf16.msra.mxu0 %v6342_v38  ;;  %vm3844_vm2 = vcmask 785920  }
  0xf6   : > { %2065 = vrot.lane.b32.xlu0 %v5608_v58, %s6429_s17  ;;  %v5769_v48 = vcombine.low %v2878_v45, %v2888_v46  ;;  %3458 = vst.msk [vmem:[#allocation3 + $0x30] sm:$0xff] %vm3450_vm15, %v6432_v55  ;;  %3459 = vst.msk [vmem:[#allocation3 + $0x38] sm:$0xff] %vm3450_vm15, %v6432_v55  ;;  %6118 = vmatprep.subr.bf16.mxu0 %v6343_v30 }
  0xf7   : > { %v1507_v13 = vpop.permute.xlu1 %1506  ;;  %v2050_v19 = vpop.permute.xlu0 %2049  ;;  %3451 = vst.msk [vmem:[#allocation3] sm:$0xff] %vm3450_vm15, %v6432_v55  ;;  %3452 = vst.msk [vmem:[#allocation3 + $0x8] sm:$0xff] %vm3450_vm15, %v6432_v55 }
  0xf8   : > { %1548 = vst.msk [vmem:[#allocation2 + $0x38] sm:$0xff] %vm1540_vm7, %v1507_v13 }
  0xf9   : > { %2092 = vst.msk [vmem:[#allocation2 + $0x30] sm:$0xff] %vm2085_vm8, %v2050_v19  ;;  %2067 = vrot.lane.b32.xlu1 %v5609_v14, %s6429_s17  ;;  %6119 = vmatpush3.bf16.msra.mxu0 %v6343_v30  ;;  %s346_s17 = sand.u32 1, %s6416_s10  }
  0xfa   : > { %2243 = vrot.lane.b32.xlu0 %v6326_v15, %s6427_s14  ;;  %3455 = vst.msk [vmem:[#allocation3 + $0x18] sm:$0xff] %vm3450_vm15, %v6432_v55  ;;  %3456 = vst.msk [vmem:[#allocation3 + $0x20] sm:$0xff] %vm3450_vm15, %v6432_v55  ;;  %s8333_s13 = scalar_lea.sflag [#allocation6], %s346_s17 }
  0xfb   : > { %v2052_v33 = vpop.permute.xlu1 %2051  ;;  %v2228_v35 = vpop.permute.xlu0 %2227  ;;  %3461 = vst.msk [vmem:[#allocation3 + $0x48] sm:$0xff] %vm3450_vm15, %v6432_v55  ;;  %3462 = vst.msk [vmem:[#allocation3 + $0x50] sm:$0xff] %vm3450_vm15, %v6432_v55 }
  0xfc   : > { %2093 = vst.msk [vmem:[#allocation2 + $0x38] sm:$0xff] %vm2085_vm8, %v2052_v33 }
  0xfd   : > { %2270 = vst.msk [vmem:[#allocation2 + $0x30] sm:$0xff] %vm2263_vm9, %v2228_v35  ;;  %2245 = vrot.lane.b32.xlu1 %v6327_v24, %s6427_s14 }
  0xfe   : > { %2420 = vrot.lane.b32.xlu0 %v6332_v25, %s6427_s14  ;;  %3464 = vst.msk [vmem:[#allocation3 + $0x60] sm:$0xff] %vm3450_vm15, %v6432_v55  ;;  %3465 = vst.msk [vmem:[#allocation3 + $0x68] sm:$0xff] %vm3450_vm15, %v6432_v55  ;;  %v3603_v61 = vld [vmem:[#allocation3 + $0x1] sm:$0xff] }
  0xff   : > { %v2230_v42 = vpop.permute.xlu1 %2229  ;;  %v2405_v44 = vpop.permute.xlu0 %2404  ;;  %3467 = vst.msk [vmem:[#allocation3 + $0x78] sm:$0xff] %vm3450_vm15, %v6432_v55  ;;  %3468 = vst.msk [vmem:[#allocation3 + $0x80] sm:$0xff] %vm3450_vm15, %v6432_v55  ;;  %v3732_v6 = vld [vmem:[#allocation3 + $0x2] sm:$0xff] }
 0x100   : > { %2271 = vst.msk [vmem:[#allocation2 + $0x38] sm:$0xff] %vm2263_vm9, %v2230_v42  ;;  %v3539_v2 = vld [vmem:[#allocation3] sm:$0xff]  ;;  %v3540_v3 = vld [vmem:[#allocation3 + $0x8] sm:$0xff] }
 0x101   : > { %2447 = vst.msk [vmem:[#allocation2 + $0x30] sm:$0xff] %vm2440_vm10, %v2405_v44  ;;  %2422 = vrot.lane.b32.xlu1 %v6333_v40, %s6427_s14 }
 0x102   : > { %2965 = vrot.lane.b32.xlu0 %v5768_v43, %s6430_s22  ;;  %3470 = vst.msk [vmem:[#allocation3 + $0x90] sm:$0xff] %vm3450_vm15, %v6432_v55  ;;  %3471 = vst.msk [vmem:[#allocation3 + $0x98] sm:$0xff] %vm3450_vm15, %v6432_v55 }
 0x103   : > { %v2407_v47 = vpop.permute.xlu1 %2406  ;;  %v2950_v49 = vpop.permute.xlu0 %2949  ;;  %3473 = vst.msk [vmem:[#allocation3 + $0xa8] sm:$0xff] %vm3450_vm15, %v6432_v55  ;;  %3474 = vst.msk [vmem:[#allocation3 + $0xb0] sm:$0xff] %vm3450_vm15, %v6432_v55 }
 0x104   : > { %2448 = vst.msk [vmem:[#allocation2 + $0x38] sm:$0xff] %vm2440_vm10, %v2407_v47 }
 0x105   : > { %2992 = vst.msk [vmem:[#allocation2 + $0x30] sm:$0xff] %vm2985_vm13, %v2950_v49  ;;  %2967 = vrot.lane.b32.xlu1 %v5769_v48, %s6430_s22  ;;  %s5509_s22 = sshll.u32 %s346_s17, 8 }
 0x106   : > { %3476 = vst.msk [vmem:[#allocation3 + $0xc0] sm:$0xff] %vm3450_vm15, %v6432_v55  ;;  %3477 = vst.msk [vmem:[#allocation3 + $0xc8] sm:$0xff] %vm3450_vm15, %v6432_v55  ;;  %s8258_s27 = scalar_lea.vmem [#allocation5], %s5509_s22  ;;  %s6366_s22 = sshll.u32 %s6436_s16, 4  ;;  %s6367_s22 = int_to_ptr.vmem [resolvable:$false] %s6366_s22 }
 0x107   : > { %v2952_v50 = vpop.permute.xlu1 %2951  ;;  %v1155_v31 = vpop.permute.xlu0 %1154  ;;  %3479 = vst.msk [vmem:[#allocation3 + $0xd8] sm:$0xff] %vm3450_vm15, %v6432_v55  ;;  %3480 = vst.msk [vmem:[#allocation3 + $0xe0] sm:$0xff] %vm3450_vm15, %v6432_v55  ;;  %s6368_s23 = scalar_lea.vmem %s6367_s22, 8192 }
 0x108   : > { %2993 = vst.msk [vmem:[#allocation2 + $0x38] sm:$0xff] %vm2985_vm13, %v2952_v50 }
 0x109   : > { %1195 = vst.msk [vmem:[#allocation2 + $0x40] sm:$0xff] %vm1186_vm5, %v1155_v31 }
 0x10a   : > { %3482 = vst.msk [vmem:[#allocation3 + $0xf0] sm:$0xff] %vm3450_vm15, %v6432_v55  ;;  %3483 = vst.msk [vmem:[#allocation3 + $0xf8] sm:$0xff] %vm3450_vm15, %v6432_v55 }
 0x10b   : > { %v1157_v51 = vpop.permute.xlu1 %1156  ;;  %v1332_v52 = vpop.permute.xlu0 %1331  ;;  %3485 = vst.msk [vmem:[#allocation3 + $0x108] sm:$0xff] %vm3450_vm15, %v6432_v55  ;;  %3486 = vst.msk [vmem:[#allocation3 + $0x110] sm:$0xff] %vm3450_vm15, %v6432_v55 }
 0x10c   : > { %1196 = vst.msk [vmem:[#allocation2 + $0x48] sm:$0xff] %vm1186_vm5, %v1157_v51  ;;  %v3008_v54 = vld [vmem:[#allocation2 + $0x30] sm:$0xff] }
 0x10d   : > { %1372 = vst.msk [vmem:[#allocation2 + $0x40] sm:$0xff] %vm1363_vm6, %v1332_v52  ;;  %6096 = vmatprep.mubr.msk.bf16.mxu0 %vm3040_vm14, %v3008_v54 }
 0x10e   : > { %3488 = vst.msk [vmem:[#allocation3 + $0x120] sm:$0xff] %vm3450_vm15, %v6432_v55  ;;  %3489 = vst.msk [vmem:[#allocation3 + $0x128] sm:$0xff] %vm3450_vm15, %v6432_v55 }
 0x10f   : > { %3491 = vst.msk [vmem:[#allocation3 + $0x138] sm:$0xff] %vm3450_vm15, %v6432_v55  ;;  %3492 = vst.msk [vmem:[#allocation3 + $0x140] sm:$0xff] %vm3450_vm15, %v6432_v55  ;;  %v1334_v56 = vpop.permute.xlu1 %1333  ;;  %v3009_v58 = vld [vmem:[#allocation2 + $0x38] sm:$0xff]  ;;  %v1509_v59 = vpop.permute.xlu0 %1508 }
 0x110   : > { %3494 = vst.msk [vmem:[#allocation3 + $0x150] sm:$0xff] %vm3450_vm15, %v6432_v55  ;;  %3495 = vst.msk [vmem:[#allocation3 + $0x158] sm:$0xff] %vm3450_vm15, %v6432_v55  ;;  %6097 = vmatmul.mubr.msk.bf16.gmra.mrb[12].mxu0 %vm3040_vm14, %v3009_v58 }
 0x111   : > { %3497 = vst.msk [vmem:[#allocation3 + $0x168] sm:$0xff] %vm3450_vm15, %v6432_v55  ;;  %3498 = vst.msk [vmem:[#allocation3 + $0x170] sm:$0xff] %vm3450_vm15, %v6432_v55 }
 0x112   : > { %3500 = vst.msk [vmem:[#allocation3 + $0x180] sm:$0xff] %vm3450_vm15, %v6432_v55  ;;  %3501 = vst.msk [vmem:[#allocation3 + $0x188] sm:$0xff] %vm3450_vm15, %v6432_v55 }
 0x113   : > { %3503 = vst.msk [vmem:[#allocation3 + $0x198] sm:$0xff] %vm3450_vm15, %v6432_v55  ;;  %3504 = vst.msk [vmem:[#allocation3 + $0x1a0] sm:$0xff] %vm3450_vm15, %v6432_v55  ;;  %v1511_v60 = vpop.permute.xlu1 %1510  ;;  %v2054_v53 = vpop.permute.xlu0 %2053 }
 0x114   : > { %3460 = vst.msk [vmem:[#allocation3 + $0x40] sm:$0x3] %vm3453_vm0, %v6432_v55  ;;  %3454 = vst.msk [vmem:[#allocation3 + $0x10] sm:$0x3] %vm3453_vm0, %v6432_v55 }
 0x115   : > { %3457 = vst.msk [vmem:[#allocation3 + $0x28] sm:$0x3] %vm3453_vm0, %v6432_v55  ;;  %3463 = vst.msk [vmem:[#allocation3 + $0x58] sm:$0x3] %vm3453_vm0, %v6432_v55 }
 0x116   : > { %3466 = vst.msk [vmem:[#allocation3 + $0x70] sm:$0x3] %vm3453_vm0, %v6432_v55  ;;  %3469 = vst.msk [vmem:[#allocation3 + $0x88] sm:$0x3] %vm3453_vm0, %v6432_v55 }
 0x117   : > { %3472 = vst.msk [vmem:[#allocation3 + $0xa0] sm:$0x3] %vm3453_vm0, %v6432_v55  ;;  %3475 = vst.msk [vmem:[#allocation3 + $0xb8] sm:$0x3] %vm3453_vm0, %v6432_v55  ;;  %v2056_v0 = vpop.permute.xlu1 %2055  ;;  %v2232_v4 = vpop.permute.xlu0 %2231 }
 0x118   : > { %3478 = vst.msk [vmem:[#allocation3 + $0xd0] sm:$0x3] %vm3453_vm0, %v6432_v55  ;;  %3481 = vst.msk [vmem:[#allocation3 + $0xe8] sm:$0x3] %vm3453_vm0, %v6432_v55 }
 0x119   : > { %3484 = vst.msk [vmem:[#allocation3 + $0x100] sm:$0x3] %vm3453_vm0, %v6432_v55  ;;  %3487 = vst.msk [vmem:[#allocation3 + $0x118] sm:$0x3] %vm3453_vm0, %v6432_v55 }
 0x11a   : > { %3490 = vst.msk [vmem:[#allocation3 + $0x130] sm:$0x3] %vm3453_vm0, %v6432_v55  ;;  %3493 = vst.msk [vmem:[#allocation3 + $0x148] sm:$0x3] %vm3453_vm0, %v6432_v55 }
 0x11b   : > { %3496 = vst.msk [vmem:[#allocation3 + $0x160] sm:$0x3] %vm3453_vm0, %v6432_v55  ;;  %3499 = vst.msk [vmem:[#allocation3 + $0x178] sm:$0x3] %vm3453_vm0, %v6432_v55  ;;  %v3604_v62 = vld [vmem:[#allocation3 + $0x9] sm:$0xff]  ;;  %v2234_v9 = vpop.permute.xlu1 %2233  ;;  %v2409_v11 = vpop.permute.xlu0 %2408 }
 0x11c   : > { %3502 = vst.msk [vmem:[#allocation3 + $0x190] sm:$0x3] %vm3453_vm0, %v6432_v55  ;;  %3505 = vst.msk [vmem:[#allocation3 + $0x1a8] sm:$0x3] %vm3453_vm0, %v6432_v55  ;;  %v3635_v63 = vpack.c.bf16 %v3604_v62, %v3603_v61  ;;  %v3733_v7 = vld [vmem:[#allocation3 + $0xa] sm:$0xff] }
 0x11d   : > { %1373 = vst.msk [vmem:[#allocation2 + $0x48] sm:$0xff] %vm1363_vm6, %v1334_v56  ;;  %v3764_v8 = vpack.c.bf16 %v3733_v7, %v3732_v6  ;;  %v7448_v6 = vld [vmem:[%s8377_s3] ss:$0 sm:$0xff] }
 0x11e   : > { %1549 = vst.msk [vmem:[#allocation2 + $0x40] sm:$0xff] %vm1540_vm7, %v1509_v59  ;;  %1550 = vst.msk [vmem:[#allocation2 + $0x48] sm:$0xff] %vm1540_vm7, %v1511_v60  ;;  %3667 = vrot.lane.b32.xlu1 %v3635_v63, %s6433_s25 }
 0x11f   : > { %2094 = vst.msk [vmem:[#allocation2 + $0x40] sm:$0xff] %vm2085_vm8, %v2054_v53  ;;  %2095 = vst.msk [vmem:[#allocation2 + $0x48] sm:$0xff] %vm2085_vm8, %v2056_v0  ;;  %v2411_v12 = vpop.permute.xlu1 %2410  ;;  %v2954_v13 = vpop.permute.xlu0 %2953 }
 0x120   : > { %2272 = vst.msk [vmem:[#allocation2 + $0x40] sm:$0xff] %vm2263_vm9, %v2232_v4  ;;  %2273 = vst.msk [vmem:[#allocation2 + $0x48] sm:$0xff] %vm2263_vm9, %v2234_v9  ;;  %v3571_v4 = vpack.c.bf16 %v3540_v3, %v3539_v2 }
 0x121   : > { %2449 = vst.msk [vmem:[#allocation2 + $0x40] sm:$0xff] %vm2440_vm10, %v2409_v11  ;;  %2450 = vst.msk [vmem:[#allocation2 + $0x48] sm:$0xff] %vm2440_vm10, %v2411_v12 }
 0x122   : > { %3796 = vrot.lane.b32.xlu1 %v3764_v8, %s6434_s26  ;;  %2994 = vst.msk [vmem:[#allocation2 + $0x40] sm:$0xff] %vm2985_vm13, %v2954_v13 }
 0x123   : > { %v2956_v14 = vpop.permute.xlu1 %2955  ;;  %v1159_v15 = vpop.permute.xlu0 %1158  ;;  %3587 = vst.msk [vmem:[#allocation4] sm:$0xff] %vm3450_vm15, %v3571_v4 }
 0x124   : > { %2995 = vst.msk [vmem:[#allocation2 + $0x48] sm:$0xff] %vm2985_vm13, %v2956_v14 }
 0x125   : > { %1197 = vst.msk [vmem:[#allocation2 + $0x50] sm:$0xff] %vm1186_vm5, %v1159_v15 }
 0x127   : > { %v1161_v16 = vpop.permute.xlu1 %1160  ;;  %v1336_v18 = vpop.permute.xlu0 %1335 }
 0x128   : > { %1198 = vst.msk [vmem:[#allocation2 + $0x58] sm:$0xff] %vm1186_vm5, %v1161_v16 }
 0x129   : > { %v3010_v17 = vld [vmem:[#allocation2 + $0x40] sm:$0xff]  ;;  %1374 = vst.msk [vmem:[#allocation2 + $0x50] sm:$0xff] %vm1363_vm6, %v1336_v18 }
 0x12a   : > { %6100 = vmatprep.mubr.msk.bf16.mxu1 %vm3040_vm14, %v3010_v17 }
 0x12b   : > { %v3011_v19 = vld [vmem:[#allocation2 + $0x48] sm:$0xff]  ;;  %v1338_v21 = vpop.permute.xlu1 %1337 }
 0x12c   : > { %6101 = vmatmul.mubr.msk.bf16.vlgmr.msra.gmra.mrb[0].mxu1 %vm3040_vm14, %v3011_v19  ;;  %1375 = vst.msk [vmem:[#allocation2 + $0x58] sm:$0xff] %vm1363_vm6, %v1338_v21  ;;  %v1513_v22 = vpop.permute.xlu0 %1512 }
 0x12d   : > { %1551 = vst.msk [vmem:[#allocation2 + $0x50] sm:$0xff] %vm1540_vm7, %v1513_v22 }
 0x12f   : > { %v1515_v57 = vpop.permute.xlu1 %1514 }
 0x130   : > { %1552 = vst.msk [vmem:[#allocation2 + $0x58] sm:$0xff] %vm1540_vm7, %v1515_v57  ;;  %v2058_v23 = vpop.permute.xlu0 %2057 }
 0x131   : > { %2096 = vst.msk [vmem:[#allocation2 + $0x50] sm:$0xff] %vm2085_vm8, %v2058_v23 }
 0x133   : > { %v2060_v24 = vpop.permute.xlu1 %2059 }
 0x134   : > { %2097 = vst.msk [vmem:[#allocation2 + $0x58] sm:$0xff] %vm2085_vm8, %v2060_v24  ;;  %v2236_v25 = vpop.permute.xlu0 %2235 }
 0x135   : > { %2274 = vst.msk [vmem:[#allocation2 + $0x50] sm:$0xff] %vm2263_vm9, %v2236_v25 }
 0x137   : > { %v2238_v26 = vpop.permute.xlu1 %2237 }
 0x138   : > { %2275 = vst.msk [vmem:[#allocation2 + $0x58] sm:$0xff] %vm2263_vm9, %v2238_v26  ;;  %v2413_v27 = vpop.permute.xlu0 %2412 }
 0x139   : > { %2451 = vst.msk [vmem:[#allocation2 + $0x50] sm:$0xff] %vm2440_vm10, %v2413_v27 }
 0x13b   : > { %v2415_v10 = vpop.permute.xlu1 %2414 }
 0x13c   : > { %2452 = vst.msk [vmem:[#allocation2 + $0x58] sm:$0xff] %vm2440_vm10, %v2415_v10  ;;  %v2958_v29 = vpop.permute.xlu0 %2957 }
 0x13d   : > { %2996 = vst.msk [vmem:[#allocation2 + $0x50] sm:$0xff] %vm2985_vm13, %v2958_v29 }
 0x13f   : > { %v2960_v32 = vpop.permute.xlu1 %2959 }
 0x140   : > { %2997 = vst.msk [vmem:[#allocation2 + $0x58] sm:$0xff] %vm2985_vm13, %v2960_v32  ;;  %v1163_v33 = vpop.permute.xlu0 %1162 }
 0x141   : > { %1199 = vst.msk [vmem:[#allocation2 + $0x60] sm:$0xff] %vm1186_vm5, %v1163_v33 }
 0x143   : > { %v1165_v28 = vpop.permute.xlu1 %1164 }
 0x144   : > { %v3012_v34 = vld [vmem:[#allocation2 + $0x50] sm:$0xff]  ;;  %1200 = vst.msk [vmem:[#allocation2 + $0x68] sm:$0xff] %vm1186_vm5, %v1165_v28  ;;  %v1340_v35 = vpop.permute.xlu0 %1339 }
 0x145   : > { %6104 = vmatprep.mubr.msk.bf16.mxu1 %vm3040_vm14, %v3012_v34  ;;  %1376 = vst.msk [vmem:[#allocation2 + $0x60] sm:$0xff] %vm1363_vm6, %v1340_v35 }
 0x147   : > { %v3013_v36 = vld [vmem:[#allocation2 + $0x58] sm:$0xff]  ;;  %v1342_v20 = vpop.permute.xlu1 %1341 }
 0x148   : > { %6105 = vmatmul.mubr.msk.bf16.gmra.mrb[4].mxu1 %vm3040_vm14, %v3013_v36  ;;  %1377 = vst.msk [vmem:[#allocation2 + $0x68] sm:$0xff] %vm1363_vm6, %v1342_v20  ;;  %v1517_v37 = vpop.permute.xlu0 %1516 }
 0x149   : > { %1553 = vst.msk [vmem:[#allocation2 + $0x60] sm:$0xff] %vm1540_vm7, %v1517_v37 }
 0x14b   : > { %v1519_v39 = vpop.permute.xlu1 %1518 }
 0x14c   : > { %1554 = vst.msk [vmem:[#allocation2 + $0x68] sm:$0xff] %vm1540_vm7, %v1519_v39  ;;  %v2062_v40 = vpop.permute.xlu0 %2061 }
 0x14d   : > { %2098 = vst.msk [vmem:[#allocation2 + $0x60] sm:$0xff] %vm2085_vm8, %v2062_v40 }
 0x14f   : > { %v2064_v41 = vpop.permute.xlu1 %2063 }
 0x150   : > { %2099 = vst.msk [vmem:[#allocation2 + $0x68] sm:$0xff] %vm2085_vm8, %v2064_v41  ;;  %v2240_v42 = vpop.permute.xlu0 %2239 }
 0x151   : > { %2276 = vst.msk [vmem:[#allocation2 + $0x60] sm:$0xff] %vm2263_vm9, %v2240_v42 }
 0x153   : > { %v2242_v43 = vpop.permute.xlu1 %2241 }
 0x154   : > { %2277 = vst.msk [vmem:[#allocation2 + $0x68] sm:$0xff] %vm2263_vm9, %v2242_v43  ;;  %v2417_v44 = vpop.permute.xlu0 %2416 }
 0x155   : > { %2453 = vst.msk [vmem:[#allocation2 + $0x60] sm:$0xff] %vm2440_vm10, %v2417_v44 }
 0x157   : > { %v2419_v45 = vpop.permute.xlu1 %2418 }
 0x158   : > { %2454 = vst.msk [vmem:[#allocation2 + $0x68] sm:$0xff] %vm2440_vm10, %v2419_v45  ;;  %v2962_v46 = vpop.permute.xlu0 %2961 }
 0x159   : > { %2998 = vst.msk [vmem:[#allocation2 + $0x60] sm:$0xff] %vm2985_vm13, %v2962_v46 }
 0x15b   : > { %v2964_v47 = vpop.permute.xlu1 %2963 }
 0x15c   : > { %2999 = vst.msk [vmem:[#allocation2 + $0x68] sm:$0xff] %vm2985_vm13, %v2964_v47  ;;  %v1167_v48 = vpop.permute.xlu0 %1166 }
 0x15d   : > { %1201 = vst.msk [vmem:[#allocation2 + $0x70] sm:$0xff] %vm1186_vm5, %v1167_v48 }
 0x15f   : > { %v1169_v50 = vpop.permute.xlu1 %1168 }
 0x160   : > { %v3014_v49 = vld [vmem:[#allocation2 + $0x60] sm:$0xff]  ;;  %v1344_v31 = vpop.permute.xlu0 %1343  ;;  %1202 = vst.msk [vmem:[#allocation2 + $0x78] sm:$0xff] %vm1186_vm5, %v1169_v50 }
 0x161   : > { %6108 = vmatprep.mubr.msk.bf16.mxu1 %vm3040_vm14, %v3014_v49  ;;  %1378 = vst.msk [vmem:[#allocation2 + $0x70] sm:$0xff] %vm1363_vm6, %v1344_v31 }
 0x163   : > { %v3015_v51 = vld [vmem:[#allocation2 + $0x68] sm:$0xff]  ;;  %v1346_v52 = vpop.permute.xlu1 %1345 }
 0x164   : > { %6109 = vmatmul.mubr.msk.bf16.gmra.mrb[8].mxu1 %vm3040_vm14, %v3015_v51  ;;  %v1521_v54 = vpop.permute.xlu0 %1520  ;;  %1379 = vst.msk [vmem:[#allocation2 + $0x78] sm:$0xff] %vm1363_vm6, %v1346_v52 }
 0x165   : > { %1555 = vst.msk [vmem:[#allocation2 + $0x70] sm:$0xff] %vm1540_vm7, %v1521_v54 }
 0x167   : > { %v1523_v55 = vpop.permute.xlu1 %1522 }
 0x168   : > { %v2066_v56 = vpop.permute.xlu0 %2065  ;;  %1556 = vst.msk [vmem:[#allocation2 + $0x78] sm:$0xff] %vm1540_vm7, %v1523_v55 }
 0x169   : > { %2100 = vst.msk [vmem:[#allocation2 + $0x70] sm:$0xff] %vm2085_vm8, %v2066_v56 }
 0x16b   : > { %v2068_v58 = vpop.permute.xlu1 %2067 }
 0x16c   : > { %v2244_v59 = vpop.permute.xlu0 %2243  ;;  %2101 = vst.msk [vmem:[#allocation2 + $0x78] sm:$0xff] %vm2085_vm8, %v2068_v58 }
 0x16d   : > { %2278 = vst.msk [vmem:[#allocation2 + $0x70] sm:$0xff] %vm2263_vm9, %v2244_v59 }
 0x16f   : > { %v2246_v60 = vpop.permute.xlu1 %2245 }
 0x170   : > { %v2421_v53 = vpop.permute.xlu0 %2420  ;;  %2279 = vst.msk [vmem:[#allocation2 + $0x78] sm:$0xff] %vm2263_vm9, %v2246_v60 }
 0x171   : > { %2455 = vst.msk [vmem:[#allocation2 + $0x70] sm:$0xff] %vm2440_vm10, %v2421_v53 }
 0x173   : > { %v2423_v61 = vpop.permute.xlu1 %2422 }
 0x174   : > { %v2966_v62 = vpop.permute.xlu0 %2965  ;;  %2456 = vst.msk [vmem:[#allocation2 + $0x78] sm:$0xff] %vm2440_vm10, %v2423_v61 }
 0x175   : > { %3000 = vst.msk [vmem:[#allocation2 + $0x70] sm:$0xff] %vm2985_vm13, %v2966_v62 }
 0x177   : > { %v2968_v63 = vpop.permute.xlu1 %2967 }
 0x178   : > { %3001 = vst.msk [vmem:[#allocation2 + $0x78] sm:$0xff] %vm2985_vm13, %v2968_v63 }
 0x17c   : > { %v3016_v0 = vld [vmem:[#allocation2 + $0x70] sm:$0xff] }
 0x17d   : > { %6112 = vmatprep.mubr.msk.bf16.mxu1 %vm3040_vm14, %v3016_v0 }
 0x17f   : > { %v3017_v1 = vld [vmem:[#allocation2 + $0x78] sm:$0xff] }
 0x180   : > { %6113 = vmatmul.mubr.msk.bf16.gmra.mrb[12].mxu1 %vm3040_vm14, %v3017_v1 }
 0x18c   : > { %v6086_v7 = vpop.f32.mrb[0].mxu0 }
 0x18d   : > { %v3139_v8 = vadd.f32 %v6086_v7, %v7448_v6  ;;  %v3130_v9 = vpop.f32.mrb[1].mxu0 }
 0x18e   : > { %v3131_v12 = vadd.f32 %v7448_v6, %v3130_v9  ;;  %v6087_v13 = vpop.f32.mrb[2].mxu0 }
 0x18f   : > { %v3259_v14 = vmax.f32 %v3139_v8, 0.0  ;;  %v3142_v15 = vadd.f32 %v6087_v13, %v7448_v6  ;;  %v3133_v16 = vpop.f32.mrb[3].mxu0 }
 0x190   : > { %v3668_v5 = vpop.permute.xlu1 %3667  ;;  %v3257_v17 = vmax.f32 %v3131_v12, 0.0  ;;  %v3134_v18 = vadd.f32 %v7448_v6, %v3133_v16 }
 0x191   : > { %3716 = vst.msk [vmem:[#allocation4] sm:$0xff] %vm3715_vm1, %v3668_v5  ;;  %v5883_v19 = vpack.c.bf16 %v3259_v14, %v3259_v14  ;;  %v3260_v21 = vmax.f32 %v3142_v15, 0.0 }
 0x192   : > { %3509 = vst.msk [vmem:[#allocation3 + $0x31] sm:$0xff] %vm3450_vm15, %v3259_v14  ;;  %v5881_v22 = vpack.c.bf16 %v3257_v17, %v3257_v17  ;;  %3507 = vst.msk [vmem:[#allocation3 + $0x19] sm:$0xff] %vm3450_vm15, %v3257_v17  ;;  %v3258_v57 = vmax.f32 %v3134_v18, 0.0 }
 0x193   : > { %3420 = vst.msk [vmem:[%s7460_s29 + $0x8] sm:$0xf] %vm3417_vm3, %v5883_v19  ;;  %v5884_v23 = vpack.c.bf16 %v3260_v21, %v3260_v21 }
 0x194   : > { %v3797_v11 = vpop.permute.xlu1 %3796  ;;  %3510 = vst.msk [vmem:[#allocation3 + $0x39] sm:$0xff] %vm3450_vm15, %v3260_v21  ;;  %v5882_v24 = vpack.c.bf16 %v3258_v57, %v3258_v57  ;;  %3508 = vst.msk [vmem:[#allocation3 + $0x21] sm:$0xff] %vm3450_vm15, %v3258_v57 }
 0x195   : > { %3845 = vst.msk [vmem:[#allocation4] sm:$0xff] %vm3844_vm2, %v3797_v11 }
 0x196   : > { %3418 = vst.msk [vmem:[%s7460_s29] sm:$0xf] %vm3417_vm3, %v5881_v22  ;;  %3421 = vst.msk [vmem:[%s7460_s29 + $0xc] sm:$0xf] %vm3417_vm3, %v5884_v23 }
 0x197   : > { %3419 = vst.msk [vmem:[%s7460_s29 + $0x4] sm:$0xf] %vm3417_vm3, %v5882_v24 }
 0x199   : > { %v4183_v25 = vld [vmem:[#allocation3 + $0x30] sm:$0xff]  ;;  %v3861_v33 = vld [vmem:[#allocation3 + $0x18] sm:$0xff] }
 0x19a   : > { %v4311_v26 = vld [vmem:[#allocation3 + $0x31] sm:$0xff]  ;;  %v3990_v20 = vld [vmem:[#allocation3 + $0x19] sm:$0xff] }
 0x19b   : > { %v4184_v27 = vld [vmem:[#allocation3 + $0x38] sm:$0xff]  ;;  %v3862_v28 = vld [vmem:[#allocation3 + $0x20] sm:$0xff] }
 0x19c   : > { %v4312_v10 = vld [vmem:[#allocation3 + $0x39] sm:$0xff]  ;;  %v4215_v29 = vpack.c.bf16 %v4184_v27, %v4183_v25  ;;  %v3893_v35 = vpack.c.bf16 %v3862_v28, %v3861_v33  ;;  %v3991_v36 = vld [vmem:[#allocation3 + $0x21] sm:$0xff] }
 0x19d   : > { %v4439_v38 = vld [vmem:[#allocation3 + $0x32] sm:$0xff]  ;;  %v4343_v30 = vpack.c.bf16 %v4312_v10, %v4311_v26  ;;  %v4440_v32 = vld [vmem:[#allocation3 + $0x3a] sm:$0xff]  ;;  %v4022_v37 = vpack.c.bf16 %v3991_v36, %v3990_v20  ;;  %v3735_v49 = vld [vmem:[#allocation3 + $0x22] sm:$0xff] }
 0x19e   : > { %v4471_v34 = vpack.c.bf16 %v4440_v32, %v4439_v38  ;;  %4247 = vrot.lane.b32.xlu0 %v4215_v29, %s6434_s26  ;;  %3927 = vrot.lane.b32.xlu1 %v4215_v29, %s6435_s21  ;;  %3589 = vst.msk [vmem:[#allocation4 + $0x30] sm:$0xff] %vm3450_vm15, %v4215_v29  ;;  %3588 = vst.msk [vmem:[#allocation4 + $0x18] sm:$0xff] %vm3450_vm15, %v3893_v35  ;;  %v3606_v40 = vld [vmem:[#allocation3 + $0x21] sm:$0xff]  ;;  %v3605_v42 = vld [vmem:[#allocation3 + $0x19] sm:$0xff] }
 0x19f   : > { %4039 = vst.msk [vmem:[#allocation4 + $0x20] sm:$0xff] %vm3450_vm15, %v4343_v30  ;;  %4038 = vst.msk [vmem:[#allocation4 + $0x8] sm:$0xff] %vm3450_vm15, %v4022_v37  ;;  %v3636_v45 = vpack.c.bf16 %v3606_v40, %v3605_v42  ;;  %v3734_v48 = vld [vmem:[#allocation3 + $0x1a] sm:$0xff] }
 0x1a0   : > { %4487 = vst.msk [vmem:[#allocation4 + $0x10] sm:$0xff] %vm3450_vm15, %v4471_v34  ;;  %v7494_v58 = vpack.c.bf16 %v3735_v49, %v3734_v48 }
 0x1a2   : > { %4375 = vrot.lane.b32.xlu0 %v4343_v30, %s6435_s21  ;;  %3671 = vrot.lane.b32.xlu1 %v4343_v30, %s6433_s25 }
 0x1a6   : > { %4120 = vrot.lane.b32.xlu0 %v4471_v34, %s6433_s25  ;;  %3800 = vrot.lane.b32.xlu1 %v4471_v34, %s6434_s26 }
 0x1a7   : > { %v4505_v39 = vld [vmem:[#allocation4 + $0x10] sm:$0xff] }
 0x1a8   : > { %6120 = vmatprep.mubr.msk.bf16.mxu0 %vm3450_vm15, %v4505_v39 }
 0x1aa   : > { %3925 = vrot.lane.b32.xlu1 %v3893_v35, %s6435_s21 }
 0x1ab   : > { %v6090_v41 = vpop.f32.mrb[4].mxu0 }
 0x1ac   : > { %v3155_v43 = vadd.f32 %v6090_v41, %v7448_v6  ;;  %v3146_v44 = vpop.f32.mrb[5].mxu0 }
 0x1ad   : > { %v3147_v46 = vadd.f32 %v7448_v6, %v3146_v44  ;;  %v6091_v47 = vpop.f32.mrb[6].mxu0 }
 0x1ae   : > { %v3263_v50 = vmax.f32 %v3155_v43, 0.0  ;;  %v3158_v31 = vadd.f32 %v6091_v47, %v7448_v6  ;;  %v3149_v51 = vpop.f32.mrb[7].mxu0  ;;  %3669 = vrot.lane.b32.xlu1 %v3636_v45, %s6433_s25 }
 0x1af   : > { %v3261_v52 = vmax.f32 %v3147_v46, 0.0  ;;  %v3150_v54 = vadd.f32 %v7448_v6, %v3149_v51 }
 0x1b0   : > { %v5887_v55 = vpack.c.bf16 %v3263_v50, %v3263_v50  ;;  %3513 = vst.msk [vmem:[#allocation3 + $0x61] sm:$0xff] %vm3450_vm15, %v3263_v50  ;;  %v3264_v56 = vmax.f32 %v3158_v31, 0.0 }
 0x1b1   : > { %v5885_v59 = vpack.c.bf16 %v3261_v52, %v3261_v52  ;;  %3511 = vst.msk [vmem:[#allocation3 + $0x49] sm:$0xff] %vm3450_vm15, %v3261_v52  ;;  %v3262_v60 = vmax.f32 %v3150_v54, 0.0 }
 0x1b2   : > { %3424 = vst.msk [vmem:[%s7460_s29 + $0x18] sm:$0xf] %vm3417_vm3, %v5887_v55  ;;  %v5888_v53 = vpack.c.bf16 %v3264_v56, %v3264_v56  ;;  %3798 = vrot.lane.b32.xlu1 %v7494_v58, %s6434_s26 }
 0x1b3   : > { %3514 = vst.msk [vmem:[#allocation3 + $0x69] sm:$0xff] %vm3450_vm15, %v3264_v56  ;;  %v5886_v61 = vpack.c.bf16 %v3262_v60, %v3262_v60  ;;  %3512 = vst.msk [vmem:[#allocation3 + $0x51] sm:$0xff] %vm3450_vm15, %v3262_v60 }
 0x1b4   : > { %3422 = vst.msk [vmem:[%s7460_s29 + $0x10] sm:$0xf] %vm3417_vm3, %v5885_v59  ;;  %3425 = vst.msk [vmem:[%s7460_s29 + $0x1c] sm:$0xf] %vm3417_vm3, %v5888_v53 }
 0x1b5   : > { %3423 = vst.msk [vmem:[%s7460_s29 + $0x14] sm:$0xf] %vm3417_vm3, %v5886_v61 }
 0x1b7   : > { %v3867_v62 = vld [vmem:[#allocation3 + $0x60] sm:$0xff] }
 0x1b8   : > { %v3611_v63 = vld [vmem:[#allocation3 + $0x61] sm:$0xff]  ;;  %v3609_v14 = vld [vmem:[#allocation3 + $0x49] sm:$0xff] }
 0x1b9   : > { %v3865_v3 = vld [vmem:[#allocation3 + $0x48] sm:$0xff] }
 0x1ba   : > { %v4443_v0 = vld [vmem:[#allocation3 + $0x62] sm:$0xff]  ;;  %v4444_v1 = vld [vmem:[#allocation3 + $0x6a] sm:$0xff]  ;;  %v4442_v5 = vld [vmem:[#allocation3 + $0x52] sm:$0xff] }
 0x1bb   : > { %v3868_v2 = vld [vmem:[#allocation3 + $0x68] sm:$0xff]  ;;  %v7509_v7 = vpack.c.bf16 %v4444_v1, %v4443_v0  ;;  %v3866_v13 = vld [vmem:[#allocation3 + $0x50] sm:$0xff] }
 0x1bc   : > { %v4441_v4 = vld [vmem:[#allocation3 + $0x4a] sm:$0xff]  ;;  %v7511_v8 = vpack.c.bf16 %v3868_v2, %v3867_v62  ;;  %v7519_v16 = vpack.c.bf16 %v3866_v13, %v3865_v3 }
 0x1bd   : > { %v3612_v9 = vld [vmem:[#allocation3 + $0x69] sm:$0xff]  ;;  %v7513_v11 = vpack.c.bf16 %v4442_v5, %v4441_v4  ;;  %v3610_v15 = vld [vmem:[#allocation3 + $0x51] sm:$0xff]  ;;  %4489 = vst.msk [vmem:[#allocation4 + $0x40] sm:$0xff] %vm3450_vm15, %v7509_v7 }
 0x1be   : > { %v7515_v12 = vpack.c.bf16 %v3612_v9, %v3611_v63  ;;  %v7521_v17 = vpack.c.bf16 %v3610_v15, %v3609_v14  ;;  %3591 = vst.msk [vmem:[#allocation4 + $0x60] sm:$0xff] %vm3450_vm15, %v7511_v8  ;;  %3590 = vst.msk [vmem:[#allocation4 + $0x48] sm:$0xff] %vm3450_vm15, %v7519_v16 }
 0x1bf   : > { %4488 = vst.msk [vmem:[#allocation4 + $0x28] sm:$0xff] %vm3450_vm15, %v7513_v11 }
 0x1c0   : > { %4041 = vst.msk [vmem:[#allocation4 + $0x50] sm:$0xff] %vm3450_vm15, %v7515_v12  ;;  %4040 = vst.msk [vmem:[#allocation4 + $0x38] sm:$0xff] %vm3450_vm15, %v7521_v17 }
 0x1c4   : > { %v4511_v19 = vld [vmem:[#allocation4 + $0x40] sm:$0xff] }
 0x1c6   : > { %v4508_v18 = vld [vmem:[#allocation4 + $0x28] sm:$0xff] }
 0x1c7   : > { %6121 = vmatmul.mubr.msk.bf16.vlgmr.msra.gmra.mrb[16].mxu0 %vm3450_vm15, %v4508_v18  ;;  %v6094_v21 = vpop.f32.mrb[8].mxu0 }
 0x1c8   : > { %6124 = vmatprep.mubr.msk.bf16.mxu0 %vm3450_vm15, %v4511_v19  ;;  %v3171_v22 = vadd.f32 %v6094_v21, %v7448_v6  ;;  %v3162_v57 = vpop.f32.mrb[9].mxu0 }
 0x1c9   : > { %v3163_v23 = vadd.f32 %v7448_v6, %v3162_v57  ;;  %v6095_v24 = vpop.f32.mrb[10].mxu0 }
 0x1ca   : > { %v3267_v25 = vmax.f32 %v3171_v22, 0.0  ;;  %v3174_v26 = vadd.f32 %v6095_v24, %v7448_v6  ;;  %v3165_v27 = vpop.f32.mrb[11].mxu0 }
 0x1cb   : > { %v3265_v10 = vmax.f32 %v3163_v23, 0.0  ;;  %v3166_v38 = vadd.f32 %v7448_v6, %v3165_v27 }
 0x1cc   : > { %v5891_v29 = vpack.c.bf16 %v3267_v25, %v3267_v25  ;;  %3517 = vst.msk [vmem:[#allocation3 + $0x91] sm:$0xff] %vm3450_vm15, %v3267_v25  ;;  %v3268_v30 = vmax.f32 %v3174_v26, 0.0 }
 0x1cd   : > { %v5889_v32 = vpack.c.bf16 %v3265_v10, %v3265_v10  ;;  %3515 = vst.msk [vmem:[#allocation3 + $0x79] sm:$0xff] %vm3450_vm15, %v3265_v10  ;;  %v3266_v33 = vmax.f32 %v3166_v38, 0.0 }
 0x1ce   : > { %3428 = vst.msk [vmem:[%s7460_s29 + $0x28] sm:$0xf] %vm3417_vm3, %v5891_v29  ;;  %v5892_v28 = vpack.c.bf16 %v3268_v30, %v3268_v30 }
 0x1cf   : > { %3518 = vst.msk [vmem:[#allocation3 + $0x99] sm:$0xff] %vm3450_vm15, %v3268_v30  ;;  %v5890_v34 = vpack.c.bf16 %v3266_v33, %v3266_v33  ;;  %3516 = vst.msk [vmem:[#allocation3 + $0x81] sm:$0xff] %vm3450_vm15, %v3266_v33 }
 0x1d0   : > { %3426 = vst.msk [vmem:[%s7460_s29 + $0x20] sm:$0xf] %vm3417_vm3, %v5889_v32  ;;  %3429 = vst.msk [vmem:[%s7460_s29 + $0x2c] sm:$0xf] %vm3417_vm3, %v5892_v28  ;;  %v6344_v28 = vld [vmem:[%s8378_s4 + $0x40] sm:$0xff]  }
 0x1d1   : > { %3427 = vst.msk [vmem:[%s7460_s29 + $0x24] sm:$0xf] %vm3417_vm3, %v5890_v34  ;;  %v6345_v34 = vld [vmem:[%s8378_s4] sm:$0xff]   ;;  %5932 = vmatprep.subr.bf16.mxu1 %v6344_v28 }
 0x1d2   : > { %5933 = vmatpush3.bf16.msra.mxu1 %v6345_v34 }
 0x1d3   : > { %v3871_v35 = vld [vmem:[#allocation3 + $0x90] sm:$0xff] }
 0x1d4   : > { %v4000_v43 = vld [vmem:[#allocation3 + $0x91] sm:$0xff]  ;;  %v3998_v50 = vld [vmem:[#allocation3 + $0x79] sm:$0xff] }
 0x1d5   : > { %v3869_v45 = vld [vmem:[#allocation3 + $0x78] sm:$0xff] }
 0x1d6   : > { %v4447_v36 = vld [vmem:[#allocation3 + $0x92] sm:$0xff]  ;;  %v4448_v20 = vld [vmem:[#allocation3 + $0x9a] sm:$0xff]  ;;  %v4446_v40 = vld [vmem:[#allocation3 + $0x82] sm:$0xff] }
 0x1d7   : > { %v3872_v37 = vld [vmem:[#allocation3 + $0x98] sm:$0xff]  ;;  %v7551_v41 = vpack.c.bf16 %v4448_v20, %v4447_v36  ;;  %v3870_v46 = vld [vmem:[#allocation3 + $0x80] sm:$0xff]  ;;  %v6346_v20 = vld [vmem:[%s8378_s4 + $0x48] sm:$0xff]  }
 0x1d8   : > { %v4445_v39 = vld [vmem:[#allocation3 + $0x7a] sm:$0xff]  ;;  %v7553_v42 = vpack.c.bf16 %v3872_v37, %v3871_v35  ;;  %v7559_v48 = vpack.c.bf16 %v3870_v46, %v3869_v45  ;;  %v6347_v37 = vld [vmem:[%s8378_s4 + $0x8] sm:$0xff]   ;;  %5934 = vmatprep.subr.bf16.mxu1 %v6346_v20 }
 0x1d9   : > { %v7555_v44 = vpack.c.bf16 %v4446_v40, %v4445_v39  ;;  %v4001_v47 = vld [vmem:[#allocation3 + $0x99] sm:$0xff]  ;;  %4491 = vst.msk [vmem:[#allocation4 + $0x70] sm:$0xff] %vm3450_vm15, %v7551_v41  ;;  %v3999_v31 = vld [vmem:[#allocation3 + $0x81] sm:$0xff]  ;;  %5935 = vmatpush3.bf16.msra.mxu1 %v6347_v37  ;;  %v6356_v37 = vld [vmem:[%s8378_s4 + $0x70] sm:$0xff]  }
 0x1da   : > { %3593 = vst.msk [vmem:[#allocation4 + $0x90] sm:$0xff] %vm3450_vm15, %v7553_v42  ;;  %v4027_v49 = vpack.c.bf16 %v4001_v47, %v4000_v43  ;;  %v4026_v51 = vpack.c.bf16 %v3999_v31, %v3998_v50  ;;  %3592 = vst.msk [vmem:[#allocation4 + $0x78] sm:$0xff] %vm3450_vm15, %v7559_v48  ;;  %v6348_v47 = vld [vmem:[%s8378_s4 + $0x50] sm:$0xff]  }
 0x1db   : > { %4490 = vst.msk [vmem:[#allocation4 + $0x58] sm:$0xff] %vm3450_vm15, %v7555_v44  ;;  %5936 = vmatprep.subr.bf16.mxu1 %v6348_v47  ;;  %v6359_v47 = vld [vmem:[%s8378_s4 + $0x38] sm:$0xff]  }
 0x1dc   : > { %4043 = vst.msk [vmem:[#allocation4 + $0x80] sm:$0xff] %vm3450_vm15, %v4027_v49  ;;  %4042 = vst.msk [vmem:[#allocation4 + $0x68] sm:$0xff] %vm3450_vm15, %v4026_v51  ;;  %v6349_v51 = vld [vmem:[%s8378_s4 + $0x10] sm:$0xff]  }
 0x1dd   : > { %5937 = vmatpush3.bf16.msra.mxu1 %v6349_v51 }
 0x1e0   : > { %v4517_v54 = vld [vmem:[#allocation4 + $0x70] sm:$0xff] }
 0x1e2   : > { %v4514_v52 = vld [vmem:[#allocation4 + $0x58] sm:$0xff] }
 0x1e3   : > { %6125 = vmatmul.mubr.msk.bf16.gmra.mrb[20].mxu0 %vm3450_vm15, %v4514_v52  ;;  %v6098_v55 = vpop.f32.mrb[12].mxu0 }
 0x1e4   : > { %6128 = vmatprep.mubr.msk.bf16.mxu0 %vm3450_vm15, %v4517_v54  ;;  %v3187_v56 = vadd.f32 %v6098_v55, %v7448_v6  ;;  %v3178_v59 = vpop.f32.mrb[13].mxu0 }
 0x1e5   : > { %v3179_v60 = vadd.f32 %v7448_v6, %v3178_v59  ;;  %v6099_v53 = vpop.f32.mrb[14].mxu0 }
 0x1e6   : > { %v3271_v61 = vmax.f32 %v3187_v56, 0.0  ;;  %v3190_v62 = vadd.f32 %v6099_v53, %v7448_v6  ;;  %v3181_v63 = vpop.f32.mrb[15].mxu0  ;;  %v6350_v53 = vld [vmem:[%s8378_s4 + $0x58] sm:$0xff]  }
 0x1e7   : > { %v3269_v0 = vmax.f32 %v3179_v60, 0.0  ;;  %v3182_v1 = vadd.f32 %v7448_v6, %v3181_v63  ;;  %5938 = vmatprep.subr.bf16.mxu1 %v6350_v53 }
 0x1e8   : > { %v5895_v2 = vpack.c.bf16 %v3271_v61, %v3271_v61  ;;  %3521 = vst.msk [vmem:[#allocation3 + $0xc1] sm:$0xff] %vm3450_vm15, %v3271_v61  ;;  %v3272_v3 = vmax.f32 %v3190_v62, 0.0  ;;  %v6351_v62 = vld [vmem:[%s8378_s4 + $0x18] sm:$0xff]  }
 0x1e9   : > { %v5893_v4 = vpack.c.bf16 %v3269_v0, %v3269_v0  ;;  %3519 = vst.msk [vmem:[#allocation3 + $0xa9] sm:$0xff] %vm3450_vm15, %v3269_v0  ;;  %v3270_v5 = vmax.f32 %v3182_v1, 0.0  ;;  %5939 = vmatpush3.bf16.msra.mxu1 %v6351_v62  ;;  %v6352_v0 = vld [vmem:[%s8378_s4 + $0x60] sm:$0xff]  }
 0x1ea   : > { %3432 = vst.msk [vmem:[%s7460_s29 + $0x38] sm:$0xf] %vm3417_vm3, %v5895_v2  ;;  %v5896_v9 = vpack.c.bf16 %v3272_v3, %v3272_v3  ;;  %v6353_v1 = vld [vmem:[%s8378_s4 + $0x20] sm:$0xff]   ;;  %5940 = vmatprep.subr.bf16.mxu1 %v6352_v0 }
 0x1eb   : > { %3522 = vst.msk [vmem:[#allocation3 + $0xc9] sm:$0xff] %vm3450_vm15, %v3272_v3  ;;  %v5894_v13 = vpack.c.bf16 %v3270_v5, %v3270_v5  ;;  %3520 = vst.msk [vmem:[#allocation3 + $0xb1] sm:$0xff] %vm3450_vm15, %v3270_v5 }
 0x1ec   : > { %3430 = vst.msk [vmem:[%s7460_s29 + $0x30] sm:$0xf] %vm3417_vm3, %v5893_v4  ;;  %3433 = vst.msk [vmem:[%s7460_s29 + $0x3c] sm:$0xf] %vm3417_vm3, %v5896_v9 }
 0x1ed   : > { %3431 = vst.msk [vmem:[%s7460_s29 + $0x34] sm:$0xf] %vm3417_vm3, %v5894_v13  ;;  %5941 = vmatpush3.bf16.msra.mxu1 %v6353_v1 }
 0x1ef   : > { %v3875_v14 = vld [vmem:[#allocation3 + $0xc0] sm:$0xff] }
 0x1f0   : > { %v3873_v21 = vld [vmem:[#allocation3 + $0xa8] sm:$0xff] }
 0x1f1   : > { %v4004_v22 = vld [vmem:[#allocation3 + $0xc1] sm:$0xff]  ;;  %v3617_v26 = vld [vmem:[#allocation3 + $0xa9] sm:$0xff] }
 0x1f2   : > { %v4451_v15 = vld [vmem:[#allocation3 + $0xc2] sm:$0xff]  ;;  %v4452_v18 = vld [vmem:[#allocation3 + $0xca] sm:$0xff]  ;;  %v4450_v23 = vld [vmem:[#allocation3 + $0xb2] sm:$0xff] }
 0x1f3   : > { %v3876_v19 = vld [vmem:[#allocation3 + $0xc8] sm:$0xff]  ;;  %v7587_v24 = vpack.c.bf16 %v4452_v18, %v4451_v15  ;;  %v3874_v10 = vld [vmem:[#allocation3 + $0xb0] sm:$0xff] }
 0x1f4   : > { %v4449_v57 = vld [vmem:[#allocation3 + $0xaa] sm:$0xff]  ;;  %v7589_v25 = vpack.c.bf16 %v3876_v19, %v3875_v14  ;;  %v7595_v30 = vpack.c.bf16 %v3874_v10, %v3873_v21 }
 0x1f5   : > { %v7591_v27 = vpack.c.bf16 %v4450_v23, %v4449_v57  ;;  %v3618_v38 = vld [vmem:[#allocation3 + $0xb1] sm:$0xff]  ;;  %v4005_v29 = vld [vmem:[#allocation3 + $0xc9] sm:$0xff]  ;;  %4493 = vst.msk [vmem:[#allocation4 + $0xa0] sm:$0xff] %vm3450_vm15, %v7587_v24 }
 0x1f6   : > { %v7597_v32 = vpack.c.bf16 %v3618_v38, %v3617_v26  ;;  %3595 = vst.msk [vmem:[#allocation4 + $0xc0] sm:$0xff] %vm3450_vm15, %v7589_v25  ;;  %v4029_v33 = vpack.c.bf16 %v4005_v29, %v4004_v22  ;;  %3594 = vst.msk [vmem:[#allocation4 + $0xa8] sm:$0xff] %vm3450_vm15, %v7595_v30  ;;  %v6354_v29 = vld [vmem:[%s8378_s4 + $0x68] sm:$0xff]  }
 0x1f7   : > { %4492 = vst.msk [vmem:[#allocation4 + $0x88] sm:$0xff] %vm3450_vm15, %v7591_v27  ;;  %5942 = vmatprep.subr.bf16.mxu1 %v6354_v29 }
 0x1f8   : > { %4045 = vst.msk [vmem:[#allocation4 + $0xb0] sm:$0xff] %vm3450_vm15, %v4029_v33  ;;  %4044 = vst.msk [vmem:[#allocation4 + $0x98] sm:$0xff] %vm3450_vm15, %v7597_v32 }
 0x1fc   : > { %v4523_v36 = vld [vmem:[#allocation4 + $0xa0] sm:$0xff] }
 0x1fe   : > { %v4520_v35 = vld [vmem:[#allocation4 + $0x88] sm:$0xff] }
 0x1ff   : > { %6129 = vmatmul.mubr.msk.bf16.gmra.mrb[24].mxu0 %vm3450_vm15, %v4520_v35  ;;  %v6102_v39 = vpop.f32.mrb[0].mxu1  ;;  %v6355_v35 = vld [vmem:[%s8378_s4 + $0x28] sm:$0xff]  }
 0x200   : > { %6132 = vmatprep.mubr.msk.bf16.mxu0 %vm3450_vm15, %v4523_v36  ;;  %v3203_v40 = vadd.f32 %v6102_v39, %v7448_v6  ;;  %v3194_v43 = vpop.f32.mrb[1].mxu1  ;;  %5943 = vmatpush3.bf16.msra.mxu1 %v6355_v35 }
 0x201   : > { %v3195_v45 = vadd.f32 %v7448_v6, %v3194_v43  ;;  %v6103_v46 = vpop.f32.mrb[2].mxu1  ;;  %5944 = vmatprep.subr.bf16.mxu1 %v6356_v37 }
 0x202   : > { %v3275_v49 = vmax.f32 %v3203_v40, 0.0  ;;  %v3206_v50 = vadd.f32 %v6103_v46, %v7448_v6  ;;  %v3197_v31 = vpop.f32.mrb[3].mxu1  ;;  %v6357_v40 = vld [vmem:[%s8378_s4 + $0x30] sm:$0xff]   ;;  %v6358_v46 = vld [vmem:[%s8378_s4 + $0x78] sm:$0xff]  }
 0x203   : > { %v3273_v52 = vmax.f32 %v3195_v45, 0.0  ;;  %v3198_v54 = vadd.f32 %v7448_v6, %v3197_v31 }
 0x204   : > { %v5899_v55 = vpack.c.bf16 %v3275_v49, %v3275_v49  ;;  %3525 = vst.msk [vmem:[#allocation3 + $0xf1] sm:$0xff] %vm3450_vm15, %v3275_v49  ;;  %v3276_v56 = vmax.f32 %v3206_v50, 0.0  ;;  %5945 = vmatpush3.bf16.msra.mxu1 %v6357_v40 }
 0x205   : > { %v5897_v59 = vpack.c.bf16 %v3273_v52, %v3273_v52  ;;  %3523 = vst.msk [vmem:[#allocation3 + $0xd9] sm:$0xff] %vm3450_vm15, %v3273_v52  ;;  %v3274_v60 = vmax.f32 %v3198_v54, 0.0  ;;  %5946 = vmatprep.subr.bf16.mxu1 %v6358_v46  ;;  %v3616_v46 = vld [vmem:[#allocation3 + $0x99] sm:$0xff] }
 0x206   : > { %3436 = vst.msk [vmem:[%s7460_s29 + $0x48] sm:$0xf] %vm3417_vm3, %v5899_v55  ;;  %v5900_v61 = vpack.c.bf16 %v3276_v56, %v3276_v56 }
 0x207   : > { %3526 = vst.msk [vmem:[#allocation3 + $0xf9] sm:$0xff] %vm3450_vm15, %v3276_v56  ;;  %v5898_v63 = vpack.c.bf16 %v3274_v60, %v3274_v60  ;;  %3524 = vst.msk [vmem:[#allocation3 + $0xe1] sm:$0xff] %vm3450_vm15, %v3274_v60 }
 0x208   : > { %3434 = vst.msk [vmem:[%s7460_s29 + $0x40] sm:$0xf] %vm3417_vm3, %v5897_v59  ;;  %3437 = vst.msk [vmem:[%s7460_s29 + $0x4c] sm:$0xf] %vm3417_vm3, %v5900_v61  ;;  %5947 = vmatpush3.bf16.msra.mxu1 %v6359_v47 }
 0x209   : > { %3435 = vst.msk [vmem:[%s7460_s29 + $0x44] sm:$0xf] %vm3417_vm3, %v5898_v63 }
 0x20b   : > { %v4199_v2 = vld [vmem:[#allocation3 + $0xf0] sm:$0xff] }
 0x20c   : > { %v3877_v3 = vld [vmem:[#allocation3 + $0xd8] sm:$0xff]  ;;  %v3559_v36 = vld [vmem:[#allocation3 + $0xf0] sm:$0xff] }
 0x20d   : > { %v4327_v4 = vld [vmem:[#allocation3 + $0xf1] sm:$0xff]  ;;  %v3621_v5 = vld [vmem:[#allocation3 + $0xd9] sm:$0xff] }
 0x20e   : > { %v4200_v9 = vld [vmem:[#allocation3 + $0xf8] sm:$0xff]  ;;  %v3878_v18 = vld [vmem:[#allocation3 + $0xe0] sm:$0xff] }
 0x20f   : > { %v4328_v13 = vld [vmem:[#allocation3 + $0xf9] sm:$0xff]  ;;  %v7656_v15 = vpack.c.bf16 %v4200_v9, %v4199_v2  ;;  %v3622_v21 = vld [vmem:[#allocation3 + $0xe1] sm:$0xff]  ;;  %v3901_v57 = vpack.c.bf16 %v3878_v18, %v3877_v3 }
 0x210   : > { %v4072_v14 = vld [vmem:[#allocation3 + $0xf2] sm:$0xff]  ;;  %v7658_v19 = vpack.c.bf16 %v4328_v13, %v4327_v4  ;;  %v4073_v22 = vld [vmem:[#allocation3 + $0xfa] sm:$0xff]  ;;  %v7660_v23 = vpack.c.bf16 %v3622_v21, %v3621_v5  ;;  %v4454_v38 = vld [vmem:[#allocation3 + $0xe2] sm:$0xff]  ;;  %v7669_v33 = vpop.permute.xlu0 %4247  ;;  %v7671_v28 = vpop.permute.xlu1 %3927 }
 0x211   : > { %v7662_v26 = vpack.c.bf16 %v4073_v22, %v4072_v14  ;;  %v4453_v10 = vld [vmem:[#allocation3 + $0xda] sm:$0xff]  ;;  %4263 = vrot.lane.b32.xlu0 %v7656_v15, %s6434_s26  ;;  %3941 = vrot.lane.b32.xlu1 %v3901_v57, %s6435_s21  ;;  %3596 = vst.msk [vmem:[#allocation4 + $0xd8] sm:$0xff] %vm3450_vm15, %v3901_v57 }
 0x212   : > { %v7673_v34 = vpack.c.bf16 %v4454_v38, %v4453_v10  ;;  %4047 = vst.msk [vmem:[#allocation4 + $0xe0] sm:$0xff] %vm3450_vm15, %v7658_v19  ;;  %v3560_v20 = vld [vmem:[#allocation3 + $0xf8] sm:$0xff]  ;;  %4046 = vst.msk [vmem:[#allocation4 + $0xc8] sm:$0xff] %vm3450_vm15, %v7660_v23 }
 0x213   : > { %4495 = vst.msk [vmem:[#allocation4 + $0xd0] sm:$0xff] %vm3450_vm15, %v7662_v26  ;;  %v3581_v39 = vpack.c.bf16 %v3560_v20, %v3559_v36 }
 0x214   : > { %4494 = vst.msk [vmem:[#allocation4 + $0xb8] sm:$0xff] %vm3450_vm15, %v7673_v34  ;;  %v7697_v43 = vpop.permute.xlu0 %4375  ;;  %v3672_v45 = vpop.permute.xlu1 %3671 }
 0x215   : > { %3597 = vst.msk [vmem:[#allocation4 + $0xf0] sm:$0xff] %vm3450_vm15, %v3581_v39  ;;  %4391 = vrot.lane.b32.xlu0 %v7658_v19, %s6435_s21  ;;  %3685 = vrot.lane.b32.xlu1 %v7660_v23, %s6433_s25 }
 0x216   : > { %3718 = vst.msk [vmem:[#allocation4 + $0x30] sm:$0xff] %vm3715_vm1, %v3672_v45 }
 0x218   : > { %v4121_v49 = vpop.permute.xlu0 %4120  ;;  %v3801_v50 = vpop.permute.xlu1 %3800 }
 0x219   : > { %4136 = vrot.lane.b32.xlu0 %v7662_v26, %s6433_s25  ;;  %3814 = vrot.lane.b32.xlu1 %v7673_v34, %s6434_s26  ;;  %4167 = vst.msk [vmem:[#allocation4 + $0x20] sm:$0xff] %vm3715_vm1, %v4121_v49  ;;  %v3615_v49 = vld [vmem:[#allocation3 + $0x91] sm:$0xff] }
 0x21a   : > { %3847 = vst.msk [vmem:[#allocation4 + $0x30] sm:$0xff] %vm3844_vm2, %v3801_v50  ;;  %v4529_v51 = vld [vmem:[#allocation4 + $0xd0] sm:$0xff]  ;;  %v7787_v50 = vpack.c.bf16 %v3616_v46, %v3615_v49 }
 0x21b   : > { %v4526_v31 = vld [vmem:[#allocation4 + $0xb8] sm:$0xff]  ;;  %v6106_v52 = vpop.f32.mrb[4].mxu1 }
 0x21c   : > { %6133 = vmatmul.mubr.msk.bf16.gmra.mrb[28].mxu0 %vm3450_vm15, %v4526_v31  ;;  %v3926_v54 = vpop.permute.xlu1 %3925  ;;  %v3219_v55 = vadd.f32 %v6106_v52, %v7448_v6  ;;  %v3210_v56 = vpop.f32.mrb[5].mxu1  ;;  %v3619_v46 = vld [vmem:[#allocation3 + $0xc1] sm:$0xff] }
 0x21d   : > { %6136 = vmatprep.mubr.msk.bf16.mxu0 %vm3450_vm15, %v4529_v51  ;;  %4118 = vrot.lane.b32.xlu0 %v7494_v58, %s6433_s25  ;;  %3974 = vst.msk [vmem:[#allocation4] sm:$0xff] %vm3973_vm4, %v3926_v54  ;;  %v3211_v59 = vadd.f32 %v7448_v6, %v3210_v56  ;;  %v6107_v60 = vpop.f32.mrb[6].mxu1 }
 0x21e   : > { %3931 = vrot.lane.b32.xlu1 %v7511_v8, %s6435_s21  ;;  %v3279_v53 = vmax.f32 %v3219_v55, 0.0  ;;  %v3222_v61 = vadd.f32 %v6107_v60, %v7448_v6  ;;  %v3213_v62 = vpop.f32.mrb[7].mxu1 }
 0x21f   : > { %v3277_v63 = vmax.f32 %v3211_v59, 0.0  ;;  %v3214_v58 = vadd.f32 %v7448_v6, %v3213_v62 }
 0x220   : > { %v3670_v0 = vpop.permute.xlu1 %3669  ;;  %v5903_v1 = vpack.c.bf16 %v3279_v53, %v3279_v53  ;;  %3529 = vst.msk [vmem:[#allocation3 + $0x121] sm:$0xff] %vm3450_vm15, %v3279_v53  ;;  %v3280_v2 = vmax.f32 %v3222_v61, 0.0 }
 0x221   : > { %4261 = vrot.lane.b32.xlu0 %v3901_v57, %s6434_s26  ;;  %3717 = vst.msk [vmem:[#allocation4 + $0x18] sm:$0xff] %vm3715_vm1, %v3670_v0  ;;  %v5901_v3 = vpack.c.bf16 %v3277_v63, %v3277_v63  ;;  %v3278_v4 = vmax.f32 %v3214_v58, 0.0 }
 0x222   : > { %3675 = vrot.lane.b32.xlu1 %v7515_v12, %s6433_s25  ;;  %3527 = vst.msk [vmem:[#allocation3 + $0x109] sm:$0xff] %vm3450_vm15, %v3277_v63  ;;  %v5904_v5 = vpack.c.bf16 %v3280_v2, %v3280_v2  ;;  %3530 = vst.msk [vmem:[#allocation3 + $0x129] sm:$0xff] %vm3450_vm15, %v3280_v2 }
 0x223   : > { %3440 = vst.msk [vmem:[%s7460_s29 + $0x58] sm:$0xf] %vm3417_vm3, %v5903_v1  ;;  %3438 = vst.msk [vmem:[%s7460_s29 + $0x50] sm:$0xf] %vm3417_vm3, %v5901_v3  ;;  %v5902_v9 = vpack.c.bf16 %v3278_v4, %v3278_v4  ;;  %v3614_v1 = vld [vmem:[#allocation3 + $0x81] sm:$0xff]  ;;  %v3613_v3 = vld [vmem:[#allocation3 + $0x79] sm:$0xff] }
 0x224   : > { %3528 = vst.msk [vmem:[#allocation3 + $0x111] sm:$0xff] %vm3450_vm15, %v3278_v4  ;;  %v3799_v13 = vpop.permute.xlu1 %3798  ;;  %v3640_v4 = vpack.c.bf16 %v3614_v1, %v3613_v3 }
 0x225   : > { %4389 = vrot.lane.b32.xlu0 %v7660_v23, %s6435_s21  ;;  %3441 = vst.msk [vmem:[%s7460_s29 + $0x5c] sm:$0xf] %vm3417_vm3, %v5904_v5  ;;  %3439 = vst.msk [vmem:[%s7460_s29 + $0x54] sm:$0xf] %vm3417_vm3, %v5902_v9 }
 0x226   : > { %3804 = vrot.lane.b32.xlu1 %v7509_v7, %s6434_s26  ;;  %3846 = vst.msk [vmem:[#allocation4 + $0x18] sm:$0xff] %vm3844_vm2, %v3799_v13 }
 0x227   : > { %3975 = vst.msk [vmem:[#allocation4 + $0x18] sm:$0xff] %vm3973_vm4, %v7671_v28  ;;  %v3883_v14 = vld [vmem:[#allocation3 + $0x120] sm:$0xff] }
 0x228   : > { %v3627_v21 = vld [vmem:[#allocation3 + $0x121] sm:$0xff] }
 0x229   : > { %4134 = vrot.lane.b32.xlu0 %v7673_v34, %s6433_s25  ;;  %v3625_v18 = vld [vmem:[#allocation3 + $0x109] sm:$0xff] }
 0x22a   : > { %v3561_v22 = vld [vmem:[#allocation3 + $0x108] sm:$0xff]  ;;  %3929 = vrot.lane.b32.xlu1 %v7519_v16, %s6435_s21 }
 0x22b   : > { %v4459_v57 = vld [vmem:[#allocation3 + $0x122] sm:$0xff]  ;;  %v4460_v23 = vld [vmem:[#allocation3 + $0x12a] sm:$0xff]  ;;  %v4458_v29 = vld [vmem:[#allocation3 + $0x112] sm:$0xff] }
 0x22c   : > { %v3884_v10 = vld [vmem:[#allocation3 + $0x128] sm:$0xff]  ;;  %v7752_v35 = vpack.c.bf16 %v4460_v23, %v4459_v57  ;;  %v3626_v20 = vld [vmem:[#allocation3 + $0x111] sm:$0xff] }
 0x22d   : > { %v4457_v38 = vld [vmem:[#allocation3 + $0x10a] sm:$0xff]  ;;  %v7754_v36 = vpack.c.bf16 %v3884_v10, %v3883_v14  ;;  %4251 = vrot.lane.b32.xlu0 %v7511_v8, %s6434_s26  ;;  %v7762_v39 = vpack.c.bf16 %v3626_v20, %v3625_v18 }
 0x22e   : > { %v7756_v28 = vpack.c.bf16 %v4458_v29, %v4457_v38  ;;  %v3628_v37 = vld [vmem:[#allocation3 + $0x129] sm:$0xff]  ;;  %4497 = vst.msk [vmem:[#allocation4 + $0x100] sm:$0xff] %vm3450_vm15, %v7752_v35  ;;  %3673 = vrot.lane.b32.xlu1 %v7521_v17, %s6433_s25 }
 0x22f   : > { %v3562_v34 = vld [vmem:[#allocation3 + $0x110] sm:$0xff]  ;;  %v7764_v40 = vpack.c.bf16 %v3628_v37, %v3627_v21  ;;  %3599 = vst.msk [vmem:[#allocation4 + $0x120] sm:$0xff] %vm3450_vm15, %v7754_v36  ;;  %4048 = vst.msk [vmem:[#allocation4 + $0xf8] sm:$0xff] %vm3450_vm15, %v7762_v39  ;;  %v4201_v58 = vld [vmem:[#allocation3 + $0x108] sm:$0xff] }
 0x230   : > { %v3582_v45 = vpack.c.bf16 %v3562_v34, %v3561_v22  ;;  %4496 = vst.msk [vmem:[#allocation4 + $0xe8] sm:$0xff] %vm3450_vm15, %v7756_v28 }
 0x231   : > { %4049 = vst.msk [vmem:[#allocation4 + $0x110] sm:$0xff] %vm3450_vm15, %v7764_v40  ;;  %4379 = vrot.lane.b32.xlu0 %v7515_v12, %s6435_s21 }
 0x232   : > { %3598 = vst.msk [vmem:[#allocation4 + $0x108] sm:$0xff] %vm3450_vm15, %v3582_v45  ;;  %3802 = vrot.lane.b32.xlu1 %v7513_v11, %s6434_s26 }
 0x235   : > { %v4535_v8 = vld [vmem:[#allocation4 + $0x100] sm:$0xff]  ;;  %4124 = vrot.lane.b32.xlu0 %v7509_v7, %s6433_s25 }
 0x236   : > { %3935 = vrot.lane.b32.xlu1 %v7553_v42, %s6435_s21 }
 0x237   : > { %v4532_v47 = vld [vmem:[#allocation4 + $0xe8] sm:$0xff]  ;;  %v6110_v12 = vpop.f32.mrb[8].mxu1 }
 0x238   : > { %6137 = vmatmul.mubr.msk.bf16.gmra.mrb[32].mxu0 %vm3450_vm15, %v4532_v47  ;;  %v3235_v31 = vadd.f32 %v6110_v12, %v7448_v6  ;;  %v3226_v51 = vpop.f32.mrb[9].mxu1 }
 0x239   : > { %6140 = vmatprep.mubr.msk.bf16.mxu0 %vm3450_vm15, %v4535_v8  ;;  %4249 = vrot.lane.b32.xlu0 %v7519_v16, %s6434_s26  ;;  %v3227_v7 = vadd.f32 %v7448_v6, %v3226_v51  ;;  %v6111_v52 = vpop.f32.mrb[10].mxu1 }
 0x23a   : > { %3679 = vrot.lane.b32.xlu1 %v7787_v50, %s6433_s25  ;;  %v3283_v54 = vmax.f32 %v3235_v31, 0.0  ;;  %v3238_v55 = vadd.f32 %v6111_v52, %v7448_v6  ;;  %v3229_v56 = vpop.f32.mrb[11].mxu1 }
 0x23b   : > { %v3281_v59 = vmax.f32 %v3227_v7, 0.0  ;;  %v3230_v60 = vadd.f32 %v7448_v6, %v3229_v56 }
 0x23c   : > { %v5907_v16 = vpack.c.bf16 %v3283_v54, %v3283_v54  ;;  %3533 = vst.msk [vmem:[#allocation3 + $0x151] sm:$0xff] %vm3450_vm15, %v3283_v54  ;;  %v3284_v53 = vmax.f32 %v3238_v55, 0.0 }
 0x23d   : > { %4377 = vrot.lane.b32.xlu0 %v7521_v17, %s6435_s21  ;;  %v5905_v61 = vpack.c.bf16 %v3281_v59, %v3281_v59  ;;  %3531 = vst.msk [vmem:[#allocation3 + $0x139] sm:$0xff] %vm3450_vm15, %v3281_v59  ;;  %v3282_v62 = vmax.f32 %v3230_v60, 0.0  ;;  %v4202_v17 = vld [vmem:[#allocation3 + $0x110] sm:$0xff] }
 0x23e   : > { %3808 = vrot.lane.b32.xlu1 %v7551_v41, %s6434_s26  ;;  %3444 = vst.msk [vmem:[%s7460_s29 + $0x68] sm:$0xf] %vm3417_vm3, %v5907_v16  ;;  %v5908_v63 = vpack.c.bf16 %v3284_v53, %v3284_v53  ;;  %v7817_v2 = vpack.c.bf16 %v4202_v17, %v4201_v58 }
 0x23f   : > { %3534 = vst.msk [vmem:[#allocation3 + $0x159] sm:$0xff] %vm3450_vm15, %v3284_v53  ;;  %v5906_v0 = vpack.c.bf16 %v3282_v62, %v3282_v62  ;;  %3532 = vst.msk [vmem:[#allocation3 + $0x141] sm:$0xff] %vm3450_vm15, %v3282_v62 }
 0x240   : > { %3442 = vst.msk [vmem:[%s7460_s29 + $0x60] sm:$0xf] %vm3417_vm3, %v5905_v61  ;;  %3445 = vst.msk [vmem:[%s7460_s29 + $0x6c] sm:$0xf] %vm3417_vm3, %v5908_v63 }
 0x241   : > { %4122 = vrot.lane.b32.xlu0 %v7513_v11, %s6433_s25  ;;  %3443 = vst.msk [vmem:[%s7460_s29 + $0x64] sm:$0xf] %vm3417_vm3, %v5906_v0 }
 0x242   : > { %3933 = vrot.lane.b32.xlu1 %v7559_v48, %s6435_s21 }
 0x243   : > { %v3887_v5 = vld [vmem:[#allocation3 + $0x150] sm:$0xff] }
 0x244   : > { %v3885_v9 = vld [vmem:[#allocation3 + $0x138] sm:$0xff] }
 0x245   : > { %4265 = vrot.lane.b32.xlu0 %v7817_v2, %s6434_s26  ;;  %v3629_v13 = vld [vmem:[#allocation3 + $0x139] sm:$0xff]  ;;  %v3631_v14 = vld [vmem:[#allocation3 + $0x151] sm:$0xff] }
 0x246   : > { %3677 = vrot.lane.b32.xlu1 %v3640_v4, %s6433_s25  ;;  %v4463_v11 = vld [vmem:[#allocation3 + $0x152] sm:$0xff]  ;;  %v4464_v18 = vld [vmem:[#allocation3 + $0x15a] sm:$0xff]  ;;  %v4462_v23 = vld [vmem:[#allocation3 + $0x142] sm:$0xff] }
 0x247   : > { %v3888_v21 = vld [vmem:[#allocation3 + $0x158] sm:$0xff]  ;;  %v3886_v22 = vld [vmem:[#allocation3 + $0x140] sm:$0xff]  ;;  %v7822_v10 = vpack.c.bf16 %v4464_v18, %v4463_v11 }
 0x248   : > { %v4461_v57 = vld [vmem:[#allocation3 + $0x13a] sm:$0xff]  ;;  %v7824_v38 = vpack.c.bf16 %v3888_v21, %v3887_v5  ;;  %v7826_v29 = vpack.c.bf16 %v3886_v22, %v3885_v9  ;;  %v4503_v22 = vld [vmem:[#allocation4] sm:$0xff] }
 0x249   : > { %v7828_v20 = vpack.c.bf16 %v4462_v23, %v4461_v57  ;;  %v3630_v37 = vld [vmem:[#allocation3 + $0x141] sm:$0xff]  ;;  %v3632_v34 = vld [vmem:[#allocation3 + $0x159] sm:$0xff]  ;;  %4255 = vrot.lane.b32.xlu0 %v7553_v42, %s6434_s26  ;;  %4499 = vst.msk [vmem:[#allocation4 + $0x130] sm:$0xff] %vm3450_vm15, %v7822_v10  ;;  %v3620_v42 = vld [vmem:[#allocation3 + $0xc9] sm:$0xff] }
 0x24a   : > { %v7832_v45 = vpack.c.bf16 %v3630_v37, %v3629_v13  ;;  %v7836_v8 = vpack.c.bf16 %v3632_v34, %v3631_v14  ;;  %3601 = vst.msk [vmem:[#allocation4 + $0x150] sm:$0xff] %vm3450_vm15, %v7824_v38  ;;  %3806 = vrot.lane.b32.xlu1 %v7555_v44, %s6434_s26  ;;  %3600 = vst.msk [vmem:[#allocation4 + $0x138] sm:$0xff] %vm3450_vm15, %v7826_v29  ;;  %v3643_v47 = vpack.c.bf16 %v3620_v42, %v3619_v46 }
 0x24b   : > { %4498 = vst.msk [vmem:[#allocation4 + $0x118] sm:$0xff] %vm3450_vm15, %v7828_v20 }
 0x24c   : > { %4050 = vst.msk [vmem:[#allocation4 + $0x128] sm:$0xff] %vm3450_vm15, %v7832_v45  ;;  %4051 = vst.msk [vmem:[#allocation4 + $0x140] sm:$0xff] %vm3450_vm15, %v7836_v8 }
 0x24d   : > { %4383 = vrot.lane.b32.xlu0 %v7787_v50, %s6435_s21 }
 0x24e   : > { %3939 = vrot.lane.b32.xlu1 %v7589_v25, %s6435_s21 }
 0x250   : > { %v4541_v49 = vld [vmem:[#allocation4 + $0x130] sm:$0xff] }
 0x251   : > { %4128 = vrot.lane.b32.xlu0 %v7551_v41, %s6433_s25 }
 0x252   : > { %v4538_v12 = vld [vmem:[#allocation4 + $0x118] sm:$0xff]  ;;  %3683 = vrot.lane.b32.xlu1 %v3643_v47, %s6433_s25 }
 0x253   : > { %6141 = vmatmul.mubr.msk.bf16.gmra.mrb[36].mxu0 %vm3450_vm15, %v4538_v12  ;;  %v6114_v50 = vpop.f32.mrb[12].mxu1 }
 0x254   : > { %6144 = vmatprep.mubr.msk.bf16.mxu0 %vm3450_vm15, %v4541_v49  ;;  %v3251_v31 = vadd.f32 %v6114_v50, %v7448_v6  ;;  %v3242_v51 = vpop.f32.mrb[13].mxu1 }
 0x255   : > { %4253 = vrot.lane.b32.xlu0 %v7559_v48, %s6434_s26  ;;  %v3243_v7 = vadd.f32 %v7448_v6, %v3242_v51  ;;  %v6115_v41 = vpop.f32.mrb[14].mxu1  ;;  %v4469_v51 = vld [vmem:[#allocation3 + $0x19a] sm:$0xff] }
 0x256   : > { %3812 = vrot.lane.b32.xlu1 %v7587_v24, %s6434_s26  ;;  %v3287_v52 = vmax.f32 %v3251_v31, 0.0  ;;  %v3254_v54 = vadd.f32 %v6115_v41, %v7448_v6  ;;  %v3245_v55 = vpop.f32.mrb[15].mxu1 }
 0x257   : > { %v3285_v48 = vmax.f32 %v3243_v7, 0.0  ;;  %v3246_v56 = vadd.f32 %v7448_v6, %v3245_v55  ;;  %v4470_v7 = vld [vmem:[#allocation3 + $0x1a2] sm:$0xff] }
 0x258   : > { %v5911_v59 = vpack.c.bf16 %v3287_v52, %v3287_v52  ;;  %3537 = vst.msk [vmem:[#allocation3 + $0x181] sm:$0xff] %vm3450_vm15, %v3287_v52  ;;  %v3288_v60 = vmax.f32 %v3254_v54, 0.0  ;;  %v4486_v41 = vpack.c.bf16 %v4470_v7, %v4469_v51 }
 0x259   : > { %4381 = vrot.lane.b32.xlu0 %v3640_v4, %s6435_s21  ;;  %v5909_v16 = vpack.c.bf16 %v3285_v48, %v3285_v48  ;;  %3535 = vst.msk [vmem:[#allocation3 + $0x169] sm:$0xff] %vm3450_vm15, %v3285_v48  ;;  %v3286_v53 = vmax.f32 %v3246_v56, 0.0  ;;  %v4213_v56 = vld [vmem:[#allocation3 + $0x198] sm:$0xff] }
 0x25a   : > { %3943 = vrot.lane.b32.xlu1 %v7656_v15, %s6435_s21  ;;  %3448 = vst.msk [vmem:[%s7460_s29 + $0x78] sm:$0xf] %vm3417_vm3, %v5911_v59  ;;  %v5912_v61 = vpack.c.bf16 %v3288_v60, %v3288_v60  ;;  %v4214_v59 = vld [vmem:[#allocation3 + $0x1a0] sm:$0xff] }
 0x25b   : > { %3538 = vst.msk [vmem:[#allocation3 + $0x189] sm:$0xff] %vm3450_vm15, %v3288_v60  ;;  %v5910_v6 = vpack.c.bf16 %v3286_v53, %v3286_v53  ;;  %3536 = vst.msk [vmem:[#allocation3 + $0x171] sm:$0xff] %vm3450_vm15, %v3286_v53 }
 0x25c   : > { %3446 = vst.msk [vmem:[%s7460_s29 + $0x70] sm:$0xf] %vm3417_vm3, %v5909_v16  ;;  %3449 = vst.msk [vmem:[%s7460_s29 + $0x7c] sm:$0xf] %vm3417_vm3, %v5912_v61 }
 0x25d   : > { %4126 = vrot.lane.b32.xlu0 %v7555_v44, %s6433_s25  ;;  %3447 = vst.msk [vmem:[%s7460_s29 + $0x74] sm:$0xf] %vm3417_vm3, %v5910_v6 }
 0x25e   : > { %3687 = vrot.lane.b32.xlu1 %v7658_v19, %s6433_s25  ;;  %4502 = vst.msk [vmem:[#allocation4 + $0x178] sm:$0xff] %vm3450_vm15, %v4486_v41 }
 0x25f   : > { %v4339_v44 = vld [vmem:[#allocation3 + $0x181] sm:$0xff] }
 0x260   : > { %v3889_v15 = vld [vmem:[#allocation3 + $0x168] sm:$0xff]  ;;  %v4211_v34 = vld [vmem:[#allocation3 + $0x180] sm:$0xff] }
 0x261   : > { %4259 = vrot.lane.b32.xlu0 %v7589_v25, %s6434_s26  ;;  %v3633_v62 = vld [vmem:[#allocation3 + $0x169] sm:$0xff] }
 0x262   : > { %3937 = vrot.lane.b32.xlu1 %v7595_v30, %s6435_s21  ;;  %v4340_v63 = vld [vmem:[#allocation3 + $0x189] sm:$0xff]  ;;  %v3634_v17 = vld [vmem:[#allocation3 + $0x171] sm:$0xff] }
 0x263   : > { %v4467_v19 = vld [vmem:[#allocation3 + $0x182] sm:$0xff]  ;;  %v3890_v58 = vld [vmem:[#allocation3 + $0x170] sm:$0xff]  ;;  %v7891_v1 = vpack.c.bf16 %v4340_v63, %v4339_v44  ;;  %v7897_v25 = vpack.c.bf16 %v3634_v17, %v3633_v62  ;;  %v4341_v62 = vld [vmem:[#allocation3 + $0x199] sm:$0xff] }
 0x264   : > { %v4465_v0 = vld [vmem:[#allocation3 + $0x16a] sm:$0xff]  ;;  %v7895_v3 = vpack.c.bf16 %v3890_v58, %v3889_v15  ;;  %v4466_v4 = vld [vmem:[#allocation3 + $0x172] sm:$0xff]  ;;  %v4230_v15 = vpack.c.bf16 %v4214_v59, %v4213_v56  ;;  %v4342_v63 = vld [vmem:[#allocation3 + $0x1a1] sm:$0xff] }
 0x265   : > { %4387 = vrot.lane.b32.xlu0 %v3643_v47, %s6435_s21  ;;  %v4468_v5 = vld [vmem:[#allocation3 + $0x18a] sm:$0xff]  ;;  %v7899_v9 = vpack.c.bf16 %v4466_v4, %v4465_v0  ;;  %4053 = vst.msk [vmem:[#allocation4 + $0x170] sm:$0xff] %vm3450_vm15, %v7891_v1  ;;  %4052 = vst.msk [vmem:[#allocation4 + $0x158] sm:$0xff] %vm3450_vm15, %v7897_v25 }
 0x266   : > { %3681 = vrot.lane.b32.xlu1 %v7597_v32, %s6433_s25  ;;  %v7901_v13 = vpack.c.bf16 %v4468_v5, %v4467_v19  ;;  %3602 = vst.msk [vmem:[#allocation4 + $0x168] sm:$0xff] %vm3450_vm15, %v7895_v3  ;;  %v4506_v44 = vld [vmem:[#allocation4 + $0x18] sm:$0xff] }
 0x267   : > { %4500 = vst.msk [vmem:[#allocation4 + $0x148] sm:$0xff] %vm3450_vm15, %v7899_v9  ;;  %v4550_v58 = vld [vmem:[#allocation4 + $0x178] sm:$0xff] }
 0x268   : > { %4501 = vst.msk [vmem:[#allocation4 + $0x160] sm:$0xff] %vm3450_vm15, %v7901_v13 }
 0x269   : > { %4132 = vrot.lane.b32.xlu0 %v7587_v24, %s6433_s25 }
 0x26a   : > { %3810 = vrot.lane.b32.xlu1 %v7591_v27, %s6434_s26 }
 0x26d   : > { %4257 = vrot.lane.b32.xlu0 %v7595_v30, %s6434_s26 }
 0x26e   : > { %3816 = vrot.lane.b32.xlu1 %v7662_v26, %s6434_s26  ;;  %v4544_v14 = vld [vmem:[#allocation4 + $0x148] sm:$0xff] }
 0x26f   : > { %v4547_v11 = vld [vmem:[#allocation4 + $0x160] sm:$0xff]  ;;  %6145 = vmatmul.mubr.msk.bf16.gmra.mrb[40].mxu0 %vm3450_vm15, %v4544_v14 }
 0x270   : > { %6148 = vmatprep.mubr.msk.bf16.mxu0 %vm3450_vm15, %v4547_v11 }
 0x271   : > { %4385 = vrot.lane.b32.xlu0 %v7597_v32, %s6435_s21 }
 0x272   : > { %3945 = vrot.lane.b32.xlu1 %v7817_v2, %s6435_s21 }
 0x275   : > { %4130 = vrot.lane.b32.xlu0 %v7591_v27, %s6433_s25 }
 0x276   : > { %3689 = vrot.lane.b32.xlu1 %v7762_v39, %s6433_s25 }
 0x277   : > { %6149 = vmatmul.mubr.msk.bf16.gmra.mrb[44].mxu0 %vm3450_vm15, %v4550_v58 }
 0x279   : > { %4393 = vrot.lane.b32.xlu0 %v7762_v39, %s6435_s21 }
 0x27a   : > { %3818 = vrot.lane.b32.xlu1 %v7756_v28, %s6434_s26 }
 0x27d   : > { %4138 = vrot.lane.b32.xlu0 %v7756_v28, %s6433_s25 }
 0x27e   : > { %3947 = vrot.lane.b32.xlu1 %v7754_v36, %s6435_s21 }
 0x281   : > { %4267 = vrot.lane.b32.xlu0 %v7754_v36, %s6434_s26 }
 0x282   : > { %3691 = vrot.lane.b32.xlu1 %v7764_v40, %s6433_s25 }
 0x283   : > { %v4264_v24 = vpop.permute.xlu0 %4263  ;;  %v7943_v27 = vpop.permute.xlu1 %3941 }
 0x285   : > { %4395 = vrot.lane.b32.xlu0 %v7764_v40, %s6435_s21 }
 0x286   : > { %3820 = vrot.lane.b32.xlu1 %v7752_v35, %s6434_s26 }
 0x287   : > { %v4392_v30 = vpop.permute.xlu0 %4391  ;;  %v3686_v32 = vpop.permute.xlu1 %3685 }
 0x288   : > { %3725 = vst.msk [vmem:[#allocation4 + $0xd8] sm:$0xff] %vm3715_vm1, %v3686_v32 }
 0x289   : > { %4140 = vrot.lane.b32.xlu0 %v7752_v35, %s6433_s25 }
 0x28a   : > { %3949 = vrot.lane.b32.xlu1 %v7826_v29, %s6435_s21 }
 0x28b   : > { %v4137_v26 = vpop.permute.xlu0 %4136  ;;  %v3815_v36 = vpop.permute.xlu1 %3814 }
 0x28c   : > { %4175 = vst.msk [vmem:[#allocation4 + $0xe0] sm:$0xff] %vm3715_vm1, %v4137_v26 }
 0x28d   : > { %3854 = vst.msk [vmem:[#allocation4 + $0xd8] sm:$0xff] %vm3844_vm2, %v3815_v36  ;;  %4269 = vrot.lane.b32.xlu0 %v7826_v29, %s6434_s26 }
 0x28e   : > { %3693 = vrot.lane.b32.xlu1 %v7832_v45, %s6433_s25 }
 0x28f   : > { %v4119_v28 = vpop.permute.xlu0 %4118 }
 0x290   : > { %4166 = vst.msk [vmem:[#allocation4 + $0x8] sm:$0xff] %vm3715_vm1, %v4119_v28  ;;  %v3932_v39 = vpop.permute.xlu1 %3931 }
 0x291   : > { %4295 = vst.msk [vmem:[#allocation4 + $0x8] sm:$0xff] %vm3844_vm2, %v7669_v33  ;;  %4397 = vrot.lane.b32.xlu0 %v7832_v45, %s6435_s21  ;;  %v4212_v45 = vld [vmem:[#allocation3 + $0x188] sm:$0xff] }
 0x292   : > { %4423 = vst.msk [vmem:[#allocation4 + $0x8] sm:$0xff] %vm3973_vm4, %v7697_v43  ;;  %3822 = vrot.lane.b32.xlu1 %v7828_v20, %s6434_s26  ;;  %v4229_v46 = vpack.c.bf16 %v4212_v45, %v4211_v34 }
 0x293   : > { %v7969_v35 = vpop.permute.xlu0 %4261 }
 0x294   : > { %v3676_v40 = vpop.permute.xlu1 %3675 }
 0x295   : > { %3720 = vst.msk [vmem:[#allocation4 + $0x60] sm:$0xff] %vm3715_vm1, %v3676_v40  ;;  %4142 = vrot.lane.b32.xlu0 %v7828_v20, %s6433_s25 }
 0x296   : > { %3951 = vrot.lane.b32.xlu1 %v7824_v38, %s6435_s21 }
 0x297   : > { %v7976_v33 = vpop.permute.xlu0 %4389 }
 0x298   : > { %v3805_v2 = vpop.permute.xlu1 %3804 }
 0x299   : > { %3849 = vst.msk [vmem:[#allocation4 + $0x60] sm:$0xff] %vm3844_vm2, %v3805_v2  ;;  %4271 = vrot.lane.b32.xlu0 %v7824_v38, %s6434_s26  ;;  %v4504_v18 = vld [vmem:[#allocation4 + $0x8] sm:$0xff] }
 0x29a   : > { %v7979_v43 = vpop.f32.mrb[16].mxu0  ;;  %4782 = vmatprep.mubr.bf16.mxu1 %v4504_v18  ;;  %3695 = vrot.lane.b32.xlu1 %v7836_v8, %s6433_s25 }
 0x29b   : > { %v7983_v21 = vpop.f32.mrb[17].mxu0  ;;  %v4135_v23 = vpop.permute.xlu0 %4134  ;;  %4783 = vmatmul.mubr.bf16.vlgmr.msra.gmra.mrb[16].mxu1 %v4503_v22 }
 0x29c   : > { %v7987_v57 = vpop.f32.mrb[18].mxu0  ;;  %4174 = vst.msk [vmem:[#allocation4 + $0xc8] sm:$0xff] %vm3715_vm1, %v4135_v23  ;;  %v3930_v20 = vpop.permute.xlu1 %3929 }
 0x29d   : > { %v7990_v29 = vpop.f32.mrb[19].mxu0  ;;  %4303 = vst.msk [vmem:[#allocation4 + $0xc8] sm:$0xff] %vm3844_vm2, %v4264_v24  ;;  %4399 = vrot.lane.b32.xlu0 %v7836_v8, %s6435_s21 }
 0x29e   : > { %3976 = vst.msk [vmem:[#allocation4 + $0x30] sm:$0xff] %vm3973_vm4, %v3930_v20  ;;  %4431 = vst.msk [vmem:[#allocation4 + $0xc8] sm:$0xff] %vm3973_vm4, %v4392_v30  ;;  %3824 = vrot.lane.b32.xlu1 %v7822_v10, %s6434_s26 }
 0x29f   : > { %v4252_v38 = vpop.permute.xlu0 %4251 }
 0x2a0   : > { %v3674_v37 = vpop.permute.xlu1 %3673 }
 0x2a1   : > { %3719 = vst.msk [vmem:[#allocation4 + $0x48] sm:$0xff] %vm3715_vm1, %v3674_v37  ;;  %4144 = vrot.lane.b32.xlu0 %v7822_v10, %s6433_s25 }
 0x2a2   : > { %3953 = vrot.lane.b32.xlu1 %v7895_v3, %s6435_s21 }
 0x2a3   : > { %v4380_v42 = vpop.permute.xlu0 %4379 }
 0x2a4   : > { %v3803_v8 = vpop.permute.xlu1 %3802 }
 0x2a5   : > { %3848 = vst.msk [vmem:[#allocation4 + $0x48] sm:$0xff] %vm3844_vm2, %v3803_v8  ;;  %4275 = vrot.lane.b32.xlu0 %v4229_v46, %s6434_s26  ;;  %v4509_v4 = vld [vmem:[#allocation4 + $0x30] sm:$0xff] }
 0x2a6   : > { %3977 = vst.msk [vmem:[#allocation4 + $0x48] sm:$0xff] %vm3973_vm4, %v3932_v39  ;;  %3697 = vrot.lane.b32.xlu1 %v7897_v25, %s6433_s25 }
 0x2a7   : > { %v4125_v47 = vpop.permute.xlu0 %4124 }
 0x2a8   : > { %4169 = vst.msk [vmem:[#allocation4 + $0x50] sm:$0xff] %vm3715_vm1, %v4125_v47  ;;  %v3936_v49 = vpop.permute.xlu1 %3935 }
 0x2a9   : > { %4403 = vrot.lane.b32.xlu0 %v7891_v1, %s6435_s21  ;;  %v4358_v1 = vpack.c.bf16 %v4342_v63, %v4341_v62 }
 0x2aa   : > { %3826 = vrot.lane.b32.xlu1 %v7899_v9, %s6434_s26 }
 0x2ab   : > { %v4250_v10 = vpop.permute.xlu0 %4249 }
 0x2ac   : > { %4296 = vst.msk [vmem:[#allocation4 + $0x20] sm:$0xff] %vm3844_vm2, %v4250_v10  ;;  %v3680_v12 = vpop.permute.xlu1 %3679 }
 0x2ad   : > { %3722 = vst.msk [vmem:[#allocation4 + $0x90] sm:$0xff] %vm3715_vm1, %v3680_v12  ;;  %4273 = vrot.lane.b32.xlu0 %v7895_v3, %s6434_s26  ;;  %v4512_v18 = vld [vmem:[#allocation4 + $0x48] sm:$0xff] }
 0x2ae   : > { %3955 = vrot.lane.b32.xlu1 %v4229_v46, %s6435_s21 }
 0x2af   : > { %v4378_v50 = vpop.permute.xlu0 %4377 }
 0x2b0   : > { %4424 = vst.msk [vmem:[#allocation4 + $0x20] sm:$0xff] %vm3973_vm4, %v4378_v50  ;;  %v3809_v31 = vpop.permute.xlu1 %3808 }
 0x2b1   : > { %3851 = vst.msk [vmem:[#allocation4 + $0x90] sm:$0xff] %vm3844_vm2, %v3809_v31  ;;  %4401 = vrot.lane.b32.xlu0 %v7897_v25, %s6435_s21 }
 0x2b3   : > { %v4123_v52 = vpop.permute.xlu0 %4122 }
 0x2b4   : > { %4168 = vst.msk [vmem:[#allocation4 + $0x38] sm:$0xff] %vm3715_vm1, %v4123_v52  ;;  %v3934_v54 = vpop.permute.xlu1 %3933 }
 0x2b5   : > { %4297 = vst.msk [vmem:[#allocation4 + $0x38] sm:$0xff] %vm3844_vm2, %v4252_v38  ;;  %4146 = vrot.lane.b32.xlu0 %v7899_v9, %s6433_s25 }
 0x2b6   : > { %3978 = vst.msk [vmem:[#allocation4 + $0x60] sm:$0xff] %vm3973_vm4, %v3934_v54  ;;  %v8027_v55 = vpop.f32.mrb[20].mxu0  ;;  %4425 = vst.msk [vmem:[#allocation4 + $0x38] sm:$0xff] %vm3973_vm4, %v4380_v42 }
 0x2b7   : > { %v8032_v48 = vpop.f32.mrb[21].mxu0  ;;  %v4266_v16 = vpop.permute.xlu0 %4265  ;;  %v4507_v53 = vld [vmem:[#allocation4 + $0x20] sm:$0xff] }
 0x2b8   : > { %v8034_v60 = vpop.f32.mrb[22].mxu0  ;;  %4304 = vst.msk [vmem:[#allocation4 + $0xe0] sm:$0xff] %vm3844_vm2, %v4266_v16  ;;  %4790 = vmatprep.mubr.bf16.mxu1 %v4507_v53  ;;  %v3678_v6 = vpop.permute.xlu1 %3677 }
 0x2b9   : > { %v8037_v61 = vpop.f32.mrb[23].mxu0  ;;  %3721 = vst.msk [vmem:[#allocation4 + $0x78] sm:$0xff] %vm3715_vm1, %v3678_v6  ;;  %4148 = vrot.lane.b32.xlu0 %v7901_v13, %s6433_s25  ;;  %4791 = vmatmul.mubr.bf16.gmra.mrb[20].mxu1 %v4506_v44  ;;  %s5406_s25 = sshll.u32 %s8258_s27, 4  ;;  %s8325_s25 = int_to_ptr.vmem [resolvable:$true] %s5406_s25 }
 0x2ba   : > { %s6362_s14 = scalar_lea.vmem %s8325_s25, 4096  ;;  %p6369_p0 = scmp.lt.s32.totalorder %s8325_s25, %s6367_s22 }
 0x2bb   : > { %v4256_v19 = vpop.permute.xlu0 %4255  ;;  %p6363_p11 = scmp.ne.s32.totalorder %s8325_s25, %s6362_s14  ;;  %p6370_p1 = scmp.lt.s32.totalorder %s6368_s23, %s6362_s14 }
 0x2bc   : > { %v3807_v17 = vpop.permute.xlu1 %3806 }
 0x2bd   : > { %3850 = vst.msk [vmem:[#allocation4 + $0x78] sm:$0xff] %vm3844_vm2, %v3807_v17  ;;  %4277 = vrot.lane.b32.xlu0 %v4230_v15, %s6434_s26  ;;  %v4510_v0 = vld [vmem:[#allocation4 + $0x38] sm:$0xff]  ;;  %v4515_v34 = vld [vmem:[#allocation4 + $0x60] sm:$0xff]  ;;  %p6364_p12 = pnand %p6363_p11, %p6527_p5  ;;  %p6371_p2 = por %p6370_p1, %p6369_p0 }
 0x2be   : > { %3979 = vst.msk [vmem:[#allocation4 + $0x78] sm:$0xff] %vm3973_vm4, %v3936_v49  ;;  %4798 = vmatprep.mubr.bf16.mxu1 %v4510_v0 }
 0x2bf   : > { %v4384_v3 = vpop.permute.xlu0 %4383  ;;  %p6365_p13 = pneg %p6364_p12 }
 0x2c0   : > { %v3940_v25 = vpop.permute.xlu1 %3939 }
 0x2c1   : > { %4405 = vrot.lane.b32.xlu0 %v4358_v1, %s6435_s21  ;;  %4799 = vmatmul.mubr.bf16.gmra.mrb[24].mxu1 %v4509_v4  ;;  %s8323_s21 = scalar_lea.hbm %s8383_s9, %s5913_s28  ;;  %p6372_p3 = pnand %p6371_p2, %p6365_p13 }
 0x2c3   : > { %v4129_v5 = vpop.permute.xlu0 %4128 }
 0x2c4   : > { %4171 = vst.msk [vmem:[#allocation4 + $0x80] sm:$0xff] %vm3715_vm1, %v4129_v5  ;;  %v3684_v9 = vpop.permute.xlu1 %3683 }
 0x2c5   : > { %3724 = vst.msk [vmem:[#allocation4 + $0xc0] sm:$0xff] %vm3715_vm1, %v3684_v9  ;;  %v4518_v12 = vld [vmem:[#allocation4 + $0x78] sm:$0xff] }
 0x2c7   : > { %v4254_v13 = vpop.permute.xlu0 %4253 }
 0x2c8   : > { %4298 = vst.msk [vmem:[#allocation4 + $0x50] sm:$0xff] %vm3844_vm2, %v4254_v13  ;;  %v3813_v14 = vpop.permute.xlu1 %3812 }
 0x2c9   : > { %3853 = vst.msk [vmem:[#allocation4 + $0xc0] sm:$0xff] %vm3844_vm2, %v3813_v14 }
 0x2ca   : > { %3982 = vst.msk [vmem:[#allocation4 + $0xc0] sm:$0xff] %vm3973_vm4, %v7943_v27 }
 0x2cb   : > { %v4382_v11 = vpop.permute.xlu0 %4381 }
 0x2cc   : > { %4426 = vst.msk [vmem:[#allocation4 + $0x50] sm:$0xff] %vm3973_vm4, %v4382_v11  ;;  %v3944_v24 = vpop.permute.xlu1 %3943 }
 0x2cd   : > { %3983 = vst.msk [vmem:[#allocation4 + $0xd8] sm:$0xff] %vm3973_vm4, %v3944_v24 }
 0x2cf   : > { %v4127_v30 = vpop.permute.xlu0 %4126 }
 0x2d0   : > { %4170 = vst.msk [vmem:[#allocation4 + $0x68] sm:$0xff] %vm3715_vm1, %v4127_v30  ;;  %v3688_v32 = vpop.permute.xlu1 %3687 }
 0x2d1   : > { %4299 = vst.msk [vmem:[#allocation4 + $0x68] sm:$0xff] %vm3844_vm2, %v4256_v19  ;;  %v4528_v19 = vld [vmem:[#allocation4 + $0xc8] sm:$0xff] }
 0x2d2   : > { %3726 = vst.msk [vmem:[#allocation4 + $0xf0] sm:$0xff] %vm3715_vm1, %v3688_v32  ;;  %v8058_v26 = vpop.f32.mrb[24].mxu0 }
 0x2d3   : > { %4427 = vst.msk [vmem:[#allocation4 + $0x68] sm:$0xff] %vm3973_vm4, %v4384_v3  ;;  %v8061_v36 = vpop.f32.mrb[25].mxu0  ;;  %v4260_v28 = vpop.permute.xlu0 %4259  ;;  %v4513_v39 = vld [vmem:[#allocation4 + $0x50] sm:$0xff]  ;;  %v4527_v3 = vld [vmem:[#allocation4 + $0xc0] sm:$0xff] }
 0x2d4   : > { %v8063_v27 = vpop.f32.mrb[26].mxu0  ;;  %v3938_v2 = vpop.permute.xlu1 %3937  ;;  %4806 = vmatprep.mubr.bf16.mxu1 %v4513_v39  ;;  %v4530_v30 = vld [vmem:[#allocation4 + $0xd8] sm:$0xff] }
 0x2d5   : > { %v8065_v40 = vpop.f32.mrb[27].mxu0  ;;  %3980 = vst.msk [vmem:[#allocation4 + $0x90] sm:$0xff] %vm3973_vm4, %v3938_v2  ;;  %4807 = vmatmul.mubr.bf16.gmra.mrb[28].mxu1 %v4512_v18 }
 0x2d7   : > { %v4388_v22 = vpop.permute.xlu0 %4387 }
 0x2d8   : > { %v3682_v23 = vpop.permute.xlu1 %3681 }
 0x2d9   : > { %3723 = vst.msk [vmem:[#allocation4 + $0xa8] sm:$0xff] %vm3715_vm1, %v3682_v23 }
 0x2da   : > { %v4516_v20 = vld [vmem:[#allocation4 + $0x68] sm:$0xff] }
 0x2db   : > { %4814 = vmatprep.mubr.bf16.mxu1 %v4516_v20  ;;  %v4133_v38 = vpop.permute.xlu0 %4132 }
 0x2dc   : > { %4173 = vst.msk [vmem:[#allocation4 + $0xb0] sm:$0xff] %vm3715_vm1, %v4133_v38  ;;  %v3811_v37 = vpop.permute.xlu1 %3810  ;;  %v4521_v16 = vld [vmem:[#allocation4 + $0x90] sm:$0xff] }
 0x2dd   : > { %4302 = vst.msk [vmem:[#allocation4 + $0xb0] sm:$0xff] %vm3844_vm2, %v7969_v35  ;;  %3852 = vst.msk [vmem:[#allocation4 + $0xa8] sm:$0xff] %vm3844_vm2, %v3811_v37  ;;  %4815 = vmatmul.mubr.bf16.gmra.mrb[32].mxu1 %v4515_v34  ;;  %v6361_v34 = vld [vmem:[%s8380_s6 + $0x8] sm:$0xff]  }
 0x2de   : > { %4430 = vst.msk [vmem:[#allocation4 + $0xb0] sm:$0xff] %vm3973_vm4, %v7976_v33  ;;  %3981 = vst.msk [vmem:[#allocation4 + $0xa8] sm:$0xff] %vm3973_vm4, %v3940_v25 }
 0x2df   : > { %v4258_v45 = vpop.permute.xlu0 %4257 }
 0x2e0   : > { %4300 = vst.msk [vmem:[#allocation4 + $0x80] sm:$0xff] %vm3844_vm2, %v4258_v45  ;;  %v3817_v42 = vpop.permute.xlu1 %3816 }
 0x2e1   : > { %3855 = vst.msk [vmem:[#allocation4 + $0xf0] sm:$0xff] %vm3844_vm2, %v3817_v42 }
 0x2e3   : > { %v4386_v46 = vpop.permute.xlu0 %4385 }
 0x2e4   : > { %4428 = vst.msk [vmem:[#allocation4 + $0x80] sm:$0xff] %vm3973_vm4, %v4386_v46  ;;  %v3946_v8 = vpop.permute.xlu1 %3945 }
 0x2e5   : > { %3984 = vst.msk [vmem:[#allocation4 + $0xf0] sm:$0xff] %vm3973_vm4, %v3946_v8  ;;  %v4525_v53 = vld [vmem:[#allocation4 + $0xb0] sm:$0xff]  ;;  %v4524_v63 = vld [vmem:[#allocation4 + $0xa8] sm:$0xff] }
 0x2e7   : > { %v4131_v35 = vpop.permute.xlu0 %4130 }
 0x2e8   : > { %4172 = vst.msk [vmem:[#allocation4 + $0x98] sm:$0xff] %vm3715_vm1, %v4131_v35  ;;  %v3690_v47 = vpop.permute.xlu1 %3689 }
 0x2e9   : > { %4301 = vst.msk [vmem:[#allocation4 + $0x98] sm:$0xff] %vm3844_vm2, %v4260_v28 }
 0x2ea   : > { %3727 = vst.msk [vmem:[#allocation4 + $0x108] sm:$0xff] %vm3715_vm1, %v3690_v47 }
 0x2eb   : > { %4429 = vst.msk [vmem:[#allocation4 + $0x98] sm:$0xff] %vm3973_vm4, %v4388_v22  ;;  %v4394_v33 = vpop.permute.xlu0 %4393  ;;  %v4519_v49 = vld [vmem:[#allocation4 + $0x80] sm:$0xff]  ;;  %v6360_v22 = vld [vmem:[%s8380_s6] sm:$0xff]  }
 0x2ec   : > { %4432 = vst.msk [vmem:[#allocation4 + $0xe0] sm:$0xff] %vm3973_vm4, %v4394_v33  ;;  %v3819_v10 = vpop.permute.xlu1 %3818  ;;  %4822 = vmatprep.mubr.bf16.mxu1 %v4519_v49  ;;  %v4533_v20 = vld [vmem:[#allocation4 + $0xf0] sm:$0xff]  ;;  %6152 = vmatprep.subr.bf16.mxu0 %v6360_v22 }
 0x2ed   : > { %3856 = vst.msk [vmem:[#allocation4 + $0x108] sm:$0xff] %vm3844_vm2, %v3819_v10  ;;  %4823 = vmatmul.mubr.bf16.gmra.mrb[36].mxu1 %v4518_v12  ;;  %6153 = vmatpush3.bf16.msra.mxu0 %v6360_v22 }
 0x2ee   : > { %6154 = vmatprep.subr.bf16.mxu0 %v6361_v34 }
 0x2ef   : > { %v8086_v50 = vpop.f32.mrb[28].mxu0  ;;  %v4139_v51 = vpop.permute.xlu0 %4138 }
 0x2f0   : > { %v8088_v31 = vpop.f32.mrb[29].mxu0  ;;  %4176 = vst.msk [vmem:[#allocation4 + $0xf8] sm:$0xff] %vm3715_vm1, %v4139_v51  ;;  %v3948_v41 = vpop.permute.xlu1 %3947 }
 0x2f1   : > { %v8090_v7 = vpop.f32.mrb[30].mxu0  ;;  %3985 = vst.msk [vmem:[#allocation4 + $0x108] sm:$0xff] %vm3973_vm4, %v3948_v41  ;;  %6155 = vmatpush3.bf16.msra.mxu0 %v6361_v34 }
 0x2f2   : > { %v8093_v52 = vpop.f32.mrb[31].mxu0  ;;  %v4522_v54 = vld [vmem:[#allocation4 + $0x98] sm:$0xff] }
 0x2f3   : > { %4830 = vmatprep.mubr.bf16.mxu1 %v4522_v54  ;;  %v4268_v56 = vpop.permute.xlu0 %4267  ;;  %v4531_v25 = vld [vmem:[#allocation4 + $0xe0] sm:$0xff] }
 0x2f4   : > { %4305 = vst.msk [vmem:[#allocation4 + $0xf8] sm:$0xff] %vm3844_vm2, %v4268_v56  ;;  %v3692_v59 = vpop.permute.xlu1 %3691 }
 0x2f5   : > { %3728 = vst.msk [vmem:[#allocation4 + $0x120] sm:$0xff] %vm3715_vm1, %v3692_v59  ;;  %4831 = vmatmul.mubr.bf16.gmra.mrb[40].mxu1 %v4521_v16 }
 0x2f6   : > { %4838 = vmatprep.mubr.bf16.mxu1 %v4525_v53 }
 0x2f7   : > { %v4396_v6 = vpop.permute.xlu0 %4395 }
 0x2f8   : > { %4433 = vst.msk [vmem:[#allocation4 + $0xf8] sm:$0xff] %vm3973_vm4, %v4396_v6  ;;  %v3821_v44 = vpop.permute.xlu1 %3820  ;;  %v4536_v8 = vld [vmem:[#allocation4 + $0x108] sm:$0xff] }
 0x2f9   : > { %3857 = vst.msk [vmem:[#allocation4 + $0x120] sm:$0xff] %vm3844_vm2, %v3821_v44 }
 0x2fb   : > { %v4141_v15 = vpop.permute.xlu0 %4140 }
 0x2fc   : > { %4177 = vst.msk [vmem:[#allocation4 + $0x110] sm:$0xff] %vm3715_vm1, %v4141_v15  ;;  %v3950_v62 = vpop.permute.xlu1 %3949 }
 0x2fd   : > { %3986 = vst.msk [vmem:[#allocation4 + $0x120] sm:$0xff] %vm3973_vm4, %v3950_v62  ;;  %4839 = vmatmul.mubr.bf16.gmra.mrb[44].mxu1 %v4524_v63 }
 0x2fe   : > { %4846 = vmatprep.mubr.bf16.mxu1 %v4528_v19 }
 0x2ff   : > { %v4270_v58 = vpop.permute.xlu0 %4269  ;;  %v4534_v28 = vld [vmem:[#allocation4 + $0xf8] sm:$0xff] }
 0x300   : > { %4306 = vst.msk [vmem:[#allocation4 + $0x110] sm:$0xff] %vm3844_vm2, %v4270_v58  ;;  %v3694_v17 = vpop.permute.xlu1 %3693 }
 0x301   : > { %3729 = vst.msk [vmem:[#allocation4 + $0x138] sm:$0xff] %vm3715_vm1, %v3694_v17 }
 0x303   : > { %v4398_v0 = vpop.permute.xlu0 %4397 }
 0x304   : > { %4434 = vst.msk [vmem:[#allocation4 + $0x110] sm:$0xff] %vm3973_vm4, %v4398_v0  ;;  %v3823_v1 = vpop.permute.xlu1 %3822  ;;  %v4539_v10 = vld [vmem:[#allocation4 + $0x120] sm:$0xff] }
 0x305   : > { %3858 = vst.msk [vmem:[#allocation4 + $0x138] sm:$0xff] %vm3844_vm2, %v3823_v1  ;;  %4847 = vmatmul.mubr.bf16.gmra.mrb[48].mxu1 %v4527_v3 }
 0x306   : > { %4854 = vmatprep.mubr.bf16.mxu1 %v4531_v25  ;;  %v8158_v25 = vld [vmem:[%s8379_s5] ss:$0 sm:$0xff] }
 0x307   : > { %v4143_v4 = vpop.permute.xlu0 %4142 }
 0x308   : > { %4178 = vst.msk [vmem:[#allocation4 + $0x128] sm:$0xff] %vm3715_vm1, %v4143_v4  ;;  %v3952_v5 = vpop.permute.xlu1 %3951 }
 0x309   : > { %3987 = vst.msk [vmem:[#allocation4 + $0x138] sm:$0xff] %vm3973_vm4, %v3952_v5 }
 0x30b   : > { %v8108_v9 = vpop.f32.mrb[32].mxu0  ;;  %v4272_v14 = vpop.permute.xlu0 %4271  ;;  %v4537_v38 = vld [vmem:[#allocation4 + $0x110] sm:$0xff] }
 0x30c   : > { %v8110_v13 = vpop.f32.mrb[33].mxu0  ;;  %4307 = vst.msk [vmem:[#allocation4 + $0x128] sm:$0xff] %vm3844_vm2, %v4272_v14  ;;  %v3696_v24 = vpop.permute.xlu1 %3695 }
 0x30d   : > { %v8112_v11 = vpop.f32.mrb[34].mxu0  ;;  %3730 = vst.msk [vmem:[#allocation4 + $0x150] sm:$0xff] %vm3715_vm1, %v3696_v24  ;;  %4855 = vmatmul.mubr.bf16.gmra.mrb[52].mxu1 %v4530_v30 }
 0x30e   : > { %v8115_v32 = vpop.f32.mrb[35].mxu0  ;;  %4862 = vmatprep.mubr.bf16.mxu1 %v4534_v28 }
 0x30f   : > { %v4400_v39 = vpop.permute.xlu0 %4399 }
 0x310   : > { %4435 = vst.msk [vmem:[#allocation4 + $0x128] sm:$0xff] %vm3973_vm4, %v4400_v39  ;;  %v3825_v2 = vpop.permute.xlu1 %3824  ;;  %v4542_v53 = vld [vmem:[#allocation4 + $0x138] sm:$0xff] }
 0x311   : > { %3859 = vst.msk [vmem:[#allocation4 + $0x150] sm:$0xff] %vm3844_vm2, %v3825_v2 }
 0x313   : > { %v4145_v18 = vpop.permute.xlu0 %4144 }
 0x314   : > { %4179 = vst.msk [vmem:[#allocation4 + $0x140] sm:$0xff] %vm3715_vm1, %v4145_v18  ;;  %v3954_v23 = vpop.permute.xlu1 %3953 }
 0x315   : > { %3988 = vst.msk [vmem:[#allocation4 + $0x150] sm:$0xff] %vm3973_vm4, %v3954_v23  ;;  %4863 = vmatmul.mubr.bf16.gmra.mrb[56].mxu1 %v4533_v20 }
 0x316   : > { %4870 = vmatprep.mubr.bf16.mxu1 %v4537_v38 }
 0x317   : > { %v4276_v37 = vpop.permute.xlu0 %4275  ;;  %v4540_v35 = vld [vmem:[#allocation4 + $0x128] sm:$0xff] }
 0x318   : > { %v3698_v45 = vpop.permute.xlu1 %3697 }
 0x319   : > { %3731 = vst.msk [vmem:[#allocation4 + $0x168] sm:$0xff] %vm3715_vm1, %v3698_v45 }
 0x31b   : > { %v4404_v42 = vpop.permute.xlu0 %4403 }
 0x31c   : > { %v3827_v46 = vpop.permute.xlu1 %3826  ;;  %v4545_v62 = vld [vmem:[#allocation4 + $0x150] sm:$0xff] }
 0x31d   : > { %3860 = vst.msk [vmem:[#allocation4 + $0x168] sm:$0xff] %vm3844_vm2, %v3827_v46  ;;  %4871 = vmatmul.mubr.bf16.gmra.mrb[60].mxu1 %v4536_v8 }
 0x31e   : > { %4878 = vmatprep.mubr.bf16.mxu1 %v4540_v35 }
 0x31f   : > { %v4274_v47 = vpop.permute.xlu0 %4273 }
 0x320   : > { %4308 = vst.msk [vmem:[#allocation4 + $0x140] sm:$0xff] %vm3844_vm2, %v4274_v47  ;;  %v3956_v33 = vpop.permute.xlu1 %3955 }
 0x321   : > { %3989 = vst.msk [vmem:[#allocation4 + $0x168] sm:$0xff] %vm3973_vm4, %v3956_v33 }
 0x323   : > { %v4402_v49 = vpop.permute.xlu0 %4401 }
 0x324   : > { %4436 = vst.msk [vmem:[#allocation4 + $0x140] sm:$0xff] %vm3973_vm4, %v4402_v49 }
 0x325   : > { %4879 = vmatmul.mubr.bf16.gmra.mrb[64].mxu1 %v4539_v10 }
 0x326   : > { %v8133_v12 = vpop.f32.mrb[36].mxu0 }
 0x327   : > { %v8135_v51 = vpop.f32.mrb[37].mxu0  ;;  %v4147_v41 = vpop.permute.xlu0 %4146 }
 0x328   : > { %v8137_v54 = vpop.f32.mrb[38].mxu0  ;;  %4180 = vst.msk [vmem:[#allocation4 + $0x158] sm:$0xff] %vm3715_vm1, %v4147_v41  ;;  %v4548_v19 = vld [vmem:[#allocation4 + $0x168] sm:$0xff] }
 0x329   : > { %v8140_v56 = vpop.f32.mrb[39].mxu0  ;;  %4309 = vst.msk [vmem:[#allocation4 + $0x158] sm:$0xff] %vm3844_vm2, %v4276_v37 }
 0x32a   : > { %4437 = vst.msk [vmem:[#allocation4 + $0x158] sm:$0xff] %vm3973_vm4, %v4404_v42 }
 0x32b   : > { %v4149_v59 = vpop.permute.xlu0 %4148  ;;  %v4543_v16 = vld [vmem:[#allocation4 + $0x140] sm:$0xff] }
 0x32c   : > { %4181 = vst.msk [vmem:[#allocation4 + $0x170] sm:$0xff] %vm3715_vm1, %v4149_v59  ;;  %4886 = vmatprep.mubr.bf16.mxu1 %v4543_v16 }
 0x32d   : > { %4887 = vmatmul.mubr.bf16.gmra.mrb[68].mxu1 %v4542_v53 }
 0x32f   : > { %v4278_v6 = vpop.permute.xlu0 %4277 }
 0x330   : > { %4310 = vst.msk [vmem:[#allocation4 + $0x170] sm:$0xff] %vm3844_vm2, %v4278_v6 }
 0x331   : > { %v4546_v44 = vld [vmem:[#allocation4 + $0x158] sm:$0xff] }
 0x332   : > { %4894 = vmatprep.mubr.bf16.mxu1 %v4546_v44 }
 0x333   : > { %v4406_v15 = vpop.permute.xlu0 %4405 }
 0x334   : > { %4438 = vst.msk [vmem:[#allocation4 + $0x170] sm:$0xff] %vm3973_vm4, %v4406_v15 }
 0x335   : > { %4895 = vmatmul.mubr.bf16.gmra.mrb[72].mxu1 %v4545_v62 }
 0x33b   : > { %v4549_v63 = vld [vmem:[#allocation4 + $0x170] sm:$0xff] }
 0x33c   : > { %4902 = vmatprep.mubr.bf16.mxu1 %v4549_v63 }
 0x33d   : > { %4903 = vmatmul.mubr.bf16.gmra.mrb[76].mxu1 %v4548_v19 }
 0x342   : > { %v8147_v58 = vpop.f32.mrb[40].mxu0 }
 0x343   : > { %v8149_v17 = vpop.f32.mrb[41].mxu0 }
 0x344   : > { %v8151_v0 = vpop.f32.mrb[42].mxu0 }
 0x345   : > { %v8153_v1 = vpop.f32.mrb[43].mxu0 }
 0x34a   : > { %v8165_v46 = vpop.f32.mrb[44].mxu0 }
 0x36e   : > { %v5948_v3 = vpop.f32.mrb[16].mxu1 }
 0x36f   : > { %v5949_v4 = vpop.f32.mrb[17].mxu1 }
 0x370   : > { %v5950_v5 = vadd.f32 %v5949_v4, %v5948_v3  ;;  %v5951_v14 = vpop.f32.mrb[18].mxu1 }
 0x371   : > { %v5952_v24 = vpop.f32.mrb[19].mxu1 }
 0x372   : > { %v4785_v30 = vadd.f32 %v5950_v5, %v8158_v25  ;;  %v5953_v28 = vadd.f32 %v5952_v24, %v5951_v14 }
 0x374   : > { %v4946_v39 = vadd.f32 %v7983_v21, %v4785_v30  ;;  %v4788_v2 = vadd.f32 %v5953_v28, %v8158_v25  ;;  %v8168_v21 = vpop.f32.mrb[45].mxu0 }
 0x375   : > { %v8170_v47 = vpop.f32.mrb[46].mxu0 }
 0x376   : > { %v4949_v18 = vadd.f32 %v7990_v29, %v4788_v2  ;;  %v5072_v22 = vmax.f32 %v4946_v39, 0.0  ;;  %v8174_v49 = vpop.f32.mrb[47].mxu0 }
 0x378   : > { %v5073_v23 = vmax.f32 %v4949_v18, 0.0 }
 0x37a   : > { %v5104_v20 = vpack.c.bf16 %v5073_v23, %v5072_v22 }
 0x37c   : > { %6156 = vmatprep.mubr.msk.bf16.mxu0 %vm3450_vm15, %v5104_v20 }
 0x38c   : > { %v5954_v38 = vpop.f32.mrb[20].mxu1 }
 0x38d   : > { %v5955_v37 = vpop.f32.mrb[21].mxu1 }
 0x38e   : > { %v5956_v34 = vadd.f32 %v5955_v37, %v5954_v38  ;;  %v5957_v45 = vpop.f32.mrb[22].mxu1 }
 0x38f   : > { %v5958_v42 = vpop.f32.mrb[23].mxu1 }
 0x390   : > { %v4793_v8 = vadd.f32 %v5956_v34, %v8158_v25  ;;  %v5959_v35 = vadd.f32 %v5958_v42, %v5957_v45 }
 0x392   : > { %v4954_v29 = vadd.f32 %v7979_v43, %v4793_v8  ;;  %v4796_v33 = vadd.f32 %v5959_v35, %v8158_v25 }
 0x394   : > { %v4957_v10 = vadd.f32 %v7987_v57, %v4796_v33  ;;  %v5960_v41 = vpop.f32.mrb[24].mxu1  ;;  %v5074_v16 = vmax.f32 %v4954_v29, 0.0 }
 0x395   : > { %v5961_v59 = vpop.f32.mrb[25].mxu1 }
 0x396   : > { %v5075_v53 = vmax.f32 %v4957_v10, 0.0  ;;  %v5962_v6 = vadd.f32 %v5961_v59, %v5960_v41  ;;  %v5963_v44 = vpop.f32.mrb[26].mxu1 }
 0x397   : > { %v5964_v15 = vpop.f32.mrb[27].mxu1 }
 0x398   : > { %v5105_v62 = vpack.c.bf16 %v5075_v53, %v5074_v16  ;;  %v4801_v63 = vadd.f32 %v5962_v6, %v8158_v25  ;;  %v5965_v19 = vadd.f32 %v5964_v15, %v5963_v44 }
 0x39a   : > { %v4962_v3 = vadd.f32 %v8032_v48, %v4801_v63  ;;  %v4804_v43 = vadd.f32 %v5965_v19, %v8158_v25  ;;  %6157 = vmatmul.mubr.msk.bf16.vlgmr.msra.gmra.mrb[48].mxu0 %vm3450_vm15, %v5105_v62 }
 0x39c   : > { %v4965_v4 = vadd.f32 %v8037_v61, %v4804_v43  ;;  %v5076_v57 = vmax.f32 %v4962_v3, 0.0 }
 0x39e   : > { %v5077_v5 = vmax.f32 %v4965_v4, 0.0 }
 0x3a0   : > { %v5106_v14 = vpack.c.bf16 %v5077_v5, %v5076_v57 }
 0x3a2   : > { %6160 = vmatprep.mubr.msk.bf16.mxu0 %vm3450_vm15, %v5106_v14 }
 0x3a8   : > { %v5966_v24 = vpop.f32.mrb[28].mxu1 }
 0x3a9   : > { %v5967_v30 = vpop.f32.mrb[29].mxu1 }
 0x3aa   : > { %v5968_v28 = vadd.f32 %v5967_v30, %v5966_v24  ;;  %v5969_v39 = vpop.f32.mrb[30].mxu1 }
 0x3ab   : > { %v5970_v2 = vpop.f32.mrb[31].mxu1 }
 0x3ac   : > { %v4809_v18 = vadd.f32 %v5968_v28, %v8158_v25  ;;  %v5971_v22 = vadd.f32 %v5970_v2, %v5969_v39 }
 0x3ae   : > { %v4970_v48 = vadd.f32 %v8027_v55, %v4809_v18  ;;  %v4812_v23 = vadd.f32 %v5971_v22, %v8158_v25 }
 0x3b0   : > { %v4973_v20 = vadd.f32 %v8034_v60, %v4812_v23  ;;  %v5972_v61 = vpop.f32.mrb[32].mxu1  ;;  %v5078_v37 = vmax.f32 %v4970_v48, 0.0 }
 0x3b1   : > { %v5973_v38 = vpop.f32.mrb[33].mxu1 }
 0x3b2   : > { %v5079_v34 = vmax.f32 %v4973_v20, 0.0  ;;  %v5974_v45 = vadd.f32 %v5973_v38, %v5972_v61  ;;  %v5975_v42 = vpop.f32.mrb[34].mxu1 }
 0x3b3   : > { %v5976_v8 = vpop.f32.mrb[35].mxu1 }
 0x3b4   : > { %v5107_v35 = vpack.c.bf16 %v5079_v34, %v5078_v37  ;;  %v4817_v29 = vadd.f32 %v5974_v45, %v8158_v25  ;;  %v5977_v33 = vadd.f32 %v5976_v8, %v5975_v42 }
 0x3b6   : > { %v4978_v10 = vadd.f32 %v8061_v36, %v4817_v29  ;;  %v4820_v41 = vadd.f32 %v5977_v33, %v8158_v25  ;;  %6161 = vmatmul.mubr.msk.bf16.gmra.mrb[52].mxu0 %vm3450_vm15, %v5107_v35 }
 0x3b8   : > { %v4981_v55 = vadd.f32 %v8065_v40, %v4820_v41  ;;  %v5080_v60 = vmax.f32 %v4978_v10, 0.0 }
 0x3ba   : > { %v5081_v59 = vmax.f32 %v4981_v55, 0.0 }
 0x3bc   : > { %v5108_v16 = vpack.c.bf16 %v5081_v59, %v5080_v60 }
 0x3be   : > { %6164 = vmatprep.mubr.msk.bf16.mxu0 %vm3450_vm15, %v5108_v16 }
 0x3c0   : > { %v5978_v53 = vpop.f32.mrb[36].mxu1 }
 0x3c1   : > { %v5979_v6 = vpop.f32.mrb[37].mxu1 }
 0x3c2   : > { %v5980_v44 = vadd.f32 %v5979_v6, %v5978_v53  ;;  %v5981_v15 = vpop.f32.mrb[38].mxu1 }
 0x3c3   : > { %v5982_v62 = vpop.f32.mrb[39].mxu1 }
 0x3c4   : > { %v4825_v63 = vadd.f32 %v5980_v44, %v8158_v25  ;;  %v5983_v19 = vadd.f32 %v5982_v62, %v5981_v15 }
 0x3c6   : > { %v4986_v36 = vadd.f32 %v8058_v26, %v4825_v63  ;;  %v4828_v3 = vadd.f32 %v5983_v19, %v8158_v25 }
 0x3c8   : > { %v4989_v43 = vadd.f32 %v8063_v27, %v4828_v3  ;;  %v5984_v40 = vpop.f32.mrb[40].mxu1  ;;  %v5082_v57 = vmax.f32 %v4986_v36, 0.0 }
 0x3c9   : > { %v5985_v4 = vpop.f32.mrb[41].mxu1 }
 0x3ca   : > { %v5083_v5 = vmax.f32 %v4989_v43, 0.0  ;;  %v5986_v14 = vadd.f32 %v5985_v4, %v5984_v40  ;;  %v5987_v24 = vpop.f32.mrb[42].mxu1 }
 0x3cb   : > { %v5988_v30 = vpop.f32.mrb[43].mxu1 }
 0x3cc   : > { %v5109_v28 = vpack.c.bf16 %v5083_v5, %v5082_v57  ;;  %v4833_v39 = vadd.f32 %v5986_v14, %v8158_v25  ;;  %v5989_v2 = vadd.f32 %v5988_v30, %v5987_v24 }
 0x3ce   : > { %v4994_v18 = vadd.f32 %v8088_v31, %v4833_v39  ;;  %v4836_v22 = vadd.f32 %v5989_v2, %v8158_v25  ;;  %6165 = vmatmul.mubr.msk.bf16.gmra.mrb[56].mxu0 %vm3450_vm15, %v5109_v28 }
 0x3d0   : > { %v4997_v26 = vadd.f32 %v8093_v52, %v4836_v22  ;;  %v5990_v27 = vpop.f32.mrb[44].mxu1  ;;  %v5084_v23 = vmax.f32 %v4994_v18, 0.0 }
 0x3d1   : > { %v5991_v48 = vpop.f32.mrb[45].mxu1 }
 0x3d2   : > { %v5085_v20 = vmax.f32 %v4997_v26, 0.0  ;;  %v5992_v61 = vadd.f32 %v5991_v48, %v5990_v27  ;;  %v5993_v38 = vpop.f32.mrb[46].mxu1 }
 0x3d3   : > { %v5994_v37 = vpop.f32.mrb[47].mxu1 }
 0x3d4   : > { %v5110_v34 = vpack.c.bf16 %v5085_v20, %v5084_v23  ;;  %v4841_v45 = vadd.f32 %v5992_v61, %v8158_v25  ;;  %v5995_v42 = vadd.f32 %v5994_v37, %v5993_v38 }
 0x3d6   : > { %v5002_v8 = vadd.f32 %v8086_v50, %v4841_v45  ;;  %v4844_v31 = vadd.f32 %v5995_v42, %v8158_v25  ;;  %6168 = vmatprep.mubr.msk.bf16.mxu0 %vm3450_vm15, %v5110_v34 }
 0x3d8   : > { %v5005_v35 = vadd.f32 %v8090_v7, %v4844_v31  ;;  %v5996_v52 = vpop.f32.mrb[48].mxu1  ;;  %v5086_v33 = vmax.f32 %v5002_v8, 0.0 }
 0x3d9   : > { %v5997_v29 = vpop.f32.mrb[49].mxu1 }
 0x3da   : > { %v5087_v10 = vmax.f32 %v5005_v35, 0.0  ;;  %v5998_v41 = vadd.f32 %v5997_v29, %v5996_v52  ;;  %v5999_v55 = vpop.f32.mrb[50].mxu1 }
 0x3db   : > { %v6000_v60 = vpop.f32.mrb[51].mxu1 }
 0x3dc   : > { %v5111_v59 = vpack.c.bf16 %v5087_v10, %v5086_v33  ;;  %v4849_v16 = vadd.f32 %v5998_v41, %v8158_v25  ;;  %v6001_v53 = vadd.f32 %v6000_v60, %v5999_v55 }
 0x3de   : > { %v5010_v6 = vadd.f32 %v8110_v13, %v4849_v16  ;;  %v4852_v50 = vadd.f32 %v6001_v53, %v8158_v25  ;;  %6169 = vmatmul.mubr.msk.bf16.gmra.mrb[60].mxu0 %vm3450_vm15, %v5111_v59 }
 0x3e0   : > { %v5013_v44 = vadd.f32 %v8115_v32, %v4852_v50  ;;  %v6002_v7 = vpop.f32.mrb[52].mxu1  ;;  %v5088_v62 = vmax.f32 %v5010_v6, 0.0 }
 0x3e1   : > { %v6003_v15 = vpop.f32.mrb[53].mxu1 }
 0x3e2   : > { %v5089_v63 = vmax.f32 %v5013_v44, 0.0  ;;  %v6004_v19 = vadd.f32 %v6003_v15, %v6002_v7  ;;  %v6005_v36 = vpop.f32.mrb[54].mxu1 }
 0x3e3   : > { %v6006_v3 = vpop.f32.mrb[55].mxu1 }
 0x3e4   : > { %v5112_v43 = vpack.c.bf16 %v5089_v63, %v5088_v62  ;;  %v4857_v40 = vadd.f32 %v6004_v19, %v8158_v25  ;;  %v6007_v4 = vadd.f32 %v6006_v3, %v6005_v36 }
 0x3e6   : > { %v5018_v57 = vadd.f32 %v8108_v9, %v4857_v40  ;;  %v4860_v13 = vadd.f32 %v6007_v4, %v8158_v25  ;;  %6172 = vmatprep.mubr.msk.bf16.mxu0 %vm3450_vm15, %v5112_v43 }
 0x3e8   : > { %v5021_v5 = vadd.f32 %v8112_v11, %v4860_v13  ;;  %v6008_v32 = vpop.f32.mrb[56].mxu1  ;;  %v5090_v24 = vmax.f32 %v5018_v57, 0.0 }
 0x3e9   : > { %v6009_v14 = vpop.f32.mrb[57].mxu1 }
 0x3ea   : > { %v5091_v30 = vmax.f32 %v5021_v5, 0.0  ;;  %v6010_v28 = vadd.f32 %v6009_v14, %v6008_v32  ;;  %v6011_v39 = vpop.f32.mrb[58].mxu1 }
 0x3eb   : > { %v6012_v2 = vpop.f32.mrb[59].mxu1 }
 0x3ec   : > { %v5113_v18 = vpack.c.bf16 %v5091_v30, %v5090_v24  ;;  %v4865_v22 = vadd.f32 %v6010_v28, %v8158_v25  ;;  %v6013_v26 = vadd.f32 %v6012_v2, %v6011_v39 }
 0x3ee   : > { %v5026_v27 = vadd.f32 %v8135_v51, %v4865_v22  ;;  %v4868_v9 = vadd.f32 %v6013_v26, %v8158_v25  ;;  %6173 = vmatmul.mubr.msk.bf16.gmra.mrb[64].mxu0 %vm3450_vm15, %v5113_v18 }
 0x3f0   : > { %v5029_v48 = vadd.f32 %v8140_v56, %v4868_v9  ;;  %v6014_v11 = vpop.f32.mrb[60].mxu1  ;;  %v5092_v20 = vmax.f32 %v5026_v27, 0.0 }
 0x3f1   : > { %v6015_v23 = vpop.f32.mrb[61].mxu1 }
 0x3f2   : > { %v5093_v61 = vmax.f32 %v5029_v48, 0.0  ;;  %v6016_v38 = vadd.f32 %v6015_v23, %v6014_v11  ;;  %v6017_v37 = vpop.f32.mrb[62].mxu1 }
 0x3f3   : > { %v6018_v34 = vpop.f32.mrb[63].mxu1 }
 0x3f4   : > { %v5114_v45 = vpack.c.bf16 %v5093_v61, %v5092_v20  ;;  %v4873_v42 = vadd.f32 %v6016_v38, %v8158_v25  ;;  %v6019_v8 = vadd.f32 %v6018_v34, %v6017_v37 }
 0x3f6   : > { %v5034_v31 = vadd.f32 %v8133_v12, %v4873_v42  ;;  %v4876_v51 = vadd.f32 %v6019_v8, %v8158_v25  ;;  %6176 = vmatprep.mubr.msk.bf16.mxu0 %vm3450_vm15, %v5114_v45  ;;  %v8254_v45 = vld [vmem:[%s8381_s7] ss:$0 sm:$0xff] }
 0x3f8   : > { %v5037_v35 = vadd.f32 %v8137_v54, %v4876_v51  ;;  %v6020_v56 = vpop.f32.mrb[64].mxu1  ;;  %v5094_v29 = vmax.f32 %v5034_v31, 0.0 }
 0x3f9   : > { %v6021_v52 = vpop.f32.mrb[65].mxu1 }
 0x3fa   : > { %v5095_v33 = vmax.f32 %v5037_v35, 0.0  ;;  %v6022_v10 = vadd.f32 %v6021_v52, %v6020_v56  ;;  %v6023_v41 = vpop.f32.mrb[66].mxu1 }
 0x3fb   : > { %v6024_v55 = vpop.f32.mrb[67].mxu1 }
 0x3fc   : > { %v5115_v60 = vpack.c.bf16 %v5095_v33, %v5094_v29  ;;  %v4881_v59 = vadd.f32 %v6022_v10, %v8158_v25  ;;  %v6025_v16 = vadd.f32 %v6024_v55, %v6023_v41 }
 0x3fe   : > { %v5042_v53 = vadd.f32 %v8149_v17, %v4881_v59  ;;  %v4884_v12 = vadd.f32 %v6025_v16, %v8158_v25  ;;  %6177 = vmatmul.mubr.msk.bf16.gmra.mrb[68].mxu0 %vm3450_vm15, %v5115_v60 }
 0x400   : > { %v5045_v6 = vadd.f32 %v8153_v1, %v4884_v12  ;;  %v6026_v54 = vpop.f32.mrb[68].mxu1  ;;  %v5096_v44 = vmax.f32 %v5042_v53, 0.0 }
 0x401   : > { %v6027_v50 = vpop.f32.mrb[69].mxu1 }
 0x402   : > { %v5097_v7 = vmax.f32 %v5045_v6, 0.0  ;;  %v6028_v15 = vadd.f32 %v6027_v50, %v6026_v54  ;;  %v6029_v62 = vpop.f32.mrb[70].mxu1 }
 0x403   : > { %v6030_v63 = vpop.f32.mrb[71].mxu1 }
 0x404   : > { %v5116_v19 = vpack.c.bf16 %v5097_v7, %v5096_v44  ;;  %v4889_v36 = vadd.f32 %v6028_v15, %v8158_v25  ;;  %v6031_v3 = vadd.f32 %v6030_v63, %v6029_v62 }
 0x406   : > { %v5050_v43 = vadd.f32 %v8147_v58, %v4889_v36  ;;  %v4892_v17 = vadd.f32 %v6031_v3, %v8158_v25  ;;  %6180 = vmatprep.mubr.msk.bf16.mxu0 %vm3450_vm15, %v5116_v19 }
 0x408   : > { %v5053_v40 = vadd.f32 %v8151_v0, %v4892_v17  ;;  %v6032_v1 = vpop.f32.mrb[72].mxu1  ;;  %v5098_v57 = vmax.f32 %v5050_v43, 0.0 }
 0x409   : > { %v6033_v4 = vpop.f32.mrb[73].mxu1 }
 0x40a   : > { %v5099_v13 = vmax.f32 %v5053_v40, 0.0  ;;  %v6034_v5 = vadd.f32 %v6033_v4, %v6032_v1  ;;  %v6035_v32 = vpop.f32.mrb[74].mxu1 }
 0x40b   : > { %v6036_v14 = vpop.f32.mrb[75].mxu1 }
 0x40c   : > { %v5117_v24 = vpack.c.bf16 %v5099_v13, %v5098_v57  ;;  %v6037_v30 = vadd.f32 %v6036_v14, %v6035_v32  ;;  %v4897_v28 = vadd.f32 %v6034_v5, %v8158_v25 }
 0x40e   : > { %v5058_v39 = vadd.f32 %v8168_v21, %v4897_v28  ;;  %6181 = vmatmul.mubr.msk.bf16.gmra.mrb[72].mxu0 %vm3450_vm15, %v5117_v24  ;;  %v4900_v58 = vadd.f32 %v6037_v30, %v8158_v25 }
 0x410   : > { %v5061_v2 = vadd.f32 %v8174_v49, %v4900_v58  ;;  %v6038_v0 = vpop.f32.mrb[76].mxu1  ;;  %v5100_v22 = vmax.f32 %v5058_v39, 0.0 }
 0x411   : > { %v6039_v18 = vpop.f32.mrb[77].mxu1 }
 0x412   : > { %v5101_v26 = vmax.f32 %v5061_v2, 0.0  ;;  %v6040_v27 = vadd.f32 %v6039_v18, %v6038_v0  ;;  %v6041_v9 = vpop.f32.mrb[78].mxu1 }
 0x413   : > { %v6042_v48 = vpop.f32.mrb[79].mxu1 }
 0x414   : > { %v5118_v11 = vpack.c.bf16 %v5101_v26, %v5100_v22  ;;  %v4905_v23 = vadd.f32 %v6040_v27, %v8158_v25  ;;  %v6043_v20 = vadd.f32 %v6042_v48, %v6041_v9 }
 0x416   : > { %v5066_v21 = vadd.f32 %v8165_v46, %v4905_v23  ;;  %v4908_v61 = vadd.f32 %v6043_v20, %v8158_v25  ;;  %6184 = vmatprep.mubr.msk.bf16.mxu0 %vm3450_vm15, %v5118_v11 }
 0x418   : > { %v5069_v49 = vadd.f32 %v8170_v47, %v4908_v61  ;;  %v5102_v38 = vmax.f32 %v5066_v21, 0.0 }
 0x41a   : > { %v5103_v37 = vmax.f32 %v5069_v49, 0.0 }
 0x41c   : > { %v5119_v34 = vpack.c.bf16 %v5103_v37, %v5102_v38 }
 0x41e   : > { %6185 = vmatmul.mubr.msk.bf16.gmra.mrb[76].mxu0 %vm3450_vm15, %v5119_v34 }
 0x46d   : > { %v6158_v46 = vpop.f32.mrb[48].mxu0 }
 0x46e   : > { %v5234_v25 = vadd.f32 %v6158_v46, %v8254_v45  ;;  %v5225_v42 = vpop.f32.mrb[49].mxu0 }
 0x46f   : > { %v5226_v8 = vadd.f32 %v8254_v45, %v5225_v42  ;;  %v6159_v47 = vpop.f32.mrb[50].mxu0 }
 0x470   : > { %5354 = vst [vmem:[%s8258_s27 + $0x10] sm:$0xff] %v5234_v25  ;;  %v5237_v31 = vadd.f32 %v6159_v47, %v8254_v45  ;;  %v5228_v51 = vpop.f32.mrb[51].mxu0 }
 0x471   : > { %5352 = vst [vmem:[%s8258_s27] sm:$0xff] %v5226_v8  ;;  %v5229_v35 = vadd.f32 %v8254_v45, %v5228_v51 }
 0x472   : > { %5355 = vst [vmem:[%s8258_s27 + $0x18] sm:$0xff] %v5237_v31 }
 0x473   : > { %5353 = vst [vmem:[%s8258_s27 + $0x8] sm:$0xff] %v5229_v35 }
 0x489   : > { %v6162_v56 = vpop.f32.mrb[52].mxu0 }
 0x48a   : > { %v5250_v52 = vadd.f32 %v6162_v56, %v8254_v45  ;;  %v5241_v29 = vpop.f32.mrb[53].mxu0 }
 0x48b   : > { %v5242_v33 = vadd.f32 %v8254_v45, %v5241_v29  ;;  %v6163_v10 = vpop.f32.mrb[54].mxu0 }
 0x48c   : > { %5358 = vst [vmem:[%s8258_s27 + $0x30] sm:$0xff] %v5250_v52  ;;  %v5253_v41 = vadd.f32 %v6163_v10, %v8254_v45  ;;  %v5244_v55 = vpop.f32.mrb[55].mxu0 }
 0x48d   : > { %5356 = vst [vmem:[%s8258_s27 + $0x20] sm:$0xff] %v5242_v33  ;;  %v5245_v60 = vadd.f32 %v8254_v45, %v5244_v55 }
 0x48e   : > { %5359 = vst [vmem:[%s8258_s27 + $0x38] sm:$0xff] %v5253_v41 }
 0x48f   : > { %5357 = vst [vmem:[%s8258_s27 + $0x28] sm:$0xff] %v5245_v60 }
 0x4a1   : > { %v6166_v59 = vpop.f32.mrb[56].mxu0 }
 0x4a2   : > { %v5266_v16 = vadd.f32 %v6166_v59, %v8254_v45  ;;  %v5257_v53 = vpop.f32.mrb[57].mxu0 }
 0x4a3   : > { %v5258_v12 = vadd.f32 %v8254_v45, %v5257_v53  ;;  %v6167_v6 = vpop.f32.mrb[58].mxu0 }
 0x4a4   : > { %5362 = vst [vmem:[%s8258_s27 + $0x50] sm:$0xff] %v5266_v16  ;;  %v5269_v54 = vadd.f32 %v6167_v6, %v8254_v45  ;;  %v5260_v50 = vpop.f32.mrb[59].mxu0 }
 0x4a5   : > { %5360 = vst [vmem:[%s8258_s27 + $0x40] sm:$0xff] %v5258_v12  ;;  %v5261_v44 = vadd.f32 %v8254_v45, %v5260_v50 }
 0x4a6   : > { %5363 = vst [vmem:[%s8258_s27 + $0x58] sm:$0xff] %v5269_v54 }
 0x4a7   : > { %5361 = vst [vmem:[%s8258_s27 + $0x48] sm:$0xff] %v5261_v44 }
 0x4b1   : > { %v6170_v7 = vpop.f32.mrb[60].mxu0 }
 0x4b2   : > { %v5282_v15 = vadd.f32 %v6170_v7, %v8254_v45  ;;  %v5273_v62 = vpop.f32.mrb[61].mxu0 }
 0x4b3   : > { %v5274_v63 = vadd.f32 %v8254_v45, %v5273_v62  ;;  %v6171_v19 = vpop.f32.mrb[62].mxu0 }
 0x4b4   : > { %5366 = vst [vmem:[%s8258_s27 + $0x70] sm:$0xff] %v5282_v15  ;;  %v5285_v36 = vadd.f32 %v6171_v19, %v8254_v45  ;;  %v5276_v3 = vpop.f32.mrb[63].mxu0 }
 0x4b5   : > { %5364 = vst [vmem:[%s8258_s27 + $0x60] sm:$0xff] %v5274_v63  ;;  %v5277_v43 = vadd.f32 %v8254_v45, %v5276_v3 }
 0x4b6   : > { %5367 = vst [vmem:[%s8258_s27 + $0x78] sm:$0xff] %v5285_v36 }
 0x4b7   : > { %5365 = vst [vmem:[%s8258_s27 + $0x68] sm:$0xff] %v5277_v43 }
 0x4c1   : > { %v6174_v17 = vpop.f32.mrb[64].mxu0 }
 0x4c2   : > { %v5298_v40 = vadd.f32 %v6174_v17, %v8254_v45  ;;  %v5289_v1 = vpop.f32.mrb[65].mxu0 }
 0x4c3   : > { %v5290_v4 = vadd.f32 %v8254_v45, %v5289_v1  ;;  %v6175_v57 = vpop.f32.mrb[66].mxu0 }
 0x4c4   : > { %5370 = vst [vmem:[%s8258_s27 + $0x90] sm:$0xff] %v5298_v40  ;;  %v5301_v13 = vadd.f32 %v6175_v57, %v8254_v45  ;;  %v5292_v5 = vpop.f32.mrb[67].mxu0 }
 0x4c5   : > { %5368 = vst [vmem:[%s8258_s27 + $0x80] sm:$0xff] %v5290_v4  ;;  %v5293_v32 = vadd.f32 %v8254_v45, %v5292_v5 }
 0x4c6   : > { %5371 = vst [vmem:[%s8258_s27 + $0x98] sm:$0xff] %v5301_v13 }
 0x4c7   : > { %5369 = vst [vmem:[%s8258_s27 + $0x88] sm:$0xff] %v5293_v32 }
 0x4d1   : > { %v6178_v14 = vpop.f32.mrb[68].mxu0 }
 0x4d2   : > { %v5314_v24 = vadd.f32 %v6178_v14, %v8254_v45  ;;  %v5305_v30 = vpop.f32.mrb[69].mxu0 }
 0x4d3   : > { %v5306_v28 = vadd.f32 %v8254_v45, %v5305_v30  ;;  %v6179_v39 = vpop.f32.mrb[70].mxu0 }
 0x4d4   : > { %5374 = vst [vmem:[%s8258_s27 + $0xb0] sm:$0xff] %v5314_v24  ;;  %v5317_v58 = vadd.f32 %v6179_v39, %v8254_v45  ;;  %v5308_v2 = vpop.f32.mrb[71].mxu0 }
 0x4d5   : > { %5372 = vst [vmem:[%s8258_s27 + $0xa0] sm:$0xff] %v5306_v28  ;;  %v5309_v0 = vadd.f32 %v8254_v45, %v5308_v2 }
 0x4d6   : > { %5375 = vst [vmem:[%s8258_s27 + $0xb8] sm:$0xff] %v5317_v58 }
 0x4d7   : > { %5373 = vst [vmem:[%s8258_s27 + $0xa8] sm:$0xff] %v5309_v0 }
 0x4e1   : > { %v6182_v18 = vpop.f32.mrb[72].mxu0 }
 0x4e2   : > { %v5330_v22 = vadd.f32 %v6182_v18, %v8254_v45  ;;  %v5321_v26 = vpop.f32.mrb[73].mxu0 }
 0x4e3   : > { %v5322_v27 = vadd.f32 %v8254_v45, %v5321_v26  ;;  %v6183_v9 = vpop.f32.mrb[74].mxu0 }
 0x4e4   : > { %5378 = vst [vmem:[%s8258_s27 + $0xd0] sm:$0xff] %v5330_v22  ;;  %v5333_v48 = vadd.f32 %v6183_v9, %v8254_v45  ;;  %v5324_v11 = vpop.f32.mrb[75].mxu0 }
 0x4e5   : > { %5376 = vst [vmem:[%s8258_s27 + $0xc0] sm:$0xff] %v5322_v27  ;;  %v5325_v23 = vadd.f32 %v8254_v45, %v5324_v11 }
 0x4e6   : > { %5379 = vst [vmem:[%s8258_s27 + $0xd8] sm:$0xff] %v5333_v48 }
 0x4e7   : > { %5377 = vst [vmem:[%s8258_s27 + $0xc8] sm:$0xff] %v5325_v23 }
 0x4f1   : > { %v6186_v20 = vpop.f32.mrb[76].mxu0 }
 0x4f2   : > { %v5346_v21 = vadd.f32 %v6186_v20, %v8254_v45  ;;  %v5337_v61 = vpop.f32.mrb[77].mxu0 }
 0x4f3   : > { %v5338_v49 = vadd.f32 %v8254_v45, %v5337_v61  ;;  %v6187_v38 = vpop.f32.mrb[78].mxu0 }
 0x4f4   : > { %5382 = vst [vmem:[%s8258_s27 + $0xf0] sm:$0xff] %v5346_v21  ;;  %v5349_v37 = vadd.f32 %v6187_v38, %v8254_v45  ;;  %v5340_v34 = vpop.f32.mrb[79].mxu0 }
 0x4f5   : > { %5380 = vst [vmem:[%s8258_s27 + $0xe0] sm:$0xff] %v5338_v49  ;;  %v5341_v46 = vadd.f32 %v8254_v45, %v5340_v34 }
 0x4f6   : > { %5383 = vst [vmem:[%s8258_s27 + $0xf8] sm:$0xff] %v5349_v37 }
 0x4f7   : > { %5381 = vst [vmem:[%s8258_s27 + $0xe8] sm:$0xff] %v5341_v46 }
 0x4f8   : > { %6375 = shalt.err (!%p6372_p3)
}
 0x4f9   : > { %s6376_s17 = scalar_lea.hbm %s8323_s21, 4096  ;;  %s6380_s28 = scalar_lea.hbm %s8383_s9, 8192 }
 0x4fa   : > { %p6377_p4 = scmp.ne.s32.totalorder %s8323_s21, %s6376_s17  ;;  %p6381_p9 = scmp.lt.u32.totalorder %s8323_s21, %s8383_s9 }
 0x4fb   : > { %p6382_p10 = scmp.lt.u32.totalorder %s6380_s28, %s6376_s17  ;;  %p6384_p12 = scmp.lt.u32.totalorder %s6376_s17, %s8323_s21 }
 0x4fc   : > { %p6378_p7 = pnand %p6377_p4, %p6527_p5 }
 0x4fd   : > { %p6383_p11 = por %p6382_p10, %p6381_p9 }
 0x4fe   : > { %p6379_p8 = pneg %p6378_p7 }
 0x4ff   : > { %p6385_p13 = por %p6384_p12, %p6383_p11 }
 0x501   : > { %p6386_p0 = pnand %p6385_p13, %p6379_p8 }
 0x503   : > { %6389 = shalt.err (!%p6386_p0)
}
 0x504   : > { %s6437_s14 = smov 128   ;;  %s6438_s16 = smov 8  }
 0x505   : > { %6193 = dma.vmem_to_hbm [thread:$0]  (%p6527_p5), %s8325_s25, 4096, %s8323_s21, %s8333_s13, %s6437_s14, %s6437_s14, %s6438_s16  }
 0x506 PF: > { %p6199_p1 = scmp.ge.s32.totalorder %s6424_s12, 2  ;;  %s5429_s22 = sand.u32 1, %s6412_s30  }
 0x507   : > { %s5430_s23 = scalar_lea.sflag [#allocation6], %s5429_s22 }
 0x508   : > { %p6196_p2 = pnand %p6199_p1, %p6531_p6 }
 0x50a   : > { %6407 = dma.done.wait (!%p6196_p2), %s5430_s23, 4096  }
 0x50b   : > { %6409 = vsyncadd (!%p6196_p2), %s5430_s23, 4294963200  ;;  %p20_p3 = scmp.ge.s32.totalorder %s6514_s15, 4   ;;  %s8388_s30 = smov %s6416_s10 }
 0x50c   : > { %s8389_s10 = smov %s6420_s11  ;;  %s8390_s11 = smov %s6525_s18 }
 0x50d   : > { %s8391_s12 = smov %s6514_s15  ;;  %22 = sbr.rel (!%p20_p3) target bundleno = 3 (0x3), region = 105 }
 0x514   :  { %5435 = vsyncpa [#allocation6], 1 }
 0x515   :  { %5437 = vsyncpa [#allocation6 + $0x1], 1 }

</bundles_post_ra>
